<compile_context>
chip_gen: v6e
topology: v6e:2x2x1
jax: 0.10.0
libtpu: 0.0.40
codegen_flags: <defaults>
</compile_context>

<pallas_src>
import functools

import jax
import jax.numpy as jnp
from jax.experimental import pallas as pl
from jax.experimental.pallas import tpu as pltpu

_LANE = 128
_SMALL_INPUT_BYTES = 1 << 20            # below this, XLA's fused reduce wins
_VMEM_LIMIT_BYTES = 32 * 1024 * 1024
_MAX_BLOCK_BYTES = 6 * 1024 * 1024      # ceiling for one (sublane-padded) input block


def _is_v7x():
    try:
        kind = jax.devices()[0].device_kind.lower().replace(" ", "")
        return ("v7" in kind) or ("tpu7" in kind)
    except Exception:
        return False


def _pack_factor(itemsize):
    # sublane packing: rows of a vreg per dtype width
    return {1: 32, 2: 16, 4: 8}.get(int(itemsize), 8)


def _divisors_desc(n):
    return [d for d in range(n, 0, -1) if n % d == 0]


def _pick_tiles(B, T, D, itemsize, *, is_v7x):
    """Choose (TB, TD, TT) + grid so blocks are big, contiguous, lane-dense and
    fit VMEM on every generation (accounting for sublane packing)."""
    pack = _pack_factor(itemsize)
    t_pad = -(-T // pack) * pack
    target_bytes = (4 if is_v7x else 2) * 1024 * 1024

    def row_bytes(td, tt_pad=t_pad):
        return tt_pad * td * itemsize

    # ---- lane (feature) tiling: prefer full D => fully contiguous HBM slabs ----
    td = D
    if row_bytes(D) > _MAX_BLOCK_BYTES:
        for cand in _divisors_desc(D):
            if cand % _LANE == 0 and row_bytes(cand) <= _MAX_BLOCK_BYTES:
                td = cand
                break
        # If no lane-dense divisor fits, keep td = D and split T instead.
    grid_d = D // td

    # ---- segment (reduction) tiling: only when a single row block is too big ----
    if row_bytes(td) > _MAX_BLOCK_BYTES:
        tt = None
        for req in (pack, 8, 1):            # prefer sublane-aligned chunks
            for cand in _divisors_desc(T):
                if cand % req:
                    continue
                cand_pad = -(-cand // pack) * pack
                if cand_pad * td * itemsize <= target_bytes:
                    tt = cand
                    break
            if tt is not None:
                break
        if tt is None:
            tt = 1
    else:
        tt = T
    grid_t = T // tt
    tt_pad = -(-tt // pack) * pack

    # ---- batch tiling: big blocks, but keep enough steps for pipelining ----
    per_batch = tt_pad * td * itemsize
    tb_budget = max(1, target_bytes // per_batch)
    if grid_d * grid_t == 1 and B > 1:
        min_steps = 8 if (is_v7x and B >= 16) else 2
        floor_tb = max(1, (1 << 20) // per_batch)   # don't shrink blocks below ~1 MiB
        tb_budget = min(tb_budget, max(B // min_steps, floor_tb, 1))

    divs = [d for d in _divisors_desc(B) if d <= tb_budget] or [1]
    tb = divs[0]
    if is_v7x:
        # prefer an even number of parallel grid steps (tail balance across 2 TCs)
        even = [d for d in divs if ((B // d) * grid_d) % 2 == 0]
        if even:
            tb = even[0]
    grid_b = B // tb
    return tb, td, tt, grid_b, grid_d, grid_t


def _input_block_spec(block_shape, index_map, extra_buffering):
    if extra_buffering:
        try:
            return pl.BlockSpec(block_shape, index_map, pipeline_mode=pl.Buffered(3))
        except Exception:   # older jax without pipeline_mode / Buffered
            pass
    return pl.BlockSpec(block_shape, index_map)


def _avg_kernel(x_ref, o_ref, *, inv_t, keep_mid):
    # x_ref: (TB, T, TD); o_ref: (TB, TD) if dense 2-D out, else (TB, 1, TD)
    x = x_ref[...].astype(jnp.float32)
    s = jnp.sum(x, axis=1, keepdims=keep_mid)
    o_ref[...] = (s * inv_t).astype(o_ref.dtype)


def _avg_acc_kernel(x_ref, o_ref, acc_ref, *, inv_t, keep_mid):
    # Segment axis split across grid axis 2 ("arbitrary"); f32 accumulator.
    @pl.when(pl.program_id(2) == 0)
    def _init():
        acc_ref[...] = jnp.zeros_like(acc_ref)

    x = x_ref[...].astype(jnp.float32)
    acc_ref[...] += jnp.sum(x, axis=1, keepdims=keep_mid)

    @pl.when(pl.program_id(2) == pl.num_programs(2) - 1)
    def _done():
        o_ref[...] = (acc_ref[...] * inv_t).astype(o_ref.dtype)


def consensus_module(x, consensus_type='avg', dim=1):
    """JAX/Pallas equivalent of ConsensusModule.forward."""
    consensus_type = 'identity' if consensus_type == 'rnn' else consensus_type

    if consensus_type == 'identity':
        return x                      # pure pass-through
    if consensus_type != 'avg':
        return None                   # PyTorch forward returns None here

    # PyTorch .mean() rejects integer dtypes; we promote the output instead.
    out_dtype = x.dtype if jnp.issubdtype(x.dtype, jnp.floating) else jnp.float32
    itemsize = jnp.dtype(x.dtype).itemsize

    if x.ndim != 3 or dim != 1:
        # General fallback keeps the module semantics for unusual layouts.
        return jnp.mean(x.astype(jnp.float32), axis=dim, keepdims=True).astype(out_dtype)

    B, T, D = x.shape

    # Tiny inputs: fixed pallas_call / pipeline setup overhead dominates.
    if B * T * D * itemsize < _SMALL_INPUT_BYTES:
        return jnp.mean(x.astype(jnp.float32), axis=1, keepdims=True).astype(out_dtype)

    is_v7x = _is_v7x()
    tb, td, tt, grid_b, grid_d, grid_t = _pick_tiles(B, T, D, itemsize, is_v7x=is_v7x)
    inv_t = 1.0 / float(T)

    # Dense 2-D (B, D) output whenever the block satisfies the (8,128) rule;
    # otherwise keep a (TB, 1, TD) block (mid dim equals full output dim 1).
    dense_out = (tb % 8 == 0) or (tb == B)

    if grid_t == 1:
        kernel = functools.partial(_avg_kernel, inv_t=inv_t, keep_mid=not dense_out)
        grid = (grid_b, grid_d)
        in_spec = _input_block_spec((tb, T, td), lambda b, d: (b, 0, d), is_v7x)
        if dense_out:
            out_shape = jax.ShapeDtypeStruct((B, D), out_dtype)
            out_spec = pl.BlockSpec((tb, td), lambda b, d: (b, d))
        else:
            out_shape = jax.ShapeDtypeStruct((B, 1, D), out_dtype)
            out_spec = pl.BlockSpec((tb, 1, td), lambda b, d: (b, 0, d))
        scratch = []
        dims = ("parallel", "parallel")
    else:
        kernel = functools.partial(_avg_acc_kernel, inv_t=inv_t, keep_mid=not dense_out)
        grid = (grid_b, grid_d, grid_t)                    # reduction axis last
        in_spec = _input_block_spec((tb, tt, td), lambda b, d, t: (b, t, d), is_v7x)
        if dense_out:
            out_shape = jax.ShapeDtypeStruct((B, D), out_dtype)
            out_spec = pl.BlockSpec((tb, td), lambda b, d, t: (b, d))
            acc_shape = (tb, td)
        else:
            out_shape = jax.ShapeDtypeStruct((B, 1, D), out_dtype)
            out_spec = pl.BlockSpec((tb, 1, td), lambda b, d, t: (b, 0, d))
            acc_shape = (tb, 1, td)
        scratch = [pltpu.VMEM(acc_shape, jnp.float32)]
        dims = ("parallel", "parallel", "arbitrary")

    out = pl.pallas_call(
        kernel,
        out_shape=out_shape,
        grid_spec=pltpu.PrefetchScalarGridSpec(
            num_scalar_prefetch=0,
            grid=grid,
            in_specs=[in_spec],
            out_specs=out_spec,
            scratch_shapes=scratch,
        ),
        compiler_params=pltpu.CompilerParams(
            dimension_semantics=dims,
            vmem_limit_bytes=_VMEM_LIMIT_BYTES,
        ),
    )(x)

    if dense_out:
        out = out.reshape(B, 1, D)      # free keepdim reshape in the wrapper
    return out


if __name__ == "__main__":
    key = jax.random.PRNGKey(0)
    k0, k1, k2, k3, k4 = jax.random.split(key, 5)

    def check(x, atol=1e-5, rtol=1e-5):
        y = jax.block_until_ready(consensus_module(x, consensus_type='avg', dim=1))
        ref = jnp.mean(x.astype(jnp.float32), axis=1, keepdims=True).astype(y.dtype)
        assert y.shape == (x.shape[0], 1, x.shape[2]), y.shape
        assert jnp.allclose(y.astype(jnp.float32), ref.astype(jnp.float32),
                            atol=atol, rtol=rtol)

    # 1) Dense 2-D output path: TB multiple of 8, lane-dense full-D blocks.
    check(jax.random.normal(k0, (32, 8, 2048), dtype=jnp.float32))

    # 2) TB not a multiple of 8 -> (TB, 1, TD) output fallback, full-D blocks.
    check(jax.random.normal(k1, (4, 8, 16384), dtype=jnp.float32))

    # 3) Degenerate large-T path -> segment-axis grid split + f32 accumulator.
    check(jax.random.normal(k2, (2, 16384, 128), dtype=jnp.float32),
          atol=1e-4, rtol=1e-4)

    # 4) bf16 input: sublane-packing-aware block sizing, f32 accumulation.
    check(jax.random.normal(k3, (32, 8, 2048), dtype=jnp.bfloat16),
          atol=2e-2, rtol=2e-2)

    # 5) Tiny input -> XLA fast path.
    check(jax.random.normal(k4, (2, 8, 32), dtype=jnp.float32))

    # 'identity' and 'rnn' (-> identity) paths: pure pass-through.
    x_small = jax.random.normal(k4, (2, 8, 32), dtype=jnp.float32)
    y_id = jax.block_until_ready(consensus_module(x_small, 'identity', 1))
    assert jnp.array_equal(y_id, x_small)
    y_rnn = jax.block_until_ready(consensus_module(x_small, 'rnn', 1))
    assert jnp.array_equal(y_rnn, x_small)

    print("KERNEL_OK")
</pallas_src>

<mosaic_0001>
module attributes {stable_mosaic.version = 11 : i64} {
  func.func @_avg_kernel(%arg0: i32, %arg1: i32, %arg2: memref<16x8x2048xf32, #tpu.memory_space<vmem>>, %arg3: memref<16x2048xf32, #tpu.memory_space<vmem>>) attributes {dimension_semantics = [#tpu.dimension_semantics<parallel>, #tpu.dimension_semantics<parallel>], iteration_bounds = array<i64: 2, 1>, scalar_prefetch = 0 : i64, scratch_operands = 0 : i64, tpu.core_type = #tpu.core_type<tc>, window_params = [{transform_indices = @transform_0, window_bounds = array<i64: 16, 8, 2048>}, {transform_indices = @transform_1, window_bounds = array<i64: 16, 2048>}]} {
    %c0 = arith.constant 0 : index
    %c0_0 = arith.constant 0 : index
    %c0_1 = arith.constant 0 : index
    %0 = vector.load %arg2[%c0, %c0_0, %c0_1] : memref<16x8x2048xf32, #tpu.memory_space<vmem>>, vector<16x8x2048xf32>
    %cst = arith.constant dense<0.000000e+00> : vector<16x2048xf32>
    %1 = vector.multi_reduction <add>, %0, %cst [1] : vector<16x8x2048xf32> to vector<16x2048xf32>
    %cst_2 = arith.constant 1.250000e-01 : f32
    %2 = vector.broadcast %cst_2 : f32 to vector<16x2048xf32>
    %3 = arith.mulf %1, %2 : vector<16x2048xf32>
    %c0_3 = arith.constant 0 : index
    %c0_4 = arith.constant 0 : index
    %4 = vector.load %arg3[%c0_3, %c0_4] : memref<16x2048xf32, #tpu.memory_space<vmem>>, vector<16x2048xf32>
    tpu.vector_store %arg3[%c0_3, %c0_4], %3 {strides = array<i32>} : memref<16x2048xf32, #tpu.memory_space<vmem>>, vector<16x2048xf32>,
    return
  }
  func.func @transform_0(%arg0: i32, %arg1: i32) -> (i32, i32, i32) {
    %c0_i32 = arith.constant 0 : i32
    %c0_i32_0 = arith.constant 0 : i32
    return %arg0, %c0_i32, %arg1 : i32, i32, i32
  }
  func.func @transform_1(%arg0: i32, %arg1: i32) -> (i32, i32) {
    %c0_i32 = arith.constant 0 : i32
    return %arg0, %arg1 : i32, i32
  }
}

</mosaic_0001>

<bundles_post_ra>
// kernel: tpu_custom_call.1
= control target key start
LH: loop header
LB: loop body
LE: loop exit
PB: predicated region body
PF: predicated region fallthrough
CT: control target
= control target key end

     0   :  { %6 = vsyncpa [#allocation3], 0  ;;  %s5274_s0 = inlined_call_operand.hbm [shape: f32[32,8,2048], index: 0, kind: input, shape index: {}]   ;;  %s5275_s1 = inlined_call_operand.hbm [shape: f32[32,2048], index: 1, kind: output, shape index: {}]  }
   0x1   :  { %8 = vsyncpa [#allocation3 + $0x1], 0 }
   0x2   :  { %9 = vsyncpa [#allocation4], 0 }
   0x3   :  { %11 = vsyncpa [#allocation4 + $0x1], 0  ;;  %s3074_s6 = smov 0   ;;  %s3076_s7 = smov 0  }
   0x4   :  { %s3078_s8 = smov 0   ;;  %s3080_s9 = smov 0  }
   0x5   :  { %s3082_s10 = smov 0   ;;  %s3084_s11 = smov 0  }
   0x6 LB: > { %s2861_s12 = sadd.s32 4294967295, %s3056_s11   ;;  %s2862_s13 = sadd.s32 4294967294, %s3056_s11   ;;  %s3056_s11 = sphi %s3084_s11, %s17_s11   ;;  %s3052_s10 = sphi %s3082_s10, %s6120_s10   ;;  %s3048_s9 = sphi %s3080_s9, %s6119_s9   ;;  %s3044_s8 = sphi %s3078_s8, %s6118_s8   ;;  %s3040_s7 = sphi %s3076_s7, %s6117_s7   ;;  %s3036_s6 = sphi %s3074_s6, %s6116_s6  }
   0x7   : > { %s29_s14 = sadd.s32 1, %s3052_s10  ;;  %s38_s15 = sadd.s32 1, %s3044_s8 }
   0x8   : > { %p31_p0 = scmp.ge.s32.totalorder %s29_s14, 2  ;;  %p45_p1 = scmp.ne.s32.totalorder %s3044_s8, %s3040_s7 }
   0x9   : > { %p46_p2 = scmp.eq.s32.totalorder %s3056_s11, 0  ;;  %p51_p3 = scmp.ne.s32.totalorder %s3040_s7, %s3036_s6 }
   0xa   : > { %s6122_s14 = smov (%p31_p0, %s29_s14), 0  ;;  %p52_p5 = scmp.eq.s32.totalorder %s2861_s12, 0 }
   0xb   : > { %p3115_p4 = por %p46_p2, %p45_p1  ;;  %s33_s17 = ssub.s32 %s3052_s10, %s6122_s14 }
   0xc   : > { %p77_p6 = scmp.eq.s32.totalorder %s2861_s12, 1  ;;  %p36_p7 = scmp.eq.s32.totalorder %s33_s17, 0 }
   0xd   : > { %p3121_p8 = por %p52_p5, %p51_p3  ;;  %p83_p10 = scmp.eq.s32.totalorder %s2862_s13, 1 }
   0xe   : > { %p3125_p9 = por %p77_p6, %p45_p1  ;;  %p2894_p13 = scmp.lt.s32.totalorder %s3056_s11, 2 }
   0xf   : > { %s3130_s20 = scalar_select %p36_p7, %s3044_s8, %s38_s15  }
  0x10   : > { %p3132_p11 = por %p83_p10, %p51_p3  ;;  %s103_s22 = sand.u32 1, %s3044_s8  }
  0x11   : > { %s2865_s23 = sshll.u32 %s103_s22, 11  ;;  %s2879_s24 = sshll.u32 %s3052_s10, 15 }
  0x12   : > { %s116_s27 = scalar_lea.hbm %s5274_s0, %s2879_s24  ;;  %s107_s28 = scalar_lea.vmem [#allocation2], %s2865_s23 }
  0x13   : > { %s117_s29 = sshll.u32 %s107_s28, 4  ;;  %p3145_p0 = pnand %p2894_p13, %p3115_p4  ;;  %s118_s29 = int_to_ptr.vmem [resolvable:$true] %s117_s29 }
  0x14   : > { %p2869_p1 = scmp.ge.s32.totalorder %s3056_s11, 1  ;;  %s104_s2 = scalar_lea.sflag [#allocation3], %s103_s22 }
  0x15   : > { %p2950_p2 = pneg %p3145_p0  ;;  %s2961_s3 = scalar_lea.vmem %s118_s29, 32768 }
  0x16   : > { %p2962_p3 = scmp.ne.s32.totalorder %s118_s29, %s2961_s3  ;;  %s3058_s4 = smov [#allocation2]  }
  0x17   : > { %s2966_s5 = sshll.u32 %s3058_s4, 4  ;;  %s2967_s5 = int_to_ptr.vmem [resolvable:$false] %s2966_s5 }
  0x18   : > { %p2964_p5 = pnand %p2962_p3, %p2950_p2  ;;  %s2968_s12 = scalar_lea.vmem %s2967_s5, 65536 }
  0x19   : > { %p2969_p7 = scmp.lt.s32.totalorder %s118_s29, %s2967_s5  ;;  %p2970_p10 = scmp.lt.s32.totalorder %s2968_s12, %s2961_s3 }
  0x1a   : > { %p2965_p6 = pneg %p2964_p5 }
  0x1b   : > { %p2971_p12 = por %p2970_p10, %p2969_p7 }
  0x1d   : > { %p2972_p4 = pnand %p2971_p12, %p2965_p6 }
  0x1f   : > { %2975 = shalt.err (!%p2972_p4)
}
  0x20   : > { %s3059_s13 = smov 2048   ;;  %s3060_s15 = smov 128  }
  0x21   : > { %2889 = dma.hbm_to_vmem [thread:$0]  (!%p3145_p0), %s116_s27, 32768, %s118_s29, %s104_s2, %s3059_s13, %s3059_s13, %s3060_s15  }
  0x22   : > { %p125_p13 = scmp.lt.s32.totalorder %s3056_s11, 3 }
  0x24   : > { %p126_p2 = pnand %p2869_p1, %p125_p13 }
  0x26   : > { %129 = sbr.rel (%p126_p2) target bundleno = 633 (0x279), region = 24 }
  0x2b   : > { %s3158_s16 = sand.u32 1, %s3040_s7  }
  0x2c   : > { %s2870_s17 = sshll.u32 %s3158_s16, 11  ;;  %s132_s22 = scalar_lea.sflag [#allocation3], %s3158_s16 }
  0x2d   : > { %s3162_s23 = scalar_lea.vmem [#allocation2], %s2870_s17 }
  0x2e   : > { %3027 = dma.done.wait (%p3121_p8), %s132_s22, 32768  }
  0x2f   : > { %3029 = vsyncadd (%p3121_p8), %s132_s22, 4294934528  ;;  %v158_v0 = vld [vmem:[%s3162_s23] sm:$0xff]  ;;  %v159_v1 = vld [vmem:[%s3162_s23 + $0x8] sm:$0xff]  ;;  %vm2462_vm0 = vcmask 1041409   ;;  %vm2464_vm1 = vcmask 1042434   ;;  %vm2466_vm2 = vcmask 1043459  }
  0x30   : > { %v160_v2 = vld [vmem:[%s3162_s23 + $0x10] sm:$0xff]  ;;  %v161_v3 = vld [vmem:[%s3162_s23 + $0x18] sm:$0xff]  ;;  %v162_v4 = vld [vmem:[%s3162_s23 + $0x20] sm:$0xff]  ;;  %v414_v6 = vrot.slane %v158_v0, 4  ;;  %v420_v7 = vrot.slane %v159_v1, 4  ;;  %vm2468_vm3 = vcmask 1044484  }
  0x31   : > { %v163_v5 = vld [vmem:[%s3162_s23 + $0x28] sm:$0xff]  ;;  %v426_v8 = vrot.slane %v160_v2, 4  ;;  %v164_v9 = vld [vmem:[%s3162_s23 + $0x30] sm:$0xff]  ;;  %v165_v10 = vld [vmem:[%s3162_s23 + $0x38] sm:$0xff]  ;;  %v432_v11 = vrot.slane %v161_v3, 4  ;;  %v438_v12 = vrot.slane %v162_v4, 4 }
  0x32   : > { %v444_v13 = vrot.slane %v163_v5, 4  ;;  %v415_v14 = vadd.f32 %v414_v6, %v158_v0  ;;  %v421_v15 = vadd.f32 %v420_v7, %v159_v1  ;;  %v450_v17 = vrot.slane %v164_v9, 4  ;;  %v166_v42 = vld [vmem:[%s3162_s23 + $0x40] sm:$0xff]  ;;  %v167_v43 = vld [vmem:[%s3162_s23 + $0x48] sm:$0xff]  ;;  %v168_v44 = vld [vmem:[%s3162_s23 + $0x50] sm:$0xff]  ;;  %s2871_s18 = sshll.u32 %s3158_s16, 8 }
  0x33   : > { %v427_v16 = vadd.f32 %v426_v8, %v160_v2  ;;  %v433_v18 = vadd.f32 %v432_v11, %v161_v3  ;;  %v439_v19 = vadd.f32 %v438_v12, %v162_v4  ;;  %v456_v21 = vrot.slane %v165_v10, 4  ;;  %v169_v49 = vld [vmem:[%s3162_s23 + $0x58] sm:$0xff]  ;;  %v170_v50 = vld [vmem:[%s3162_s23 + $0x60] sm:$0xff]  ;;  %v171_v51 = vld [vmem:[%s3162_s23 + $0x68] sm:$0xff]  ;;  %s4764_s24 = scalar_lea.vmem [#allocation5], %s2871_s18  ;;  %s2881_s25 = sshll.u32 %s3048_s9, 12 }
  0x34   : > { %v445_v20 = vadd.f32 %v444_v13, %v163_v5  ;;  %v416_v22 = vrot.slane %v415_v14, 2  ;;  %v422_v23 = vrot.slane %v421_v15, 2  ;;  %v451_v25 = vadd.f32 %v450_v17, %v164_v9  ;;  %v172_v56 = vld [vmem:[%s3162_s23 + $0x70] sm:$0xff]  ;;  %v173_v61 = vld [vmem:[%s3162_s23 + $0x78] sm:$0xff]  ;;  %s2774_s26 = sshll.u32 %s4764_s24, 4  ;;  %s5210_s28 = scalar_lea.hbm %s5275_s1, %s2881_s25  ;;  %s5212_s26 = int_to_ptr.vmem [resolvable:$true] %s2774_s26 }
  0x35   : > { %v428_v24 = vrot.slane %v427_v16, 2  ;;  %v434_v26 = vrot.slane %v433_v18, 2  ;;  %v440_v27 = vrot.slane %v439_v19, 2  ;;  %v457_v29 = vadd.f32 %v456_v21, %v165_v10  ;;  %s2758_s29 = scalar_lea.sflag [#allocation4], %s3158_s16  ;;  %s2976_s30 = scalar_lea.vmem %s5212_s26, 4096 }
  0x36   : > { %v446_v28 = vrot.slane %v445_v20, 2  ;;  %v417_v30 = vadd.f32 %v416_v22, %v415_v14  ;;  %v423_v31 = vadd.f32 %v422_v23, %v421_v15  ;;  %v452_v33 = vrot.slane %v451_v25, 2  ;;  %p2977_p8 = scmp.ne.s32.totalorder %s5212_s26, %s2976_s30  ;;  %s3061_s2 = smov [#allocation5]  }
  0x37   : > { %v429_v32 = vadd.f32 %v428_v24, %v427_v16  ;;  %v435_v34 = vadd.f32 %v434_v26, %v433_v18  ;;  %v441_v35 = vadd.f32 %v440_v27, %v439_v19  ;;  %v458_v37 = vrot.slane %v457_v29, 2  ;;  %s2980_s3 = sshll.u32 %s3061_s2, 4  ;;  %s2981_s3 = int_to_ptr.vmem [resolvable:$false] %s2980_s3 }
  0x38   : > { %v447_v36 = vadd.f32 %v446_v28, %v445_v20  ;;  %v418_v38 = vrot.slane %v417_v30, 1  ;;  %v424_v39 = vrot.slane %v423_v31, 1  ;;  %v453_v41 = vadd.f32 %v452_v33, %v451_v25  ;;  %p2978_p12 = pnand %p2977_p8, %p3125_p9  ;;  %s2982_s4 = scalar_lea.vmem %s2981_s3, 8192 }
  0x39   : > { %v430_v40 = vrot.slane %v429_v32, 1  ;;  %v436_v45 = vrot.slane %v435_v34, 1  ;;  %v442_v46 = vrot.slane %v441_v35, 1  ;;  %v459_v48 = vadd.f32 %v458_v37, %v457_v29  ;;  %p2983_p1 = scmp.lt.s32.totalorder %s5212_s26, %s2981_s3  ;;  %p2984_p3 = scmp.lt.s32.totalorder %s2982_s4, %s2976_s30 }
  0x3a   : > { %v448_v47 = vrot.slane %v447_v36, 1  ;;  %v3182_v52 = vadd.f32 %v418_v38, %v417_v30  ;;  %v3184_v53 = vadd.f32 %v424_v39, %v423_v31  ;;  %v454_v55 = vrot.slane %v453_v41, 1  ;;  %p2979_p0 = pneg %p2978_p12 }
  0x3b   : > { %v3186_v54 = vadd.f32 %v430_v40, %v429_v32  ;;  %v3189_v57 = vadd.f32 %v436_v45, %v435_v34  ;;  %v3191_v58 = vadd.f32 %v442_v46, %v441_v35  ;;  %v460_v60 = vrot.slane %v459_v48, 1  ;;  %v174_v34 = vld [vmem:[%s3162_s23 + $0x80] sm:$0xff]  ;;  %v175_v35 = vld [vmem:[%s3162_s23 + $0x88] sm:$0xff]  ;;  %p2985_p5 = por %p2984_p3, %p2983_p1 }
  0x3c   : > { %v3193_v59 = vadd.f32 %v448_v47, %v447_v36  ;;  %v3196_v62 = vadd.f32 %v454_v55, %v453_v41  ;;  %v462_v63 = vrot.slane %v166_v42, 4  ;;  %v468_v0 = vrot.slane %v167_v43, 4  ;;  %v176_v36 = vld [vmem:[%s3162_s23 + $0x90] sm:$0xff]  ;;  %v177_v41 = vld [vmem:[%s3162_s23 + $0x98] sm:$0xff] }
  0x3d   : > { %v474_v1 = vrot.slane %v168_v44, 4  ;;  %v3198_v2 = vadd.f32 %v460_v60, %v459_v48  ;;  %v480_v3 = vrot.slane %v169_v49, 4  ;;  %v486_v4 = vrot.slane %v170_v50, 4  ;;  %v180_v48 = vld [vmem:[%s3162_s23 + $0xb0] sm:$0xff]  ;;  %p2986_p6 = pnand %p2985_p5, %p2979_p0 }
  0x3e   : > { %v492_v5 = vrot.slane %v171_v51, 4  ;;  %v463_v6 = vadd.f32 %v462_v63, %v166_v42  ;;  %v469_v7 = vadd.f32 %v468_v0, %v167_v43  ;;  %v498_v9 = vrot.slane %v172_v56, 4  ;;  %v178_v42 = vld [vmem:[%s3162_s23 + $0xa0] sm:$0xff]  ;;  %v179_v43 = vld [vmem:[%s3162_s23 + $0xa8] sm:$0xff] }
  0x3f   : > { %v475_v8 = vadd.f32 %v474_v1, %v168_v44  ;;  %v481_v10 = vadd.f32 %v480_v3, %v169_v49  ;;  %v487_v11 = vadd.f32 %v486_v4, %v170_v50  ;;  %v504_v13 = vrot.slane %v173_v61, 4 }
  0x40   : > { %v493_v12 = vadd.f32 %v492_v5, %v171_v51  ;;  %v464_v14 = vrot.slane %v463_v6, 2  ;;  %v470_v15 = vrot.slane %v469_v7, 2  ;;  %v499_v17 = vadd.f32 %v498_v9, %v172_v56  ;;  %v181_v56 = vld [vmem:[%s3162_s23 + $0xb8] sm:$0xff] }
  0x41   : > { %v476_v16 = vrot.slane %v475_v8, 2  ;;  %v482_v18 = vrot.slane %v481_v10, 2  ;;  %v488_v19 = vrot.slane %v487_v11, 2  ;;  %v505_v21 = vadd.f32 %v504_v13, %v173_v61 }
  0x42   : > { %v494_v20 = vrot.slane %v493_v12, 2  ;;  %v465_v22 = vadd.f32 %v464_v14, %v463_v6  ;;  %v471_v23 = vadd.f32 %v470_v15, %v469_v7  ;;  %v500_v25 = vrot.slane %v499_v17, 2 }
  0x43   : > { %v477_v24 = vadd.f32 %v476_v16, %v475_v8  ;;  %v483_v26 = vadd.f32 %v482_v18, %v481_v10  ;;  %v489_v27 = vadd.f32 %v488_v19, %v487_v11  ;;  %v506_v29 = vrot.slane %v505_v21, 2 }
  0x44   : > { %v495_v28 = vadd.f32 %v494_v20, %v493_v12  ;;  %v466_v30 = vrot.slane %v465_v22, 1  ;;  %v472_v31 = vrot.slane %v471_v23, 1  ;;  %v501_v33 = vadd.f32 %v500_v25, %v499_v17 }
  0x45   : > { %v478_v32 = vrot.slane %v477_v24, 1  ;;  %v484_v37 = vrot.slane %v483_v26, 1  ;;  %v490_v38 = vrot.slane %v489_v27, 1  ;;  %v507_v40 = vadd.f32 %v506_v29, %v505_v21 }
  0x46   : > { %v496_v39 = vrot.slane %v495_v28, 1  ;;  %v3206_v44 = vadd.f32 %v466_v30, %v465_v22  ;;  %v3208_v45 = vadd.f32 %v472_v31, %v471_v23  ;;  %v502_v47 = vrot.slane %v501_v33, 1 }
  0x47   : > { %v3210_v46 = vadd.f32 %v478_v32, %v477_v24  ;;  %v3213_v49 = vadd.f32 %v484_v37, %v483_v26  ;;  %v3215_v50 = vadd.f32 %v490_v38, %v489_v27  ;;  %v508_v55 = vrot.slane %v507_v40, 1 }
  0x48   : > { %v3217_v51 = vadd.f32 %v496_v39, %v495_v28  ;;  %v3220_v60 = vadd.f32 %v502_v47, %v501_v33  ;;  %v510_v61 = vrot.slane %v174_v34, 4  ;;  %v516_v63 = vrot.slane %v175_v35, 4 }
  0x49   : > { %v522_v0 = vrot.slane %v176_v36, 4  ;;  %v3222_v1 = vadd.f32 %v508_v55, %v507_v40  ;;  %v528_v3 = vrot.slane %v177_v41, 4  ;;  %v534_v4 = vrot.slane %v178_v42, 4 }
  0x4a   : > { %v540_v5 = vrot.slane %v179_v43, 4  ;;  %v511_v6 = vadd.f32 %v510_v61, %v174_v34  ;;  %v517_v7 = vadd.f32 %v516_v63, %v175_v35  ;;  %v546_v9 = vrot.slane %v180_v48, 4  ;;  %v182_v34 = vld [vmem:[%s3162_s23 + $0xc0] sm:$0xff]  ;;  %v183_v35 = vld [vmem:[%s3162_s23 + $0xc8] sm:$0xff]  ;;  %v188_v61 = vld [vmem:[%s3162_s23 + $0xf0] sm:$0xff] }
  0x4b   : > { %v523_v8 = vadd.f32 %v522_v0, %v176_v36  ;;  %v529_v10 = vadd.f32 %v528_v3, %v177_v41  ;;  %v535_v11 = vadd.f32 %v534_v4, %v178_v42  ;;  %v552_v13 = vrot.slane %v181_v56, 4  ;;  %v184_v36 = vld [vmem:[%s3162_s23 + $0xd0] sm:$0xff]  ;;  %v185_v41 = vld [vmem:[%s3162_s23 + $0xd8] sm:$0xff]  ;;  %v186_v42 = vld [vmem:[%s3162_s23 + $0xe0] sm:$0xff] }
  0x4c   : > { %v541_v12 = vadd.f32 %v540_v5, %v179_v43  ;;  %v512_v14 = vrot.slane %v511_v6, 2  ;;  %v518_v15 = vrot.slane %v517_v7, 2  ;;  %v547_v17 = vadd.f32 %v546_v9, %v180_v48  ;;  %v187_v43 = vld [vmem:[%s3162_s23 + $0xe8] sm:$0xff]  ;;  %v189_v5 = vld [vmem:[%s3162_s23 + $0xf8] sm:$0xff] }
  0x4d   : > { %v524_v16 = vrot.slane %v523_v8, 2  ;;  %v530_v18 = vrot.slane %v529_v10, 2  ;;  %v536_v19 = vrot.slane %v535_v11, 2  ;;  %v553_v21 = vadd.f32 %v552_v13, %v181_v56 }
  0x4e   : > { %v542_v20 = vrot.slane %v541_v12, 2  ;;  %v513_v22 = vadd.f32 %v512_v14, %v511_v6  ;;  %v519_v23 = vadd.f32 %v518_v15, %v517_v7  ;;  %v548_v25 = vrot.slane %v547_v17, 2 }
  0x4f   : > { %v525_v24 = vadd.f32 %v524_v16, %v523_v8  ;;  %v531_v26 = vadd.f32 %v530_v18, %v529_v10  ;;  %v537_v27 = vadd.f32 %v536_v19, %v535_v11  ;;  %v554_v29 = vrot.slane %v553_v21, 2 }
  0x50   : > { %v543_v28 = vadd.f32 %v542_v20, %v541_v12  ;;  %v514_v30 = vrot.slane %v513_v22, 1  ;;  %v520_v31 = vrot.slane %v519_v23, 1  ;;  %v549_v33 = vadd.f32 %v548_v25, %v547_v17 }
  0x51   : > { %v526_v32 = vrot.slane %v525_v24, 1  ;;  %v532_v37 = vrot.slane %v531_v26, 1  ;;  %v538_v38 = vrot.slane %v537_v27, 1  ;;  %v555_v40 = vadd.f32 %v554_v29, %v553_v21 }
  0x52   : > { %v544_v39 = vrot.slane %v543_v28, 1  ;;  %v3230_v47 = vadd.f32 %v514_v30, %v513_v22  ;;  %v3232_v48 = vadd.f32 %v520_v31, %v519_v23  ;;  %v550_v56 = vrot.slane %v549_v33, 1 }
  0x53   : > { %v3234_v55 = vadd.f32 %v526_v32, %v525_v24  ;;  %v3237_v63 = vadd.f32 %v532_v37, %v531_v26  ;;  %v3239_v0 = vadd.f32 %v538_v38, %v537_v27  ;;  %v556_v4 = vrot.slane %v555_v40, 1 }
  0x54   : > { %v3241_v3 = vadd.f32 %v544_v39, %v543_v28  ;;  %v3244_v6 = vadd.f32 %v550_v56, %v549_v33  ;;  %v558_v7 = vrot.slane %v182_v34, 4  ;;  %v564_v8 = vrot.slane %v183_v35, 4  ;;  %v192_v56 = vld [vmem:[%s3162_s23 + $0x110] sm:$0xff] }
  0x55   : > { %v570_v9 = vrot.slane %v184_v36, 4  ;;  %v3246_v10 = vadd.f32 %v556_v4, %v555_v40  ;;  %v576_v11 = vrot.slane %v185_v41, 4  ;;  %v582_v12 = vrot.slane %v186_v42, 4 }
  0x56   : > { %v588_v13 = vrot.slane %v187_v43, 4  ;;  %v559_v14 = vadd.f32 %v558_v7, %v182_v34  ;;  %v565_v15 = vadd.f32 %v564_v8, %v183_v35  ;;  %v594_v17 = vrot.slane %v188_v61, 4  ;;  %v193_v8 = vld [vmem:[%s3162_s23 + $0x118] sm:$0xff] }
  0x57   : > { %v571_v16 = vadd.f32 %v570_v9, %v184_v36  ;;  %v577_v18 = vadd.f32 %v576_v11, %v185_v41  ;;  %v583_v19 = vadd.f32 %v582_v12, %v186_v42  ;;  %v600_v21 = vrot.slane %v189_v5, 4  ;;  %v190_v42 = vld [vmem:[%s3162_s23 + $0x100] sm:$0xff]  ;;  %v195_v11 = vld [vmem:[%s3162_s23 + $0x128] sm:$0xff] }
  0x58   : > { %v589_v20 = vadd.f32 %v588_v13, %v187_v43  ;;  %v560_v22 = vrot.slane %v559_v14, 2  ;;  %v566_v23 = vrot.slane %v565_v15, 2  ;;  %v595_v25 = vadd.f32 %v594_v17, %v188_v61  ;;  %v191_v43 = vld [vmem:[%s3162_s23 + $0x108] sm:$0xff]  ;;  %v194_v9 = vld [vmem:[%s3162_s23 + $0x120] sm:$0xff] }
  0x59   : > { %v572_v24 = vrot.slane %v571_v16, 2  ;;  %v578_v26 = vrot.slane %v577_v18, 2  ;;  %v584_v27 = vrot.slane %v583_v19, 2  ;;  %v601_v29 = vadd.f32 %v600_v21, %v189_v5  ;;  %v197_v21 = vld [vmem:[%s3162_s23 + $0x138] sm:$0xff] }
  0x5a   : > { %v590_v28 = vrot.slane %v589_v20, 2  ;;  %v561_v30 = vadd.f32 %v560_v22, %v559_v14  ;;  %v567_v31 = vadd.f32 %v566_v23, %v565_v15  ;;  %v596_v33 = vrot.slane %v595_v25, 2 }
  0x5b   : > { %v573_v32 = vadd.f32 %v572_v24, %v571_v16  ;;  %v579_v34 = vadd.f32 %v578_v26, %v577_v18  ;;  %v585_v35 = vadd.f32 %v584_v27, %v583_v19  ;;  %v602_v37 = vrot.slane %v601_v29, 2  ;;  %v196_v16 = vld [vmem:[%s3162_s23 + $0x130] sm:$0xff] }
  0x5c   : > { %v591_v36 = vadd.f32 %v590_v28, %v589_v20  ;;  %v562_v38 = vrot.slane %v561_v30, 1  ;;  %v568_v39 = vrot.slane %v567_v31, 1  ;;  %v597_v41 = vadd.f32 %v596_v33, %v595_v25 }
  0x5d   : > { %v574_v40 = vrot.slane %v573_v32, 1  ;;  %v580_v61 = vrot.slane %v579_v34, 1  ;;  %v586_v4 = vrot.slane %v585_v35, 1  ;;  %v603_v7 = vadd.f32 %v602_v37, %v601_v29 }
  0x5e   : > { %v592_v5 = vrot.slane %v591_v36, 1  ;;  %v3254_v12 = vadd.f32 %v562_v38, %v561_v30  ;;  %v3256_v13 = vadd.f32 %v568_v39, %v567_v31  ;;  %v598_v15 = vrot.slane %v597_v41, 1 }
  0x5f   : > { %v3258_v14 = vadd.f32 %v574_v40, %v573_v32  ;;  %v3261_v17 = vadd.f32 %v580_v61, %v579_v34  ;;  %v3263_v18 = vadd.f32 %v586_v4, %v585_v35  ;;  %v604_v20 = vrot.slane %v603_v7, 1 }
  0x60   : > { %v3265_v19 = vadd.f32 %v592_v5, %v591_v36  ;;  %v3268_v22 = vadd.f32 %v598_v15, %v597_v41  ;;  %v606_v23 = vrot.slane %v190_v42, 4  ;;  %v612_v24 = vrot.slane %v191_v43, 4 }
  0x61   : > { %v618_v25 = vrot.slane %v192_v56, 4  ;;  %v3270_v26 = vadd.f32 %v604_v20, %v603_v7  ;;  %v624_v27 = vrot.slane %v193_v8, 4  ;;  %v630_v28 = vrot.slane %v194_v9, 4 }
  0x62   : > { %5281 = vst [vmem:[#allocation8_spill] sm:$0xff] %v3268_v22  ;;  %v636_v29 = vrot.slane %v195_v11, 4  ;;  %v607_v30 = vadd.f32 %v606_v23, %v190_v42  ;;  %v613_v31 = vadd.f32 %v612_v24, %v191_v43  ;;  %v642_v33 = vrot.slane %v196_v16, 4 }
  0x63   : > { %5282 = vst [vmem:[#allocation9_spill] sm:$0xff] %v3270_v26  ;;  %v619_v32 = vadd.f32 %v618_v25, %v192_v56  ;;  %v625_v34 = vadd.f32 %v624_v27, %v193_v8  ;;  %v631_v35 = vadd.f32 %v630_v28, %v194_v9  ;;  %v648_v37 = vrot.slane %v197_v21, 4  ;;  %v198_v27 = vld [vmem:[%s3162_s23 + $0x140] sm:$0xff]  ;;  %v199_v28 = vld [vmem:[%s3162_s23 + $0x148] sm:$0xff] }
  0x64   : > { %v637_v36 = vadd.f32 %v636_v29, %v195_v11  ;;  %v608_v38 = vrot.slane %v607_v30, 2  ;;  %v614_v39 = vrot.slane %v613_v31, 2  ;;  %v643_v41 = vadd.f32 %v642_v33, %v196_v16  ;;  %v200_v29 = vld [vmem:[%s3162_s23 + $0x150] sm:$0xff]  ;;  %v201_v33 = vld [vmem:[%s3162_s23 + $0x158] sm:$0xff] }
  0x65   : > { %v620_v40 = vrot.slane %v619_v32, 2  ;;  %v626_v61 = vrot.slane %v625_v34, 2  ;;  %v632_v4 = vrot.slane %v631_v35, 2  ;;  %v649_v7 = vadd.f32 %v648_v37, %v197_v21  ;;  %v203_v37 = vld [vmem:[%s3162_s23 + $0x168] sm:$0xff] }
  0x66   : > { %v638_v5 = vrot.slane %v637_v36, 2  ;;  %v609_v15 = vadd.f32 %v608_v38, %v607_v30  ;;  %v615_v42 = vadd.f32 %v614_v39, %v613_v31  ;;  %v644_v56 = vrot.slane %v643_v41, 2 }
  0x67   : > { %v621_v43 = vadd.f32 %v620_v40, %v619_v32  ;;  %v627_v8 = vadd.f32 %v626_v61, %v625_v34  ;;  %v633_v9 = vadd.f32 %v632_v4, %v631_v35  ;;  %v650_v20 = vrot.slane %v649_v7, 2  ;;  %v202_v34 = vld [vmem:[%s3162_s23 + $0x160] sm:$0xff]  ;;  %v204_v40 = vld [vmem:[%s3162_s23 + $0x170] sm:$0xff] }
  0x68   : > { %v639_v11 = vadd.f32 %v638_v5, %v637_v36  ;;  %v610_v23 = vrot.slane %v609_v15, 1  ;;  %v616_v16 = vrot.slane %v615_v42, 1  ;;  %v645_v25 = vadd.f32 %v644_v56, %v643_v41  ;;  %v205_v56 = vld [vmem:[%s3162_s23 + $0x178] sm:$0xff] }
  0x69   : > { %v622_v24 = vrot.slane %v621_v43, 1  ;;  %v628_v21 = vrot.slane %v627_v8, 1  ;;  %v634_v30 = vrot.slane %v633_v9, 1  ;;  %v651_v32 = vadd.f32 %v650_v20, %v649_v7 }
  0x6a   : > { %v640_v31 = vrot.slane %v639_v11, 1  ;;  %v3278_v35 = vadd.f32 %v610_v23, %v609_v15  ;;  %v3280_v36 = vadd.f32 %v616_v16, %v615_v42  ;;  %v646_v39 = vrot.slane %v645_v25, 1 }
  0x6b   : > { %v3282_v38 = vadd.f32 %v622_v24, %v621_v43  ;;  %v3285_v41 = vadd.f32 %v628_v21, %v627_v8  ;;  %v3287_v61 = vadd.f32 %v634_v30, %v633_v9  ;;  %v652_v5 = vrot.slane %v651_v32, 1 }
  0x6c   : > { %5283 = vst [vmem:[#allocation10_spill] sm:$0xff] %v3278_v35  ;;  %5284 = vst [vmem:[#allocation11_spill] sm:$0xff] %v3280_v36  ;;  %v3289_v4 = vadd.f32 %v640_v31, %v639_v11  ;;  %v3292_v7 = vadd.f32 %v646_v39, %v645_v25  ;;  %v654_v20 = vrot.slane %v198_v27, 4  ;;  %v660_v26 = vrot.slane %v199_v28, 4  ;;  %v213_v36 = vld [vmem:[%s3162_s23 + $0x1b8] sm:$0xff] }
  0x6d   : > { %5285 = vst [vmem:[#allocation12_spill] sm:$0xff] %v3282_v38  ;;  %5286 = vst [vmem:[#allocation13_spill] sm:$0xff] %v3285_v41  ;;  %v666_v15 = vrot.slane %v200_v29, 4  ;;  %v3294_v23 = vadd.f32 %v652_v5, %v651_v32  ;;  %v672_v42 = vrot.slane %v201_v33, 4  ;;  %v678_v43 = vrot.slane %v202_v34, 4 }
  0x6e   : > { %5287 = vst [vmem:[#allocation14_spill] sm:$0xff] %v3287_v61  ;;  %5288 = vst [vmem:[#allocation15_spill] sm:$0xff] %v3289_v4  ;;  %v684_v16 = vrot.slane %v203_v37, 4  ;;  %v655_v24 = vadd.f32 %v654_v20, %v198_v27  ;;  %v661_v38 = vadd.f32 %v660_v26, %v199_v28  ;;  %v690_v21 = vrot.slane %v204_v40, 4 }
  0x6f   : > { %5289 = vst [vmem:[#allocation16_spill] sm:$0xff] %v3292_v7  ;;  %5290 = vst [vmem:[#allocation17_spill] sm:$0xff] %v3294_v23  ;;  %v667_v8 = vadd.f32 %v666_v15, %v200_v29  ;;  %v673_v9 = vadd.f32 %v672_v42, %v201_v33  ;;  %v679_v30 = vadd.f32 %v678_v43, %v202_v34  ;;  %v696_v31 = vrot.slane %v205_v56, 4  ;;  %v206_v43 = vld [vmem:[%s3162_s23 + $0x180] sm:$0xff] }
  0x70   : > { %v685_v11 = vadd.f32 %v684_v16, %v203_v37  ;;  %v656_v4 = vrot.slane %v655_v24, 2  ;;  %v662_v61 = vrot.slane %v661_v38, 2  ;;  %v691_v39 = vadd.f32 %v690_v21, %v204_v40  ;;  %v207_v16 = vld [vmem:[%s3162_s23 + $0x188] sm:$0xff]  ;;  %v208_v21 = vld [vmem:[%s3162_s23 + $0x190] sm:$0xff] }
  0x71   : > { %v668_v25 = vrot.slane %v667_v8, 2  ;;  %v674_v7 = vrot.slane %v673_v9, 2  ;;  %v680_v41 = vrot.slane %v679_v30, 2  ;;  %v697_v5 = vadd.f32 %v696_v31, %v205_v56  ;;  %v212_v31 = vld [vmem:[%s3162_s23 + $0x1b0] sm:$0xff] }
  0x72   : > { %v686_v32 = vrot.slane %v685_v11, 2  ;;  %v657_v23 = vadd.f32 %v656_v4, %v655_v24  ;;  %v663_v27 = vadd.f32 %v662_v61, %v661_v38  ;;  %v692_v28 = vrot.slane %v691_v39, 2  ;;  %v209_v24 = vld [vmem:[%s3162_s23 + $0x198] sm:$0xff] }
  0x73   : > { %v669_v26 = vadd.f32 %v668_v25, %v667_v8  ;;  %v675_v29 = vadd.f32 %v674_v7, %v673_v9  ;;  %v681_v33 = vadd.f32 %v680_v41, %v679_v30  ;;  %v698_v37 = vrot.slane %v697_v5, 2  ;;  %v210_v7 = vld [vmem:[%s3162_s23 + $0x1a0] sm:$0xff]  ;;  %v211_v8 = vld [vmem:[%s3162_s23 + $0x1a8] sm:$0xff] }
  0x74   : > { %v687_v34 = vadd.f32 %v686_v32, %v685_v11  ;;  %v658_v20 = vrot.slane %v657_v23, 1  ;;  %v664_v40 = vrot.slane %v663_v27, 1  ;;  %v693_v42 = vadd.f32 %v692_v28, %v691_v39 }
  0x75   : > { %v670_v15 = vrot.slane %v669_v26, 1  ;;  %v676_v56 = vrot.slane %v675_v29, 1  ;;  %v682_v38 = vrot.slane %v681_v33, 1  ;;  %v699_v4 = vadd.f32 %v698_v37, %v697_v5 }
  0x76   : > { %v688_v61 = vrot.slane %v687_v34, 1  ;;  %v3302_v41 = vadd.f32 %v658_v20, %v657_v23  ;;  %v3304_v9 = vadd.f32 %v664_v40, %v663_v27  ;;  %v694_v11 = vrot.slane %v693_v42, 1 }
  0x77   : > { %v3306_v30 = vadd.f32 %v670_v15, %v669_v26  ;;  %v3309_v25 = vadd.f32 %v676_v56, %v675_v29  ;;  %v3311_v39 = vadd.f32 %v682_v38, %v681_v33  ;;  %v700_v28 = vrot.slane %v699_v4, 1 }
  0x78   : > { %5291 = vst [vmem:[#allocation18_spill] sm:$0xff] %v3302_v41  ;;  %5292 = vst [vmem:[#allocation19_spill] sm:$0xff] %v3304_v9  ;;  %v3313_v32 = vadd.f32 %v688_v61, %v687_v34  ;;  %v3316_v5 = vadd.f32 %v694_v11, %v693_v42  ;;  %v702_v37 = vrot.slane %v206_v43, 4  ;;  %v708_v35 = vrot.slane %v207_v16, 4  ;;  %v221_v9 = vld [vmem:[%s3162_s23 + $0x1f8] sm:$0xff] }
  0x79   : > { %5293 = vst [vmem:[#allocation20_spill] sm:$0xff] %v3306_v30  ;;  %5294 = vst [vmem:[#allocation21_spill] sm:$0xff] %v3309_v25  ;;  %v714_v23 = vrot.slane %v208_v21, 4  ;;  %v3318_v20 = vadd.f32 %v700_v28, %v699_v4  ;;  %v720_v27 = vrot.slane %v209_v24, 4  ;;  %v726_v26 = vrot.slane %v210_v7, 4 }
  0x7a   : > { %5295 = vst [vmem:[#allocation22_spill] sm:$0xff] %v3311_v39  ;;  %5296 = vst [vmem:[#allocation23_spill] sm:$0xff] %v3313_v32  ;;  %v732_v40 = vrot.slane %v211_v8, 4  ;;  %v703_v15 = vadd.f32 %v702_v37, %v206_v43  ;;  %v709_v30 = vadd.f32 %v708_v35, %v207_v16  ;;  %v738_v56 = vrot.slane %v212_v31, 4 }
  0x7b   : > { %5297 = vst [vmem:[#allocation24_spill] sm:$0xff] %v3316_v5  ;;  %5298 = vst [vmem:[#allocation25_spill] sm:$0xff] %v3318_v20  ;;  %v715_v29 = vadd.f32 %v714_v23, %v208_v21  ;;  %v721_v33 = vadd.f32 %v720_v27, %v209_v24  ;;  %v727_v38 = vadd.f32 %v726_v26, %v210_v7  ;;  %v744_v61 = vrot.slane %v213_v36, 4  ;;  %v214_v26 = vld [vmem:[%s3162_s23 + $0x1c0] sm:$0xff] }
  0x7c   : > { %v733_v34 = vadd.f32 %v732_v40, %v211_v8  ;;  %v704_v32 = vrot.slane %v703_v15, 2  ;;  %v710_v39 = vrot.slane %v709_v30, 2  ;;  %v739_v11 = vadd.f32 %v738_v56, %v212_v31  ;;  %v215_v40 = vld [vmem:[%s3162_s23 + $0x1c8] sm:$0xff]  ;;  %v216_v56 = vld [vmem:[%s3162_s23 + $0x1d0] sm:$0xff] }
  0x7d   : > { %v716_v42 = vrot.slane %v715_v29, 2  ;;  %v722_v5 = vrot.slane %v721_v33, 2  ;;  %v728_v25 = vrot.slane %v727_v38, 2  ;;  %v745_v28 = vadd.f32 %v744_v61, %v213_v36  ;;  %v220_v61 = vld [vmem:[%s3162_s23 + $0x1f0] sm:$0xff] }
  0x7e   : > { %v734_v4 = vrot.slane %v733_v34, 2  ;;  %v705_v20 = vadd.f32 %v704_v32, %v703_v15  ;;  %v711_v43 = vadd.f32 %v710_v39, %v709_v30  ;;  %v740_v16 = vrot.slane %v739_v11, 2  ;;  %v217_v15 = vld [vmem:[%s3162_s23 + $0x1d8] sm:$0xff] }
  0x7f   : > { %v717_v35 = vadd.f32 %v716_v42, %v715_v29  ;;  %v723_v21 = vadd.f32 %v722_v5, %v721_v33  ;;  %v729_v24 = vadd.f32 %v728_v25, %v727_v38  ;;  %v746_v8 = vrot.slane %v745_v28, 2  ;;  %v218_v5 = vld [vmem:[%s3162_s23 + $0x1e0] sm:$0xff]  ;;  %v219_v29 = vld [vmem:[%s3162_s23 + $0x1e8] sm:$0xff] }
  0x80   : > { %v735_v7 = vadd.f32 %v734_v4, %v733_v34  ;;  %v706_v37 = vrot.slane %v705_v20, 1  ;;  %v712_v31 = vrot.slane %v711_v43, 1  ;;  %v741_v27 = vadd.f32 %v740_v16, %v739_v11 }
  0x81   : > { %v718_v23 = vrot.slane %v717_v35, 1  ;;  %v724_v36 = vrot.slane %v723_v21, 1  ;;  %v730_v30 = vrot.slane %v729_v24, 1  ;;  %v747_v32 = vadd.f32 %v746_v8, %v745_v28 }
  0x82   : > { %v736_v39 = vrot.slane %v735_v7, 1  ;;  %v3326_v25 = vadd.f32 %v706_v37, %v705_v20  ;;  %v3328_v33 = vadd.f32 %v712_v31, %v711_v43  ;;  %v742_v34 = vrot.slane %v741_v27, 1 }
  0x83   : > { %v3330_v38 = vadd.f32 %v718_v23, %v717_v35  ;;  %v3333_v42 = vadd.f32 %v724_v36, %v723_v21  ;;  %v3335_v11 = vadd.f32 %v730_v30, %v729_v24  ;;  %v748_v16 = vrot.slane %v747_v32, 1 }
  0x84   : > { %5299 = vst [vmem:[#allocation26_spill] sm:$0xff] %v3326_v25  ;;  %5300 = vst [vmem:[#allocation27_spill] sm:$0xff] %v3328_v33  ;;  %v3337_v4 = vadd.f32 %v736_v39, %v735_v7  ;;  %v3340_v28 = vadd.f32 %v742_v34, %v741_v27  ;;  %v750_v8 = vrot.slane %v214_v26, 4  ;;  %v756_v41 = vrot.slane %v215_v40, 4  ;;  %v229_v33 = vld [vmem:[%s3162_s23 + $0x238] sm:$0xff] }
  0x85   : > { %5301 = vst [vmem:[#allocation28_spill] sm:$0xff] %v3330_v38  ;;  %5302 = vst [vmem:[#allocation29_spill] sm:$0xff] %v3333_v42  ;;  %v762_v20 = vrot.slane %v216_v56, 4  ;;  %v3342_v37 = vadd.f32 %v748_v16, %v747_v32  ;;  %v768_v43 = vrot.slane %v217_v15, 4  ;;  %v774_v35 = vrot.slane %v218_v5, 4 }
  0x86   : > { %5303 = vst [vmem:[#allocation30_spill] sm:$0xff] %v3335_v11  ;;  %5304 = vst [vmem:[#allocation31_spill] sm:$0xff] %v3337_v4  ;;  %v780_v31 = vrot.slane %v219_v29, 4  ;;  %v751_v23 = vadd.f32 %v750_v8, %v214_v26  ;;  %v757_v38 = vadd.f32 %v756_v41, %v215_v40  ;;  %v786_v36 = vrot.slane %v220_v61, 4 }
  0x87   : > { %5305 = vst [vmem:[#allocation32_spill] sm:$0xff] %v3340_v28  ;;  %5306 = vst [vmem:[#allocation33_spill] sm:$0xff] %v3342_v37  ;;  %v763_v21 = vadd.f32 %v762_v20, %v216_v56  ;;  %v769_v24 = vadd.f32 %v768_v43, %v217_v15  ;;  %v775_v30 = vadd.f32 %v774_v35, %v218_v5  ;;  %v792_v39 = vrot.slane %v221_v9, 4  ;;  %v222_v35 = vld [vmem:[%s3162_s23 + $0x200] sm:$0xff] }
  0x88   : > { %v781_v7 = vadd.f32 %v780_v31, %v219_v29  ;;  %v752_v4 = vrot.slane %v751_v23, 2  ;;  %v758_v11 = vrot.slane %v757_v38, 2  ;;  %v787_v34 = vadd.f32 %v786_v36, %v220_v61  ;;  %v223_v31 = vld [vmem:[%s3162_s23 + $0x208] sm:$0xff]  ;;  %v224_v36 = vld [vmem:[%s3162_s23 + $0x210] sm:$0xff] }
  0x89   : > { %v764_v27 = vrot.slane %v763_v21, 2  ;;  %v770_v28 = vrot.slane %v769_v24, 2  ;;  %v776_v42 = vrot.slane %v775_v30, 2  ;;  %v793_v16 = vadd.f32 %v792_v39, %v221_v9  ;;  %v228_v39 = vld [vmem:[%s3162_s23 + $0x230] sm:$0xff] }
  0x8a   : > { %v782_v32 = vrot.slane %v781_v7, 2  ;;  %v753_v37 = vadd.f32 %v752_v4, %v751_v23  ;;  %v759_v26 = vadd.f32 %v758_v11, %v757_v38  ;;  %v788_v40 = vrot.slane %v787_v34, 2  ;;  %v225_v23 = vld [vmem:[%s3162_s23 + $0x218] sm:$0xff] }
  0x8b   : > { %v765_v41 = vadd.f32 %v764_v27, %v763_v21  ;;  %v771_v56 = vadd.f32 %v770_v28, %v769_v24  ;;  %v777_v15 = vadd.f32 %v776_v42, %v775_v30  ;;  %v794_v29 = vrot.slane %v793_v16, 2  ;;  %v226_v28 = vld [vmem:[%s3162_s23 + $0x220] sm:$0xff]  ;;  %v227_v21 = vld [vmem:[%s3162_s23 + $0x228] sm:$0xff] }
  0x8c   : > { %v783_v5 = vadd.f32 %v782_v32, %v781_v7  ;;  %v754_v8 = vrot.slane %v753_v37, 1  ;;  %v760_v61 = vrot.slane %v759_v26, 1  ;;  %v789_v43 = vadd.f32 %v788_v40, %v787_v34 }
  0x8d   : > { %v766_v20 = vrot.slane %v765_v41, 1  ;;  %v772_v9 = vrot.slane %v771_v56, 1  ;;  %v778_v38 = vrot.slane %v777_v15, 1  ;;  %v795_v4 = vadd.f32 %v794_v29, %v793_v16 }
  0x8e   : > { %v784_v11 = vrot.slane %v783_v5, 1  ;;  %v3350_v42 = vadd.f32 %v754_v8, %v753_v37  ;;  %v3352_v24 = vadd.f32 %v760_v61, %v759_v26  ;;  %v790_v7 = vrot.slane %v789_v43, 1 }
  0x8f   : > { %v3354_v30 = vadd.f32 %v766_v20, %v765_v41  ;;  %v3357_v27 = vadd.f32 %v772_v9, %v771_v56  ;;  %v3359_v34 = vadd.f32 %v778_v38, %v777_v15  ;;  %v796_v40 = vrot.slane %v795_v4, 1 }
  0x90   : > { %5307 = vst [vmem:[#allocation34_spill] sm:$0xff] %v3350_v42  ;;  %5308 = vst [vmem:[#allocation35_spill] sm:$0xff] %v3352_v24  ;;  %v3361_v32 = vadd.f32 %v784_v11, %v783_v5  ;;  %v3364_v16 = vadd.f32 %v790_v7, %v789_v43  ;;  %v798_v29 = vrot.slane %v222_v35, 4  ;;  %v804_v25 = vrot.slane %v223_v31, 4  ;;  %v237_v24 = vld [vmem:[%s3162_s23 + $0x278] sm:$0xff] }
  0x91   : > { %5309 = vst [vmem:[#allocation36_spill] sm:$0xff] %v3354_v30  ;;  %5310 = vst [vmem:[#allocation37_spill] sm:$0xff] %v3357_v27  ;;  %v810_v37 = vrot.slane %v224_v36, 4  ;;  %v3366_v8 = vadd.f32 %v796_v40, %v795_v4  ;;  %v816_v26 = vrot.slane %v225_v23, 4  ;;  %v822_v41 = vrot.slane %v226_v28, 4 }
  0x92   : > { %5311 = vst [vmem:[#allocation38_spill] sm:$0xff] %v3359_v34  ;;  %5312 = vst [vmem:[#allocation39_spill] sm:$0xff] %v3361_v32  ;;  %v828_v61 = vrot.slane %v227_v21, 4  ;;  %v799_v20 = vadd.f32 %v798_v29, %v222_v35  ;;  %v805_v30 = vadd.f32 %v804_v25, %v223_v31  ;;  %v834_v9 = vrot.slane %v228_v39, 4 }
  0x93   : > { %5313 = vst [vmem:[#allocation40_spill] sm:$0xff] %v3364_v16  ;;  %5314 = vst [vmem:[#allocation41_spill] sm:$0xff] %v3366_v8  ;;  %v811_v56 = vadd.f32 %v810_v37, %v224_v36  ;;  %v817_v15 = vadd.f32 %v816_v26, %v225_v23  ;;  %v823_v38 = vadd.f32 %v822_v41, %v226_v28  ;;  %v840_v11 = vrot.slane %v229_v33, 4  ;;  %v230_v41 = vld [vmem:[%s3162_s23 + $0x240] sm:$0xff] }
  0x94   : > { %v829_v5 = vadd.f32 %v828_v61, %v227_v21  ;;  %v800_v32 = vrot.slane %v799_v20, 2  ;;  %v806_v34 = vrot.slane %v805_v30, 2  ;;  %v835_v7 = vadd.f32 %v834_v9, %v228_v39  ;;  %v231_v61 = vld [vmem:[%s3162_s23 + $0x248] sm:$0xff]  ;;  %v232_v9 = vld [vmem:[%s3162_s23 + $0x250] sm:$0xff] }
  0x95   : > { %v812_v43 = vrot.slane %v811_v56, 2  ;;  %v818_v16 = vrot.slane %v817_v15, 2  ;;  %v824_v27 = vrot.slane %v823_v38, 2  ;;  %v841_v40 = vadd.f32 %v840_v11, %v229_v33  ;;  %v236_v11 = vld [vmem:[%s3162_s23 + $0x270] sm:$0xff] }
  0x96   : > { %v830_v4 = vrot.slane %v829_v5, 2  ;;  %v801_v8 = vadd.f32 %v800_v32, %v799_v20  ;;  %v807_v35 = vadd.f32 %v806_v34, %v805_v30  ;;  %v836_v31 = vrot.slane %v835_v7, 2  ;;  %v233_v20 = vld [vmem:[%s3162_s23 + $0x258] sm:$0xff] }
  0x97   : > { %v813_v25 = vadd.f32 %v812_v43, %v811_v56  ;;  %v819_v36 = vadd.f32 %v818_v16, %v817_v15  ;;  %v825_v23 = vadd.f32 %v824_v27, %v823_v38  ;;  %v842_v21 = vrot.slane %v841_v40, 2  ;;  %v234_v16 = vld [vmem:[%s3162_s23 + $0x260] sm:$0xff]  ;;  %v235_v56 = vld [vmem:[%s3162_s23 + $0x268] sm:$0xff] }
  0x98   : > { %v831_v28 = vadd.f32 %v830_v4, %v829_v5  ;;  %v802_v29 = vrot.slane %v801_v8, 1  ;;  %v808_v39 = vrot.slane %v807_v35, 1  ;;  %v837_v26 = vadd.f32 %v836_v31, %v835_v7 }
  0x99   : > { %v814_v37 = vrot.slane %v813_v25, 1  ;;  %v820_v33 = vrot.slane %v819_v36, 1  ;;  %v826_v30 = vrot.slane %v825_v23, 1  ;;  %v843_v32 = vadd.f32 %v842_v21, %v841_v40 }
  0x9a   : > { %v832_v34 = vrot.slane %v831_v28, 1  ;;  %v3374_v27 = vadd.f32 %v802_v29, %v801_v8  ;;  %v3376_v15 = vadd.f32 %v808_v39, %v807_v35  ;;  %v838_v5 = vrot.slane %v837_v26, 1 }
  0x9b   : > { %v3378_v38 = vadd.f32 %v814_v37, %v813_v25  ;;  %v3381_v43 = vadd.f32 %v820_v33, %v819_v36  ;;  %v3383_v7 = vadd.f32 %v826_v30, %v825_v23  ;;  %v844_v31 = vrot.slane %v843_v32, 1 }
  0x9c   : > { %5315 = vst [vmem:[#allocation42_spill] sm:$0xff] %v3374_v27  ;;  %5316 = vst [vmem:[#allocation43_spill] sm:$0xff] %v3376_v15  ;;  %v3385_v4 = vadd.f32 %v832_v34, %v831_v28  ;;  %v3388_v40 = vadd.f32 %v838_v5, %v837_v26  ;;  %v846_v21 = vrot.slane %v230_v41, 4  ;;  %v852_v42 = vrot.slane %v231_v61, 4  ;;  %v245_v15 = vld [vmem:[%s3162_s23 + $0x2b8] sm:$0xff] }
  0x9d   : > { %5317 = vst [vmem:[#allocation44_spill] sm:$0xff] %v3378_v38  ;;  %5318 = vst [vmem:[#allocation45_spill] sm:$0xff] %v3381_v43  ;;  %v858_v8 = vrot.slane %v232_v9, 4  ;;  %v3390_v29 = vadd.f32 %v844_v31, %v843_v32  ;;  %v864_v35 = vrot.slane %v233_v20, 4  ;;  %v870_v25 = vrot.slane %v234_v16, 4 }
  0x9e   : > { %5319 = vst [vmem:[#allocation46_spill] sm:$0xff] %v3383_v7  ;;  %5320 = vst [vmem:[#allocation47_spill] sm:$0xff] %v3385_v4  ;;  %v876_v39 = vrot.slane %v235_v56, 4  ;;  %v847_v37 = vadd.f32 %v846_v21, %v230_v41  ;;  %v853_v38 = vadd.f32 %v852_v42, %v231_v61  ;;  %v882_v33 = vrot.slane %v236_v11, 4 }
  0x9f   : > { %5321 = vst [vmem:[#allocation48_spill] sm:$0xff] %v3388_v40  ;;  %5322 = vst [vmem:[#allocation49_spill] sm:$0xff] %v3390_v29  ;;  %v859_v36 = vadd.f32 %v858_v8, %v232_v9  ;;  %v865_v23 = vadd.f32 %v864_v35, %v233_v20  ;;  %v871_v30 = vadd.f32 %v870_v25, %v234_v16  ;;  %v888_v34 = vrot.slane %v237_v24, 4  ;;  %v238_v25 = vld [vmem:[%s3162_s23 + $0x280] sm:$0xff] }
  0xa0   : > { %v877_v28 = vadd.f32 %v876_v39, %v235_v56  ;;  %v848_v4 = vrot.slane %v847_v37, 2  ;;  %v854_v7 = vrot.slane %v853_v38, 2  ;;  %v883_v5 = vadd.f32 %v882_v33, %v236_v11  ;;  %v239_v39 = vld [vmem:[%s3162_s23 + $0x288] sm:$0xff]  ;;  %v240_v33 = vld [vmem:[%s3162_s23 + $0x290] sm:$0xff] }
  0xa1   : > { %v860_v26 = vrot.slane %v859_v36, 2  ;;  %v866_v40 = vrot.slane %v865_v23, 2  ;;  %v872_v43 = vrot.slane %v871_v30, 2  ;;  %v889_v31 = vadd.f32 %v888_v34, %v237_v24  ;;  %v244_v34 = vld [vmem:[%s3162_s23 + $0x2b0] sm:$0xff] }
  0xa2   : > { %v878_v32 = vrot.slane %v877_v28, 2  ;;  %v849_v29 = vadd.f32 %v848_v4, %v847_v37  ;;  %v855_v41 = vadd.f32 %v854_v7, %v853_v38  ;;  %v884_v61 = vrot.slane %v883_v5, 2  ;;  %v241_v37 = vld [vmem:[%s3162_s23 + $0x298] sm:$0xff] }
  0xa3   : > { %v861_v42 = vadd.f32 %v860_v26, %v859_v36  ;;  %v867_v9 = vadd.f32 %v866_v40, %v865_v23  ;;  %v873_v20 = vadd.f32 %v872_v43, %v871_v30  ;;  %v890_v56 = vrot.slane %v889_v31, 2  ;;  %v242_v40 = vld [vmem:[%s3162_s23 + $0x2a0] sm:$0xff]  ;;  %v243_v36 = vld [vmem:[%s3162_s23 + $0x2a8] sm:$0xff] }
  0xa4   : > { %v879_v16 = vadd.f32 %v878_v32, %v877_v28  ;;  %v850_v21 = vrot.slane %v849_v29, 1  ;;  %v856_v11 = vrot.slane %v855_v41, 1  ;;  %v885_v35 = vadd.f32 %v884_v61, %v883_v5 }
  0xa5   : > { %v862_v8 = vrot.slane %v861_v42, 1  ;;  %v868_v24 = vrot.slane %v867_v9, 1  ;;  %v874_v38 = vrot.slane %v873_v20, 1  ;;  %v891_v4 = vadd.f32 %v890_v56, %v889_v31 }
  0xa6   : > { %v880_v7 = vrot.slane %v879_v16, 1  ;;  %v3398_v43 = vadd.f32 %v850_v21, %v849_v29  ;;  %v3400_v23 = vadd.f32 %v856_v11, %v855_v41  ;;  %v886_v28 = vrot.slane %v885_v35, 1 }
  0xa7   : > { %v3402_v30 = vadd.f32 %v862_v8, %v861_v42  ;;  %v3405_v26 = vadd.f32 %v868_v24, %v867_v9  ;;  %v3407_v5 = vadd.f32 %v874_v38, %v873_v20  ;;  %v892_v61 = vrot.slane %v891_v4, 1 }
  0xa8   : > { %5323 = vst [vmem:[#allocation50_spill] sm:$0xff] %v3398_v43  ;;  %5324 = vst [vmem:[#allocation51_spill] sm:$0xff] %v3400_v23  ;;  %v3409_v32 = vadd.f32 %v880_v7, %v879_v16  ;;  %v3412_v31 = vadd.f32 %v886_v28, %v885_v35  ;;  %v894_v56 = vrot.slane %v238_v25, 4  ;;  %v900_v27 = vrot.slane %v239_v39, 4  ;;  %v253_v23 = vld [vmem:[%s3162_s23 + $0x2f8] sm:$0xff] }
  0xa9   : > { %5325 = vst [vmem:[#allocation52_spill] sm:$0xff] %v3402_v30  ;;  %5326 = vst [vmem:[#allocation53_spill] sm:$0xff] %v3405_v26  ;;  %v906_v29 = vrot.slane %v240_v33, 4  ;;  %v3414_v21 = vadd.f32 %v892_v61, %v891_v4  ;;  %v912_v41 = vrot.slane %v241_v37, 4  ;;  %v918_v42 = vrot.slane %v242_v40, 4 }
  0xaa   : > { %5327 = vst [vmem:[#allocation54_spill] sm:$0xff] %v3407_v5  ;;  %5328 = vst [vmem:[#allocation55_spill] sm:$0xff] %v3409_v32  ;;  %v924_v11 = vrot.slane %v243_v36, 4  ;;  %v895_v8 = vadd.f32 %v894_v56, %v238_v25  ;;  %v901_v30 = vadd.f32 %v900_v27, %v239_v39  ;;  %v930_v24 = vrot.slane %v244_v34, 4 }
  0xab   : > { %5329 = vst [vmem:[#allocation56_spill] sm:$0xff] %v3412_v31  ;;  %5330 = vst [vmem:[#allocation57_spill] sm:$0xff] %v3414_v21  ;;  %v907_v9 = vadd.f32 %v906_v29, %v240_v33  ;;  %v913_v20 = vadd.f32 %v912_v41, %v241_v37  ;;  %v919_v38 = vadd.f32 %v918_v42, %v242_v40  ;;  %v936_v7 = vrot.slane %v245_v15, 4  ;;  %v246_v42 = vld [vmem:[%s3162_s23 + $0x2c0] sm:$0xff] }
  0xac   : > { %v925_v16 = vadd.f32 %v924_v11, %v243_v36  ;;  %v896_v32 = vrot.slane %v895_v8, 2  ;;  %v902_v5 = vrot.slane %v901_v30, 2  ;;  %v931_v28 = vadd.f32 %v930_v24, %v244_v34  ;;  %v247_v11 = vld [vmem:[%s3162_s23 + $0x2c8] sm:$0xff]  ;;  %v248_v24 = vld [vmem:[%s3162_s23 + $0x2d0] sm:$0xff] }
  0xad   : > { %v908_v35 = vrot.slane %v907_v9, 2  ;;  %v914_v31 = vrot.slane %v913_v20, 2  ;;  %v920_v26 = vrot.slane %v919_v38, 2  ;;  %v937_v61 = vadd.f32 %v936_v7, %v245_v15  ;;  %v252_v7 = vld [vmem:[%s3162_s23 + $0x2f0] sm:$0xff] }
  0xae   : > { %v926_v4 = vrot.slane %v925_v16, 2  ;;  %v897_v21 = vadd.f32 %v896_v32, %v895_v8  ;;  %v903_v25 = vadd.f32 %v902_v5, %v901_v30  ;;  %v932_v39 = vrot.slane %v931_v28, 2  ;;  %v249_v8 = vld [vmem:[%s3162_s23 + $0x2d8] sm:$0xff] }
  0xaf   : > { %v909_v27 = vadd.f32 %v908_v35, %v907_v9  ;;  %v915_v33 = vadd.f32 %v914_v31, %v913_v20  ;;  %v921_v37 = vadd.f32 %v920_v26, %v919_v38  ;;  %v938_v36 = vrot.slane %v937_v61, 2  ;;  %v250_v31 = vld [vmem:[%s3162_s23 + $0x2e0] sm:$0xff]  ;;  %v251_v9 = vld [vmem:[%s3162_s23 + $0x2e8] sm:$0xff] }
  0xb0   : > { %v927_v40 = vadd.f32 %v926_v4, %v925_v16  ;;  %v898_v56 = vrot.slane %v897_v21, 1  ;;  %v904_v34 = vrot.slane %v903_v25, 1  ;;  %v933_v41 = vadd.f32 %v932_v39, %v931_v28 }
  0xb1   : > { %v910_v29 = vrot.slane %v909_v27, 1  ;;  %v916_v15 = vrot.slane %v915_v33, 1  ;;  %v922_v30 = vrot.slane %v921_v37, 1  ;;  %v939_v32 = vadd.f32 %v938_v36, %v937_v61 }
  0xb2   : > { %v928_v5 = vrot.slane %v927_v40, 1  ;;  %v3422_v26 = vadd.f32 %v898_v56, %v897_v21  ;;  %v3424_v20 = vadd.f32 %v904_v34, %v903_v25  ;;  %v934_v16 = vrot.slane %v933_v41, 1 }
  0xb3   : > { %v3426_v38 = vadd.f32 %v910_v29, %v909_v27  ;;  %v3429_v35 = vadd.f32 %v916_v15, %v915_v33  ;;  %v3431_v28 = vadd.f32 %v922_v30, %v921_v37  ;;  %v940_v39 = vrot.slane %v939_v32, 1 }
  0xb4   : > { %5331 = vst [vmem:[#allocation58_spill] sm:$0xff] %v3422_v26  ;;  %5332 = vst [vmem:[#allocation59_spill] sm:$0xff] %v3424_v20  ;;  %v3433_v4 = vadd.f32 %v928_v5, %v927_v40  ;;  %v3436_v61 = vadd.f32 %v934_v16, %v933_v41  ;;  %v942_v36 = vrot.slane %v246_v42, 4  ;;  %v948_v43 = vrot.slane %v247_v11, 4  ;;  %v261_v20 = vld [vmem:[%s3162_s23 + $0x338] sm:$0xff] }
  0xb5   : > { %5333 = vst [vmem:[#allocation60_spill] sm:$0xff] %v3426_v38  ;;  %5334 = vst [vmem:[#allocation61_spill] sm:$0xff] %v3429_v35  ;;  %v954_v21 = vrot.slane %v248_v24, 4  ;;  %v3438_v56 = vadd.f32 %v940_v39, %v939_v32  ;;  %v960_v25 = vrot.slane %v249_v8, 4  ;;  %v966_v27 = vrot.slane %v250_v31, 4 }
  0xb6   : > { %5335 = vst [vmem:[#allocation62_spill] sm:$0xff] %v3431_v28  ;;  %5336 = vst [vmem:[#allocation63_spill] sm:$0xff] %v3433_v4  ;;  %v972_v34 = vrot.slane %v251_v9, 4  ;;  %v943_v29 = vadd.f32 %v942_v36, %v246_v42  ;;  %v949_v38 = vadd.f32 %v948_v43, %v247_v11  ;;  %v978_v15 = vrot.slane %v252_v7, 4 }
  0xb7   : > { %5337 = vst [vmem:[#allocation64_spill] sm:$0xff] %v3436_v61  ;;  %5338 = vst [vmem:[#allocation65_spill] sm:$0xff] %v3438_v56  ;;  %v955_v33 = vadd.f32 %v954_v21, %v248_v24  ;;  %v961_v37 = vadd.f32 %v960_v25, %v249_v8  ;;  %v967_v30 = vadd.f32 %v966_v27, %v250_v31  ;;  %v984_v5 = vrot.slane %v253_v23, 4  ;;  %v254_v27 = vld [vmem:[%s3162_s23 + $0x300] sm:$0xff] }
  0xb8   : > { %v973_v40 = vadd.f32 %v972_v34, %v251_v9  ;;  %v944_v4 = vrot.slane %v943_v29, 2  ;;  %v950_v28 = vrot.slane %v949_v38, 2  ;;  %v979_v16 = vadd.f32 %v978_v15, %v252_v7  ;;  %v255_v34 = vld [vmem:[%s3162_s23 + $0x308] sm:$0xff]  ;;  %v256_v15 = vld [vmem:[%s3162_s23 + $0x310] sm:$0xff] }
  0xb9   : > { %v956_v41 = vrot.slane %v955_v33, 2  ;;  %v962_v61 = vrot.slane %v961_v37, 2  ;;  %v968_v35 = vrot.slane %v967_v30, 2  ;;  %v985_v39 = vadd.f32 %v984_v5, %v253_v23  ;;  %v260_v5 = vld [vmem:[%s3162_s23 + $0x330] sm:$0xff] }
  0xba   : > { %v974_v32 = vrot.slane %v973_v40, 2  ;;  %v945_v56 = vadd.f32 %v944_v4, %v943_v29  ;;  %v951_v42 = vadd.f32 %v950_v28, %v949_v38  ;;  %v980_v11 = vrot.slane %v979_v16, 2  ;;  %v257_v29 = vld [vmem:[%s3162_s23 + $0x318] sm:$0xff] }
  0xbb   : > { %v957_v43 = vadd.f32 %v956_v41, %v955_v33  ;;  %v963_v24 = vadd.f32 %v962_v61, %v961_v37  ;;  %v969_v8 = vadd.f32 %v968_v35, %v967_v30  ;;  %v986_v9 = vrot.slane %v985_v39, 2  ;;  %v258_v61 = vld [vmem:[%s3162_s23 + $0x320] sm:$0xff]  ;;  %v259_v33 = vld [vmem:[%s3162_s23 + $0x328] sm:$0xff] }
  0xbc   : > { %v975_v31 = vadd.f32 %v974_v32, %v973_v40  ;;  %v946_v36 = vrot.slane %v945_v56, 1  ;;  %v952_v7 = vrot.slane %v951_v42, 1  ;;  %v981_v25 = vadd.f32 %v980_v11, %v979_v16 }
  0xbd   : > { %v958_v21 = vrot.slane %v957_v43, 1  ;;  %v964_v23 = vrot.slane %v963_v24, 1  ;;  %v970_v38 = vrot.slane %v969_v8, 1  ;;  %v987_v4 = vadd.f32 %v986_v9, %v985_v39 }
  0xbe   : > { %v976_v28 = vrot.slane %v975_v31, 1  ;;  %v3446_v35 = vadd.f32 %v946_v36, %v945_v56  ;;  %v3448_v37 = vadd.f32 %v952_v7, %v951_v42  ;;  %v982_v40 = vrot.slane %v981_v25, 1 }
  0xbf   : > { %v3450_v30 = vadd.f32 %v958_v21, %v957_v43  ;;  %v3453_v41 = vadd.f32 %v964_v23, %v963_v24  ;;  %v3455_v16 = vadd.f32 %v970_v38, %v969_v8  ;;  %v988_v11 = vrot.slane %v987_v4, 1 }
  0xc0   : > { %5339 = vst [vmem:[#allocation66_spill] sm:$0xff] %v3446_v35  ;;  %5340 = vst [vmem:[#allocation67_spill] sm:$0xff] %v3448_v37  ;;  %v3457_v32 = vadd.f32 %v976_v28, %v975_v31  ;;  %v3460_v39 = vadd.f32 %v982_v40, %v981_v25  ;;  %v990_v9 = vrot.slane %v254_v27, 4  ;;  %v996_v26 = vrot.slane %v255_v34, 4  ;;  %v269_v37 = vld [vmem:[%s3162_s23 + $0x378] sm:$0xff] }
  0xc1   : > { %5341 = vst [vmem:[#allocation68_spill] sm:$0xff] %v3450_v30  ;;  %5342 = vst [vmem:[#allocation69_spill] sm:$0xff] %v3453_v41  ;;  %v1002_v56 = vrot.slane %v256_v15, 4  ;;  %v3462_v36 = vadd.f32 %v988_v11, %v987_v4  ;;  %v1008_v42 = vrot.slane %v257_v29, 4  ;;  %v1014_v43 = vrot.slane %v258_v61, 4 }
  0xc2   : > { %5343 = vst [vmem:[#allocation70_spill] sm:$0xff] %v3455_v16  ;;  %5344 = vst [vmem:[#allocation71_spill] sm:$0xff] %v3457_v32  ;;  %v1020_v7 = vrot.slane %v259_v33, 4  ;;  %v991_v21 = vadd.f32 %v990_v9, %v254_v27  ;;  %v997_v30 = vadd.f32 %v996_v26, %v255_v34  ;;  %v1026_v23 = vrot.slane %v260_v5, 4 }
  0xc3   : > { %5345 = vst [vmem:[#allocation72_spill] sm:$0xff] %v3460_v39  ;;  %5346 = vst [vmem:[#allocation73_spill] sm:$0xff] %v3462_v36  ;;  %v1003_v24 = vadd.f32 %v1002_v56, %v256_v15  ;;  %v1009_v8 = vadd.f32 %v1008_v42, %v257_v29  ;;  %v1015_v38 = vadd.f32 %v1014_v43, %v258_v61  ;;  %v1032_v28 = vrot.slane %v261_v20, 4  ;;  %v262_v43 = vld [vmem:[%s3162_s23 + $0x340] sm:$0xff] }
  0xc4   : > { %v1021_v31 = vadd.f32 %v1020_v7, %v259_v33  ;;  %v992_v32 = vrot.slane %v991_v21, 2  ;;  %v998_v16 = vrot.slane %v997_v30, 2  ;;  %v1027_v40 = vadd.f32 %v1026_v23, %v260_v5  ;;  %v263_v7 = vld [vmem:[%s3162_s23 + $0x348] sm:$0xff]  ;;  %v264_v23 = vld [vmem:[%s3162_s23 + $0x350] sm:$0xff] }
  0xc5   : > { %v1004_v25 = vrot.slane %v1003_v24, 2  ;;  %v1010_v39 = vrot.slane %v1009_v8, 2  ;;  %v1016_v41 = vrot.slane %v1015_v38, 2  ;;  %v1033_v11 = vadd.f32 %v1032_v28, %v261_v20  ;;  %v268_v28 = vld [vmem:[%s3162_s23 + $0x370] sm:$0xff] }
  0xc6   : > { %v1022_v4 = vrot.slane %v1021_v31, 2  ;;  %v993_v36 = vadd.f32 %v992_v32, %v991_v21  ;;  %v999_v27 = vadd.f32 %v998_v16, %v997_v30  ;;  %v1028_v34 = vrot.slane %v1027_v40, 2  ;;  %v265_v21 = vld [vmem:[%s3162_s23 + $0x358] sm:$0xff] }
  0xc7   : > { %v1005_v26 = vadd.f32 %v1004_v25, %v1003_v24  ;;  %v1011_v15 = vadd.f32 %v1010_v39, %v1009_v8  ;;  %v1017_v29 = vadd.f32 %v1016_v41, %v1015_v38  ;;  %v1034_v33 = vrot.slane %v1033_v11, 2  ;;  %v266_v39 = vld [vmem:[%s3162_s23 + $0x360] sm:$0xff]  ;;  %v267_v24 = vld [vmem:[%s3162_s23 + $0x368] sm:$0xff] }
  0xc8   : > { %v1023_v61 = vadd.f32 %v1022_v4, %v1021_v31  ;;  %v994_v9 = vrot.slane %v993_v36, 1  ;;  %v1000_v5 = vrot.slane %v999_v27, 1  ;;  %v1029_v42 = vadd.f32 %v1028_v34, %v1027_v40 }
  0xc9   : > { %v1006_v56 = vrot.slane %v1005_v26, 1  ;;  %v1012_v20 = vrot.slane %v1011_v15, 1  ;;  %v1018_v30 = vrot.slane %v1017_v29, 1  ;;  %v1035_v32 = vadd.f32 %v1034_v33, %v1033_v11 }
  0xca   : > { %v1024_v16 = vrot.slane %v1023_v61, 1  ;;  %v3470_v41 = vadd.f32 %v994_v9, %v993_v36  ;;  %v3472_v8 = vadd.f32 %v1000_v5, %v999_v27  ;;  %v1030_v31 = vrot.slane %v1029_v42, 1 }
  0xcb   : > { %v3474_v38 = vadd.f32 %v1006_v56, %v1005_v26  ;;  %v3477_v25 = vadd.f32 %v1012_v20, %v1011_v15  ;;  %v3479_v40 = vadd.f32 %v1018_v30, %v1017_v29  ;;  %v1036_v34 = vrot.slane %v1035_v32, 1 }
  0xcc   : > { %5347 = vst [vmem:[#allocation74_spill] sm:$0xff] %v3470_v41  ;;  %5348 = vst [vmem:[#allocation75_spill] sm:$0xff] %v3472_v8  ;;  %v3481_v4 = vadd.f32 %v1024_v16, %v1023_v61  ;;  %v3484_v11 = vadd.f32 %v1030_v31, %v1029_v42  ;;  %v1038_v33 = vrot.slane %v262_v43, 4  ;;  %v1044_v35 = vrot.slane %v263_v7, 4  ;;  %v277_v8 = vld [vmem:[%s3162_s23 + $0x3b8] sm:$0xff] }
  0xcd   : > { %5349 = vst [vmem:[#allocation76_spill] sm:$0xff] %v3474_v38  ;;  %5350 = vst [vmem:[#allocation77_spill] sm:$0xff] %v3477_v25  ;;  %v1050_v36 = vrot.slane %v264_v23, 4  ;;  %v3486_v9 = vadd.f32 %v1036_v34, %v1035_v32  ;;  %v1056_v27 = vrot.slane %v265_v21, 4  ;;  %v1062_v26 = vrot.slane %v266_v39, 4 }
  0xce   : > { %5351 = vst [vmem:[#allocation78_spill] sm:$0xff] %v3479_v40  ;;  %5352 = vst [vmem:[#allocation79_spill] sm:$0xff] %v3481_v4  ;;  %v1068_v5 = vrot.slane %v267_v24, 4  ;;  %v1039_v56 = vadd.f32 %v1038_v33, %v262_v43  ;;  %v1045_v38 = vadd.f32 %v1044_v35, %v263_v7  ;;  %v1074_v20 = vrot.slane %v268_v28, 4 }
  0xcf   : > { %5353 = vst [vmem:[#allocation80_spill] sm:$0xff] %v3484_v11  ;;  %5354 = vst [vmem:[#allocation81_spill] sm:$0xff] %v3486_v9  ;;  %v1051_v15 = vadd.f32 %v1050_v36, %v264_v23  ;;  %v1057_v29 = vadd.f32 %v1056_v27, %v265_v21  ;;  %v1063_v30 = vadd.f32 %v1062_v26, %v266_v39  ;;  %v1080_v16 = vrot.slane %v269_v37, 4  ;;  %v270_v26 = vld [vmem:[%s3162_s23 + $0x380] sm:$0xff] }
  0xd0   : > { %v1069_v61 = vadd.f32 %v1068_v5, %v267_v24  ;;  %v1040_v4 = vrot.slane %v1039_v56, 2  ;;  %v1046_v40 = vrot.slane %v1045_v38, 2  ;;  %v1075_v31 = vadd.f32 %v1074_v20, %v268_v28  ;;  %v271_v5 = vld [vmem:[%s3162_s23 + $0x388] sm:$0xff]  ;;  %v272_v20 = vld [vmem:[%s3162_s23 + $0x390] sm:$0xff] }
  0xd1   : > { %v1052_v42 = vrot.slane %v1051_v15, 2  ;;  %v1058_v11 = vrot.slane %v1057_v29, 2  ;;  %v1064_v25 = vrot.slane %v1063_v30, 2  ;;  %v1081_v34 = vadd.f32 %v1080_v16, %v269_v37  ;;  %v276_v16 = vld [vmem:[%s3162_s23 + $0x3b0] sm:$0xff] }
  0xd2   : > { %v1070_v32 = vrot.slane %v1069_v61, 2  ;;  %v1041_v9 = vadd.f32 %v1040_v4, %v1039_v56  ;;  %v1047_v43 = vadd.f32 %v1046_v40, %v1045_v38  ;;  %v1076_v7 = vrot.slane %v1075_v31, 2  ;;  %v273_v56 = vld [vmem:[%s3162_s23 + $0x398] sm:$0xff] }
  0xd3   : > { %v1053_v35 = vadd.f32 %v1052_v42, %v1051_v15  ;;  %v1059_v23 = vadd.f32 %v1058_v11, %v1057_v29  ;;  %v1065_v21 = vadd.f32 %v1064_v25, %v1063_v30  ;;  %v1082_v24 = vrot.slane %v1081_v34, 2  ;;  %v274_v11 = vld [vmem:[%s3162_s23 + $0x3a0] sm:$0xff]  ;;  %v275_v15 = vld [vmem:[%s3162_s23 + $0x3a8] sm:$0xff] }
  0xd4   : > { %v1071_v39 = vadd.f32 %v1070_v32, %v1069_v61  ;;  %v1042_v33 = vrot.slane %v1041_v9, 1  ;;  %v1048_v28 = vrot.slane %v1047_v43, 1  ;;  %v1077_v27 = vadd.f32 %v1076_v7, %v1075_v31 }
  0xd5   : > { %v1054_v36 = vrot.slane %v1053_v35, 1  ;;  %v1060_v37 = vrot.slane %v1059_v23, 1  ;;  %v1066_v38 = vrot.slane %v1065_v21, 1  ;;  %v1083_v4 = vadd.f32 %v1082_v24, %v1081_v34 }
  0xd6   : > { %v1072_v40 = vrot.slane %v1071_v39, 1  ;;  %v3494_v25 = vadd.f32 %v1042_v33, %v1041_v9  ;;  %v3496_v29 = vadd.f32 %v1048_v28, %v1047_v43  ;;  %v1078_v61 = vrot.slane %v1077_v27, 1 }
  0xd7   : > { %v3498_v30 = vadd.f32 %v1054_v36, %v1053_v35  ;;  %v3501_v42 = vadd.f32 %v1060_v37, %v1059_v23  ;;  %v3503_v31 = vadd.f32 %v1066_v38, %v1065_v21  ;;  %v1084_v7 = vrot.slane %v1083_v4, 1 }
  0xd8   : > { %5355 = vst [vmem:[#allocation82_spill] sm:$0xff] %v3494_v25  ;;  %5356 = vst [vmem:[#allocation83_spill] sm:$0xff] %v3496_v29  ;;  %v3505_v32 = vadd.f32 %v1072_v40, %v1071_v39  ;;  %v3508_v34 = vadd.f32 %v1078_v61, %v1077_v27  ;;  %v1086_v24 = vrot.slane %v270_v26, 4  ;;  %v1092_v41 = vrot.slane %v271_v5, 4  ;;  %v285_v29 = vld [vmem:[%s3162_s23 + $0x3f8] sm:$0xff] }
  0xd9   : > { %5357 = vst [vmem:[#allocation84_spill] sm:$0xff] %v3498_v30  ;;  %5358 = vst [vmem:[#allocation85_spill] sm:$0xff] %v3501_v42  ;;  %v1098_v9 = vrot.slane %v272_v20, 4  ;;  %v3510_v33 = vadd.f32 %v1084_v7, %v1083_v4  ;;  %v1104_v43 = vrot.slane %v273_v56, 4  ;;  %v1110_v35 = vrot.slane %v274_v11, 4 }
  0xda   : > { %5359 = vst [vmem:[#allocation86_spill] sm:$0xff] %v3503_v31  ;;  %5360 = vst [vmem:[#allocation87_spill] sm:$0xff] %v3505_v32  ;;  %v1116_v28 = vrot.slane %v275_v15, 4  ;;  %v1087_v36 = vadd.f32 %v1086_v24, %v270_v26  ;;  %v1093_v30 = vadd.f32 %v1092_v41, %v271_v5  ;;  %v1122_v37 = vrot.slane %v276_v16, 4 }
  0xdb   : > { %5361 = vst [vmem:[#allocation88_spill] sm:$0xff] %v3508_v34  ;;  %5362 = vst [vmem:[#allocation89_spill] sm:$0xff] %v3510_v33  ;;  %v1099_v23 = vadd.f32 %v1098_v9, %v272_v20  ;;  %v1105_v21 = vadd.f32 %v1104_v43, %v273_v56  ;;  %v1111_v38 = vadd.f32 %v1110_v35, %v274_v11  ;;  %v1128_v40 = vrot.slane %v277_v8, 4  ;;  %v278_v35 = vld [vmem:[%s3162_s23 + $0x3c0] sm:$0xff] }
  0xdc   : > { %v1117_v39 = vadd.f32 %v1116_v28, %v275_v15  ;;  %v1088_v32 = vrot.slane %v1087_v36, 2  ;;  %v1094_v31 = vrot.slane %v1093_v30, 2  ;;  %v1123_v61 = vadd.f32 %v1122_v37, %v276_v16  ;;  %v279_v28 = vld [vmem:[%s3162_s23 + $0x3c8] sm:$0xff]  ;;  %v280_v37 = vld [vmem:[%s3162_s23 + $0x3d0] sm:$0xff] }
  0xdd   : > { %v1100_v27 = vrot.slane %v1099_v23, 2  ;;  %v1106_v34 = vrot.slane %v1105_v21, 2  ;;  %v1112_v42 = vrot.slane %v1111_v38, 2  ;;  %v1129_v7 = vadd.f32 %v1128_v40, %v277_v8  ;;  %v284_v40 = vld [vmem:[%s3162_s23 + $0x3f0] sm:$0xff] }
  0xde   : > { %v1118_v4 = vrot.slane %v1117_v39, 2  ;;  %v1089_v33 = vadd.f32 %v1088_v32, %v1087_v36  ;;  %v1095_v26 = vadd.f32 %v1094_v31, %v1093_v30  ;;  %v1124_v5 = vrot.slane %v1123_v61, 2  ;;  %v281_v36 = vld [vmem:[%s3162_s23 + $0x3d8] sm:$0xff] }
  0xdf   : > { %v1101_v41 = vadd.f32 %v1100_v27, %v1099_v23  ;;  %v1107_v20 = vadd.f32 %v1106_v34, %v1105_v21  ;;  %v1113_v56 = vadd.f32 %v1112_v42, %v1111_v38  ;;  %v1130_v15 = vrot.slane %v1129_v7, 2  ;;  %v282_v34 = vld [vmem:[%s3162_s23 + $0x3e0] sm:$0xff]  ;;  %v283_v23 = vld [vmem:[%s3162_s23 + $0x3e8] sm:$0xff] }
  0xe0   : > { %v1119_v11 = vadd.f32 %v1118_v4, %v1117_v39  ;;  %v1090_v24 = vrot.slane %v1089_v33, 1  ;;  %v1096_v16 = vrot.slane %v1095_v26, 1  ;;  %v1125_v43 = vadd.f32 %v1124_v5, %v1123_v61 }
  0xe1   : > { %v1102_v9 = vrot.slane %v1101_v41, 1  ;;  %v1108_v8 = vrot.slane %v1107_v20, 1  ;;  %v1114_v30 = vrot.slane %v1113_v56, 1  ;;  %v1131_v32 = vadd.f32 %v1130_v15, %v1129_v7 }
  0xe2   : > { %v1120_v31 = vrot.slane %v1119_v11, 1  ;;  %v3518_v42 = vadd.f32 %v1090_v24, %v1089_v33  ;;  %v3520_v21 = vadd.f32 %v1096_v16, %v1095_v26  ;;  %v1126_v39 = vrot.slane %v1125_v43, 1 }
  0xe3   : > { %v3522_v38 = vadd.f32 %v1102_v9, %v1101_v41  ;;  %v3525_v27 = vadd.f32 %v1108_v8, %v1107_v20  ;;  %v3527_v61 = vadd.f32 %v1114_v30, %v1113_v56  ;;  %v1132_v5 = vrot.slane %v1131_v32, 1 }
  0xe4   : > { %5363 = vst [vmem:[#allocation90_spill] sm:$0xff] %v3518_v42  ;;  %5364 = vst [vmem:[#allocation91_spill] sm:$0xff] %v3520_v21  ;;  %v3529_v4 = vadd.f32 %v1120_v31, %v1119_v11  ;;  %v3532_v7 = vadd.f32 %v1126_v39, %v1125_v43  ;;  %v1134_v15 = vrot.slane %v278_v35, 4  ;;  %v1140_v25 = vrot.slane %v279_v28, 4  ;;  %v293_v21 = vld [vmem:[%s3162_s23 + $0x438] sm:$0xff] }
  0xe5   : > { %5365 = vst [vmem:[#allocation92_spill] sm:$0xff] %v3522_v38  ;;  %5366 = vst [vmem:[#allocation93_spill] sm:$0xff] %v3525_v27  ;;  %v1146_v33 = vrot.slane %v280_v37, 4  ;;  %v3534_v24 = vadd.f32 %v1132_v5, %v1131_v32  ;;  %v1152_v26 = vrot.slane %v281_v36, 4  ;;  %v1158_v41 = vrot.slane %v282_v34, 4 }
  0xe6   : > { %5367 = vst [vmem:[#allocation94_spill] sm:$0xff] %v3527_v61  ;;  %5368 = vst [vmem:[#allocation95_spill] sm:$0xff] %v3529_v4  ;;  %v1164_v16 = vrot.slane %v283_v23, 4  ;;  %v1135_v9 = vadd.f32 %v1134_v15, %v278_v35  ;;  %v1141_v38 = vadd.f32 %v1140_v25, %v279_v28  ;;  %v1170_v8 = vrot.slane %v284_v40, 4 }
  0xe7   : > { %5369 = vst [vmem:[#allocation96_spill] sm:$0xff] %v3532_v7  ;;  %5370 = vst [vmem:[#allocation97_spill] sm:$0xff] %v3534_v24  ;;  %v1147_v20 = vadd.f32 %v1146_v33, %v280_v37  ;;  %v1153_v56 = vadd.f32 %v1152_v26, %v281_v36  ;;  %v1159_v30 = vadd.f32 %v1158_v41, %v282_v34  ;;  %v1176_v31 = vrot.slane %v285_v29, 4  ;;  %v286_v41 = vld [vmem:[%s3162_s23 + $0x400] sm:$0xff] }
  0xe8   : > { %v1165_v11 = vadd.f32 %v1164_v16, %v283_v23  ;;  %v1136_v4 = vrot.slane %v1135_v9, 2  ;;  %v1142_v61 = vrot.slane %v1141_v38, 2  ;;  %v1171_v39 = vadd.f32 %v1170_v8, %v284_v40  ;;  %v287_v16 = vld [vmem:[%s3162_s23 + $0x408] sm:$0xff]  ;;  %v288_v8 = vld [vmem:[%s3162_s23 + $0x410] sm:$0xff] }
  0xe9   : > { %v1148_v43 = vrot.slane %v1147_v20, 2  ;;  %v1154_v7 = vrot.slane %v1153_v56, 2  ;;  %v1160_v27 = vrot.slane %v1159_v30, 2  ;;  %v1177_v5 = vadd.f32 %v1176_v31, %v285_v29  ;;  %v292_v31 = vld [vmem:[%s3162_s23 + $0x430] sm:$0xff] }
  0xea   : > { %v1166_v32 = vrot.slane %v1165_v11, 2  ;;  %v1137_v24 = vadd.f32 %v1136_v4, %v1135_v9  ;;  %v1143_v35 = vadd.f32 %v1142_v61, %v1141_v38  ;;  %v1172_v28 = vrot.slane %v1171_v39, 2  ;;  %v289_v9 = vld [vmem:[%s3162_s23 + $0x418] sm:$0xff] }
  0xeb   : > { %v1149_v25 = vadd.f32 %v1148_v43, %v1147_v20  ;;  %v1155_v37 = vadd.f32 %v1154_v7, %v1153_v56  ;;  %v1161_v36 = vadd.f32 %v1160_v27, %v1159_v30  ;;  %v1178_v23 = vrot.slane %v1177_v5, 2  ;;  %v290_v7 = vld [vmem:[%s3162_s23 + $0x420] sm:$0xff]  ;;  %v291_v20 = vld [vmem:[%s3162_s23 + $0x428] sm:$0xff] }
  0xec   : > { %v1167_v34 = vadd.f32 %v1166_v32, %v1165_v11  ;;  %v1138_v15 = vrot.slane %v1137_v24, 1  ;;  %v1144_v40 = vrot.slane %v1143_v35, 1  ;;  %v1173_v26 = vadd.f32 %v1172_v28, %v1171_v39 }
  0xed   : > { %v1150_v33 = vrot.slane %v1149_v25, 1  ;;  %v1156_v29 = vrot.slane %v1155_v37, 1  ;;  %v1162_v38 = vrot.slane %v1161_v36, 1  ;;  %v1179_v4 = vadd.f32 %v1178_v23, %v1177_v5 }
  0xee   : > { %v1168_v61 = vrot.slane %v1167_v34, 1  ;;  %v3542_v27 = vadd.f32 %v1138_v15, %v1137_v24  ;;  %v3544_v56 = vadd.f32 %v1144_v40, %v1143_v35  ;;  %v1174_v11 = vrot.slane %v1173_v26, 1 }
  0xef   : > { %v3546_v30 = vadd.f32 %v1150_v33, %v1149_v25  ;;  %v3549_v43 = vadd.f32 %v1156_v29, %v1155_v37  ;;  %v3551_v39 = vadd.f32 %v1162_v38, %v1161_v36  ;;  %v1180_v28 = vrot.slane %v1179_v4, 1 }
  0xf0   : > { %5371 = vst [vmem:[#allocation98_spill] sm:$0xff] %v3542_v27  ;;  %5372 = vst [vmem:[#allocation99_spill] sm:$0xff] %v3544_v56  ;;  %v3553_v32 = vadd.f32 %v1168_v61, %v1167_v34  ;;  %v3556_v5 = vadd.f32 %v1174_v11, %v1173_v26  ;;  %v1182_v23 = vrot.slane %v286_v41, 4  ;;  %v1188_v42 = vrot.slane %v287_v16, 4  ;;  %v301_v56 = vld [vmem:[%s3162_s23 + $0x478] sm:$0xff] }
  0xf1   : > { %5373 = vst [vmem:[#allocation100_spill] sm:$0xff] %v3546_v30  ;;  %5374 = vst [vmem:[#allocation101_spill] sm:$0xff] %v3549_v43  ;;  %v1194_v24 = vrot.slane %v288_v8, 4  ;;  %v3558_v15 = vadd.f32 %v1180_v28, %v1179_v4  ;;  %v1200_v35 = vrot.slane %v289_v9, 4  ;;  %v1206_v25 = vrot.slane %v290_v7, 4 }
  0xf2   : > { %5375 = vst [vmem:[#allocation102_spill] sm:$0xff] %v3551_v39  ;;  %5376 = vst [vmem:[#allocation103_spill] sm:$0xff] %v3553_v32  ;;  %v1212_v40 = vrot.slane %v291_v20, 4  ;;  %v1183_v33 = vadd.f32 %v1182_v23, %v286_v41  ;;  %v1189_v30 = vadd.f32 %v1188_v42, %v287_v16  ;;  %v1218_v29 = vrot.slane %v292_v31, 4 }
  0xf3   : > { %5377 = vst [vmem:[#allocation104_spill] sm:$0xff] %v3556_v5  ;;  %5378 = vst [vmem:[#allocation105_spill] sm:$0xff] %v3558_v15  ;;  %v1195_v37 = vadd.f32 %v1194_v24, %v288_v8  ;;  %v1201_v36 = vadd.f32 %v1200_v35, %v289_v9  ;;  %v1207_v38 = vadd.f32 %v1206_v25, %v290_v7  ;;  %v1224_v61 = vrot.slane %v293_v21, 4  ;;  %v294_v25 = vld [vmem:[%s3162_s23 + $0x440] sm:$0xff] }
  0xf4   : > { %v1213_v34 = vadd.f32 %v1212_v40, %v291_v20  ;;  %v1184_v32 = vrot.slane %v1183_v33, 2  ;;  %v1190_v39 = vrot.slane %v1189_v30, 2  ;;  %v1219_v11 = vadd.f32 %v1218_v29, %v292_v31  ;;  %v295_v40 = vld [vmem:[%s3162_s23 + $0x448] sm:$0xff]  ;;  %v296_v29 = vld [vmem:[%s3162_s23 + $0x450] sm:$0xff] }
  0xf5   : > { %v1196_v26 = vrot.slane %v1195_v37, 2  ;;  %v1202_v5 = vrot.slane %v1201_v36, 2  ;;  %v1208_v43 = vrot.slane %v1207_v38, 2  ;;  %v1225_v28 = vadd.f32 %v1224_v61, %v293_v21  ;;  %v300_v61 = vld [vmem:[%s3162_s23 + $0x470] sm:$0xff] }
  0xf6   : > { %v1214_v4 = vrot.slane %v1213_v34, 2  ;;  %v1185_v15 = vadd.f32 %v1184_v32, %v1183_v33  ;;  %v1191_v41 = vadd.f32 %v1190_v39, %v1189_v30  ;;  %v1220_v16 = vrot.slane %v1219_v11, 2  ;;  %v297_v33 = vld [vmem:[%s3162_s23 + $0x458] sm:$0xff] }
  0xf7   : > { %v1197_v42 = vadd.f32 %v1196_v26, %v1195_v37  ;;  %v1203_v8 = vadd.f32 %v1202_v5, %v1201_v36  ;;  %v1209_v9 = vadd.f32 %v1208_v43, %v1207_v38  ;;  %v1226_v20 = vrot.slane %v1225_v28, 2  ;;  %v298_v5 = vld [vmem:[%s3162_s23 + $0x460] sm:$0xff]  ;;  %v299_v37 = vld [vmem:[%s3162_s23 + $0x468] sm:$0xff] }
  0xf8   : > { %v1215_v7 = vadd.f32 %v1214_v4, %v1213_v34  ;;  %v1186_v23 = vrot.slane %v1185_v15, 1  ;;  %v1192_v31 = vrot.slane %v1191_v41, 1  ;;  %v1221_v35 = vadd.f32 %v1220_v16, %v1219_v11 }
  0xf9   : > { %v1198_v24 = vrot.slane %v1197_v42, 1  ;;  %v1204_v21 = vrot.slane %v1203_v8, 1  ;;  %v1210_v30 = vrot.slane %v1209_v9, 1  ;;  %v1227_v32 = vadd.f32 %v1226_v20, %v1225_v28 }
  0xfa   : > { %v1216_v39 = vrot.slane %v1215_v7, 1  ;;  %v3566_v43 = vadd.f32 %v1186_v23, %v1185_v15  ;;  %v3568_v36 = vadd.f32 %v1192_v31, %v1191_v41  ;;  %v1222_v34 = vrot.slane %v1221_v35, 1 }
  0xfb   : > { %v3570_v38 = vadd.f32 %v1198_v24, %v1197_v42  ;;  %v3573_v26 = vadd.f32 %v1204_v21, %v1203_v8  ;;  %v3575_v11 = vadd.f32 %v1210_v30, %v1209_v9  ;;  %v1228_v16 = vrot.slane %v1227_v32, 1 }
  0xfc   : > { %5379 = vst [vmem:[#allocation106_spill] sm:$0xff] %v3566_v43  ;;  %5380 = vst [vmem:[#allocation107_spill] sm:$0xff] %v3568_v36  ;;  %v3577_v4 = vadd.f32 %v1216_v39, %v1215_v7  ;;  %v3580_v28 = vadd.f32 %v1222_v34, %v1221_v35  ;;  %v1230_v20 = vrot.slane %v294_v25, 4  ;;  %v1236_v27 = vrot.slane %v295_v40, 4  ;;  %v309_v36 = vld [vmem:[%s3162_s23 + $0x4b8] sm:$0xff] }
  0xfd   : > { %5381 = vst [vmem:[#allocation108_spill] sm:$0xff] %v3570_v38  ;;  %5382 = vst [vmem:[#allocation109_spill] sm:$0xff] %v3573_v26  ;;  %v1242_v15 = vrot.slane %v296_v29, 4  ;;  %v3582_v23 = vadd.f32 %v1228_v16, %v1227_v32  ;;  %v1248_v41 = vrot.slane %v297_v33, 4  ;;  %v1254_v42 = vrot.slane %v298_v5, 4 }
  0xfe   : > { %5383 = vst [vmem:[#allocation110_spill] sm:$0xff] %v3575_v11  ;;  %5384 = vst [vmem:[#allocation111_spill] sm:$0xff] %v3577_v4  ;;  %v1260_v31 = vrot.slane %v299_v37, 4  ;;  %v1231_v24 = vadd.f32 %v1230_v20, %v294_v25  ;;  %v1237_v38 = vadd.f32 %v1236_v27, %v295_v40  ;;  %v1266_v21 = vrot.slane %v300_v61, 4 }
  0xff   : > { %5385 = vst [vmem:[#allocation112_spill] sm:$0xff] %v3580_v28  ;;  %5386 = vst [vmem:[#allocation113_spill] sm:$0xff] %v3582_v23  ;;  %v1243_v8 = vadd.f32 %v1242_v15, %v296_v29  ;;  %v1249_v9 = vadd.f32 %v1248_v41, %v297_v33  ;;  %v1255_v30 = vadd.f32 %v1254_v42, %v298_v5  ;;  %v1272_v39 = vrot.slane %v301_v56, 4  ;;  %v302_v42 = vld [vmem:[%s3162_s23 + $0x480] sm:$0xff] }
 0x100   : > { %v1261_v7 = vadd.f32 %v1260_v31, %v299_v37  ;;  %v1232_v4 = vrot.slane %v1231_v24, 2  ;;  %v1238_v11 = vrot.slane %v1237_v38, 2  ;;  %v1267_v34 = vadd.f32 %v1266_v21, %v300_v61  ;;  %v303_v31 = vld [vmem:[%s3162_s23 + $0x488] sm:$0xff]  ;;  %v304_v21 = vld [vmem:[%s3162_s23 + $0x490] sm:$0xff] }
 0x101   : > { %v1244_v35 = vrot.slane %v1243_v8, 2  ;;  %v1250_v28 = vrot.slane %v1249_v9, 2  ;;  %v1256_v26 = vrot.slane %v1255_v30, 2  ;;  %v1273_v16 = vadd.f32 %v1272_v39, %v301_v56  ;;  %v308_v39 = vld [vmem:[%s3162_s23 + $0x4b0] sm:$0xff] }
 0x102   : > { %v1262_v32 = vrot.slane %v1261_v7, 2  ;;  %v1233_v23 = vadd.f32 %v1232_v4, %v1231_v24  ;;  %v1239_v25 = vadd.f32 %v1238_v11, %v1237_v38  ;;  %v1268_v40 = vrot.slane %v1267_v34, 2  ;;  %v305_v24 = vld [vmem:[%s3162_s23 + $0x498] sm:$0xff] }
 0x103   : > { %v1245_v27 = vadd.f32 %v1244_v35, %v1243_v8  ;;  %v1251_v29 = vadd.f32 %v1250_v28, %v1249_v9  ;;  %v1257_v33 = vadd.f32 %v1256_v26, %v1255_v30  ;;  %v1274_v37 = vrot.slane %v1273_v16, 2  ;;  %v306_v28 = vld [vmem:[%s3162_s23 + $0x4a0] sm:$0xff]  ;;  %v307_v8 = vld [vmem:[%s3162_s23 + $0x4a8] sm:$0xff] }
 0x104   : > { %v1263_v5 = vadd.f32 %v1262_v32, %v1261_v7  ;;  %v1234_v20 = vrot.slane %v1233_v23, 1  ;;  %v1240_v61 = vrot.slane %v1239_v25, 1  ;;  %v1269_v41 = vadd.f32 %v1268_v40, %v1267_v34 }
 0x105   : > { %v1246_v15 = vrot.slane %v1245_v27, 1  ;;  %v1252_v56 = vrot.slane %v1251_v29, 1  ;;  %v1258_v38 = vrot.slane %v1257_v33, 1  ;;  %v1275_v4 = vadd.f32 %v1274_v37, %v1273_v16 }
 0x106   : > { %v1264_v11 = vrot.slane %v1263_v5, 1  ;;  %v3590_v26 = vadd.f32 %v1234_v20, %v1233_v23  ;;  %v3592_v9 = vadd.f32 %v1240_v61, %v1239_v25  ;;  %v1270_v7 = vrot.slane %v1269_v41, 1 }
 0x107   : > { %v3594_v30 = vadd.f32 %v1246_v15, %v1245_v27  ;;  %v3597_v35 = vadd.f32 %v1252_v56, %v1251_v29  ;;  %v3599_v34 = vadd.f32 %v1258_v38, %v1257_v33  ;;  %v1276_v40 = vrot.slane %v1275_v4, 1 }
 0x108   : > { %5387 = vst [vmem:[#allocation114_spill] sm:$0xff] %v3590_v26  ;;  %5388 = vst [vmem:[#allocation115_spill] sm:$0xff] %v3592_v9  ;;  %v3601_v32 = vadd.f32 %v1264_v11, %v1263_v5  ;;  %v3604_v16 = vadd.f32 %v1270_v7, %v1269_v41  ;;  %v1278_v37 = vrot.slane %v302_v42, 4  ;;  %v1284_v43 = vrot.slane %v303_v31, 4  ;;  %v317_v9 = vld [vmem:[%s3162_s23 + $0x4f8] sm:$0xff] }
 0x109   : > { %5389 = vst [vmem:[#allocation116_spill] sm:$0xff] %v3594_v30  ;;  %5390 = vst [vmem:[#allocation117_spill] sm:$0xff] %v3597_v35  ;;  %v1290_v23 = vrot.slane %v304_v21, 4  ;;  %v3606_v20 = vadd.f32 %v1276_v40, %v1275_v4  ;;  %v1296_v25 = vrot.slane %v305_v24, 4  ;;  %v1302_v27 = vrot.slane %v306_v28, 4 }
 0x10a   : > { %5391 = vst [vmem:[#allocation118_spill] sm:$0xff] %v3599_v34  ;;  %5392 = vst [vmem:[#allocation119_spill] sm:$0xff] %v3601_v32  ;;  %v1308_v61 = vrot.slane %v307_v8, 4  ;;  %v1279_v15 = vadd.f32 %v1278_v37, %v302_v42  ;;  %v1285_v30 = vadd.f32 %v1284_v43, %v303_v31  ;;  %v1314_v56 = vrot.slane %v308_v39, 4 }
 0x10b   : > { %5393 = vst [vmem:[#allocation120_spill] sm:$0xff] %v3604_v16  ;;  %5394 = vst [vmem:[#allocation121_spill] sm:$0xff] %v3606_v20  ;;  %v1291_v29 = vadd.f32 %v1290_v23, %v304_v21  ;;  %v1297_v33 = vadd.f32 %v1296_v25, %v305_v24  ;;  %v1303_v38 = vadd.f32 %v1302_v27, %v306_v28  ;;  %v1320_v11 = vrot.slane %v309_v36, 4  ;;  %v310_v27 = vld [vmem:[%s3162_s23 + $0x4c0] sm:$0xff] }
 0x10c   : > { %v1309_v5 = vadd.f32 %v1308_v61, %v307_v8  ;;  %v1280_v32 = vrot.slane %v1279_v15, 2  ;;  %v1286_v34 = vrot.slane %v1285_v30, 2  ;;  %v1315_v7 = vadd.f32 %v1314_v56, %v308_v39  ;;  %v311_v61 = vld [vmem:[%s3162_s23 + $0x4c8] sm:$0xff]  ;;  %v312_v56 = vld [vmem:[%s3162_s23 + $0x4d0] sm:$0xff] }
 0x10d   : > { %v1292_v41 = vrot.slane %v1291_v29, 2  ;;  %v1298_v16 = vrot.slane %v1297_v33, 2  ;;  %v1304_v35 = vrot.slane %v1303_v38, 2  ;;  %v1321_v40 = vadd.f32 %v1320_v11, %v309_v36  ;;  %v316_v11 = vld [vmem:[%s3162_s23 + $0x4f0] sm:$0xff] }
 0x10e   : > { %v1310_v4 = vrot.slane %v1309_v5, 2  ;;  %v1281_v20 = vadd.f32 %v1280_v32, %v1279_v15  ;;  %v1287_v42 = vadd.f32 %v1286_v34, %v1285_v30  ;;  %v1316_v31 = vrot.slane %v1315_v7, 2  ;;  %v313_v15 = vld [vmem:[%s3162_s23 + $0x4d8] sm:$0xff] }
 0x10f   : > { %v1293_v43 = vadd.f32 %v1292_v41, %v1291_v29  ;;  %v1299_v21 = vadd.f32 %v1298_v16, %v1297_v33  ;;  %v1305_v24 = vadd.f32 %v1304_v35, %v1303_v38  ;;  %v1322_v8 = vrot.slane %v1321_v40, 2  ;;  %v314_v16 = vld [vmem:[%s3162_s23 + $0x4e0] sm:$0xff]  ;;  %v315_v29 = vld [vmem:[%s3162_s23 + $0x4e8] sm:$0xff] }
 0x110   : > { %v1311_v28 = vadd.f32 %v1310_v4, %v1309_v5  ;;  %v1282_v37 = vrot.slane %v1281_v20, 1  ;;  %v1288_v39 = vrot.slane %v1287_v42, 1  ;;  %v1317_v25 = vadd.f32 %v1316_v31, %v1315_v7 }
 0x111   : > { %v1294_v23 = vrot.slane %v1293_v43, 1  ;;  %v1300_v36 = vrot.slane %v1299_v21, 1  ;;  %v1306_v30 = vrot.slane %v1305_v24, 1  ;;  %v1323_v32 = vadd.f32 %v1322_v8, %v1321_v40 }
 0x112   : > { %v1312_v34 = vrot.slane %v1311_v28, 1  ;;  %v3614_v35 = vadd.f32 %v1282_v37, %v1281_v20  ;;  %v3616_v33 = vadd.f32 %v1288_v39, %v1287_v42  ;;  %v1318_v5 = vrot.slane %v1317_v25, 1 }
 0x113   : > { %v3618_v38 = vadd.f32 %v1294_v23, %v1293_v43  ;;  %v3621_v41 = vadd.f32 %v1300_v36, %v1299_v21  ;;  %v3623_v7 = vadd.f32 %v1306_v30, %v1305_v24  ;;  %v1324_v31 = vrot.slane %v1323_v32, 1 }
 0x114   : > { %5395 = vst [vmem:[#allocation122_spill] sm:$0xff] %v3614_v35  ;;  %5396 = vst [vmem:[#allocation123_spill] sm:$0xff] %v3616_v33  ;;  %v3625_v4 = vadd.f32 %v1312_v34, %v1311_v28  ;;  %v3628_v40 = vadd.f32 %v1318_v5, %v1317_v25  ;;  %v1326_v8 = vrot.slane %v310_v27, 4  ;;  %v1332_v26 = vrot.slane %v311_v61, 4  ;;  %v325_v33 = vld [vmem:[%s3162_s23 + $0x538] sm:$0xff] }
 0x115   : > { %5397 = vst [vmem:[#allocation124_spill] sm:$0xff] %v3618_v38  ;;  %5398 = vst [vmem:[#allocation125_spill] sm:$0xff] %v3621_v41  ;;  %v1338_v20 = vrot.slane %v312_v56, 4  ;;  %v3630_v37 = vadd.f32 %v1324_v31, %v1323_v32  ;;  %v1344_v42 = vrot.slane %v313_v15, 4  ;;  %v1350_v43 = vrot.slane %v314_v16, 4 }
 0x116   : > { %5399 = vst [vmem:[#allocation126_spill] sm:$0xff] %v3623_v7  ;;  %5400 = vst [vmem:[#allocation127_spill] sm:$0xff] %v3625_v4  ;;  %v1356_v39 = vrot.slane %v315_v29, 4  ;;  %v1327_v23 = vadd.f32 %v1326_v8, %v310_v27  ;;  %v1333_v38 = vadd.f32 %v1332_v26, %v311_v61  ;;  %v1362_v36 = vrot.slane %v316_v11, 4 }
 0x117   : > { %5401 = vst [vmem:[#allocation128_spill] sm:$0xff] %v3628_v40  ;;  %5402 = vst [vmem:[#allocation129_spill] sm:$0xff] %v3630_v37  ;;  %v1339_v21 = vadd.f32 %v1338_v20, %v312_v56  ;;  %v1345_v24 = vadd.f32 %v1344_v42, %v313_v15  ;;  %v1351_v30 = vadd.f32 %v1350_v43, %v314_v16  ;;  %v1368_v34 = vrot.slane %v317_v9, 4  ;;  %v318_v43 = vld [vmem:[%s3162_s23 + $0x500] sm:$0xff] }
 0x118   : > { %v1357_v28 = vadd.f32 %v1356_v39, %v315_v29  ;;  %v1328_v4 = vrot.slane %v1327_v23, 2  ;;  %v1334_v7 = vrot.slane %v1333_v38, 2  ;;  %v1363_v5 = vadd.f32 %v1362_v36, %v316_v11  ;;  %v319_v39 = vld [vmem:[%s3162_s23 + $0x508] sm:$0xff]  ;;  %v320_v36 = vld [vmem:[%s3162_s23 + $0x510] sm:$0xff] }
 0x119   : > { %v1340_v25 = vrot.slane %v1339_v21, 2  ;;  %v1346_v40 = vrot.slane %v1345_v24, 2  ;;  %v1352_v41 = vrot.slane %v1351_v30, 2  ;;  %v1369_v31 = vadd.f32 %v1368_v34, %v317_v9  ;;  %v324_v34 = vld [vmem:[%s3162_s23 + $0x530] sm:$0xff] }
 0x11a   : > { %v1358_v32 = vrot.slane %v1357_v28, 2  ;;  %v1329_v37 = vadd.f32 %v1328_v4, %v1327_v23  ;;  %v1335_v27 = vadd.f32 %v1334_v7, %v1333_v38  ;;  %v1364_v61 = vrot.slane %v1363_v5, 2  ;;  %v321_v23 = vld [vmem:[%s3162_s23 + $0x518] sm:$0xff] }
 0x11b   : > { %v1341_v26 = vadd.f32 %v1340_v25, %v1339_v21  ;;  %v1347_v56 = vadd.f32 %v1346_v40, %v1345_v24  ;;  %v1353_v15 = vadd.f32 %v1352_v41, %v1351_v30  ;;  %v1370_v29 = vrot.slane %v1369_v31, 2  ;;  %v322_v40 = vld [vmem:[%s3162_s23 + $0x520] sm:$0xff]  ;;  %v323_v21 = vld [vmem:[%s3162_s23 + $0x528] sm:$0xff] }
 0x11c   : > { %v1359_v16 = vadd.f32 %v1358_v32, %v1357_v28  ;;  %v1330_v8 = vrot.slane %v1329_v37, 1  ;;  %v1336_v11 = vrot.slane %v1335_v27, 1  ;;  %v1365_v42 = vadd.f32 %v1364_v61, %v1363_v5 }
 0x11d   : > { %v1342_v20 = vrot.slane %v1341_v26, 1  ;;  %v1348_v9 = vrot.slane %v1347_v56, 1  ;;  %v1354_v38 = vrot.slane %v1353_v15, 1  ;;  %v1371_v4 = vadd.f32 %v1370_v29, %v1369_v31 }
 0x11e   : > { %v1360_v7 = vrot.slane %v1359_v16, 1  ;;  %v3638_v41 = vadd.f32 %v1330_v8, %v1329_v37  ;;  %v3640_v24 = vadd.f32 %v1336_v11, %v1335_v27  ;;  %v1366_v28 = vrot.slane %v1365_v42, 1 }
 0x11f   : > { %v3642_v30 = vadd.f32 %v1342_v20, %v1341_v26  ;;  %v3645_v25 = vadd.f32 %v1348_v9, %v1347_v56  ;;  %v3647_v5 = vadd.f32 %v1354_v38, %v1353_v15  ;;  %v1372_v61 = vrot.slane %v1371_v4, 1 }
 0x120   : > { %5403 = vst [vmem:[#allocation130_spill] sm:$0xff] %v3638_v41  ;;  %5404 = vst [vmem:[#allocation131_spill] sm:$0xff] %v3640_v24  ;;  %v3649_v32 = vadd.f32 %v1360_v7, %v1359_v16  ;;  %v3652_v31 = vadd.f32 %v1366_v28, %v1365_v42  ;;  %v1374_v29 = vrot.slane %v318_v43, 4  ;;  %v1380_v35 = vrot.slane %v319_v39, 4  ;;  %v333_v24 = vld [vmem:[%s3162_s23 + $0x578] sm:$0xff] }
 0x121   : > { %5405 = vst [vmem:[#allocation132_spill] sm:$0xff] %v3642_v30  ;;  %5406 = vst [vmem:[#allocation133_spill] sm:$0xff] %v3645_v25  ;;  %v1386_v37 = vrot.slane %v320_v36, 4  ;;  %v3654_v8 = vadd.f32 %v1372_v61, %v1371_v4  ;;  %v1392_v27 = vrot.slane %v321_v23, 4  ;;  %v1398_v26 = vrot.slane %v322_v40, 4 }
 0x122   : > { %5407 = vst [vmem:[#allocation134_spill] sm:$0xff] %v3647_v5  ;;  %5408 = vst [vmem:[#allocation135_spill] sm:$0xff] %v3649_v32  ;;  %v1404_v11 = vrot.slane %v323_v21, 4  ;;  %v1375_v20 = vadd.f32 %v1374_v29, %v318_v43  ;;  %v1381_v30 = vadd.f32 %v1380_v35, %v319_v39  ;;  %v1410_v9 = vrot.slane %v324_v34, 4 }
 0x123   : > { %5409 = vst [vmem:[#allocation136_spill] sm:$0xff] %v3652_v31  ;;  %5410 = vst [vmem:[#allocation137_spill] sm:$0xff] %v3654_v8  ;;  %v1387_v56 = vadd.f32 %v1386_v37, %v320_v36  ;;  %v1393_v15 = vadd.f32 %v1392_v27, %v321_v23  ;;  %v1399_v38 = vadd.f32 %v1398_v26, %v322_v40  ;;  %v1416_v7 = vrot.slane %v325_v33, 4  ;;  %v326_v26 = vld [vmem:[%s3162_s23 + $0x540] sm:$0xff] }
 0x124   : > { %v1405_v16 = vadd.f32 %v1404_v11, %v323_v21  ;;  %v1376_v32 = vrot.slane %v1375_v20, 2  ;;  %v1382_v5 = vrot.slane %v1381_v30, 2  ;;  %v1411_v28 = vadd.f32 %v1410_v9, %v324_v34  ;;  %v327_v11 = vld [vmem:[%s3162_s23 + $0x548] sm:$0xff]  ;;  %v328_v9 = vld [vmem:[%s3162_s23 + $0x550] sm:$0xff] }
 0x125   : > { %v1388_v42 = vrot.slane %v1387_v56, 2  ;;  %v1394_v31 = vrot.slane %v1393_v15, 2  ;;  %v1400_v25 = vrot.slane %v1399_v38, 2  ;;  %v1417_v61 = vadd.f32 %v1416_v7, %v325_v33  ;;  %v332_v7 = vld [vmem:[%s3162_s23 + $0x570] sm:$0xff] }
 0x126   : > { %v1406_v4 = vrot.slane %v1405_v16, 2  ;;  %v1377_v8 = vadd.f32 %v1376_v32, %v1375_v20  ;;  %v1383_v43 = vadd.f32 %v1382_v5, %v1381_v30  ;;  %v1412_v39 = vrot.slane %v1411_v28, 2  ;;  %v329_v20 = vld [vmem:[%s3162_s23 + $0x558] sm:$0xff] }
 0x127   : > { %v1389_v35 = vadd.f32 %v1388_v42, %v1387_v56  ;;  %v1395_v36 = vadd.f32 %v1394_v31, %v1393_v15  ;;  %v1401_v23 = vadd.f32 %v1400_v25, %v1399_v38  ;;  %v1418_v21 = vrot.slane %v1417_v61, 2  ;;  %v330_v31 = vld [vmem:[%s3162_s23 + $0x560] sm:$0xff]  ;;  %v331_v56 = vld [vmem:[%s3162_s23 + $0x568] sm:$0xff] }
 0x128   : > { %v1407_v40 = vadd.f32 %v1406_v4, %v1405_v16  ;;  %v1378_v29 = vrot.slane %v1377_v8, 1  ;;  %v1384_v34 = vrot.slane %v1383_v43, 1  ;;  %v1413_v27 = vadd.f32 %v1412_v39, %v1411_v28 }
 0x129   : > { %v1390_v37 = vrot.slane %v1389_v35, 1  ;;  %v1396_v33 = vrot.slane %v1395_v36, 1  ;;  %v1402_v30 = vrot.slane %v1401_v23, 1  ;;  %v1419_v32 = vadd.f32 %v1418_v21, %v1417_v61 }
 0x12a   : > { %v1408_v5 = vrot.slane %v1407_v40, 1  ;;  %v3662_v25 = vadd.f32 %v1378_v29, %v1377_v8  ;;  %v3664_v15 = vadd.f32 %v1384_v34, %v1383_v43  ;;  %v1414_v16 = vrot.slane %v1413_v27, 1 }
 0x12b   : > { %v3666_v38 = vadd.f32 %v1390_v37, %v1389_v35  ;;  %v3669_v42 = vadd.f32 %v1396_v33, %v1395_v36  ;;  %v3671_v28 = vadd.f32 %v1402_v30, %v1401_v23  ;;  %v1420_v39 = vrot.slane %v1419_v32, 1 }
 0x12c   : > { %5411 = vst [vmem:[#allocation138_spill] sm:$0xff] %v3662_v25  ;;  %5412 = vst [vmem:[#allocation139_spill] sm:$0xff] %v3664_v15  ;;  %v3673_v4 = vadd.f32 %v1408_v5, %v1407_v40  ;;  %v3676_v61 = vadd.f32 %v1414_v16, %v1413_v27  ;;  %v1422_v21 = vrot.slane %v326_v26, 4  ;;  %v1428_v41 = vrot.slane %v327_v11, 4  ;;  %v341_v15 = vld [vmem:[%s3162_s23 + $0x5b8] sm:$0xff] }
 0x12d   : > { %5413 = vst [vmem:[#allocation140_spill] sm:$0xff] %v3666_v38  ;;  %5414 = vst [vmem:[#allocation141_spill] sm:$0xff] %v3669_v42  ;;  %v1434_v8 = vrot.slane %v328_v9, 4  ;;  %v3678_v29 = vadd.f32 %v1420_v39, %v1419_v32  ;;  %v1440_v43 = vrot.slane %v329_v20, 4  ;;  %v1446_v35 = vrot.slane %v330_v31, 4 }
 0x12e   : > { %5415 = vst [vmem:[#allocation142_spill] sm:$0xff] %v3671_v28  ;;  %5416 = vst [vmem:[#allocation143_spill] sm:$0xff] %v3673_v4  ;;  %v1452_v34 = vrot.slane %v331_v56, 4  ;;  %v1423_v37 = vadd.f32 %v1422_v21, %v326_v26  ;;  %v1429_v38 = vadd.f32 %v1428_v41, %v327_v11  ;;  %v1458_v33 = vrot.slane %v332_v7, 4 }
 0x12f   : > { %5417 = vst [vmem:[#allocation144_spill] sm:$0xff] %v3676_v61  ;;  %5418 = vst [vmem:[#allocation145_spill] sm:$0xff] %v3678_v29  ;;  %v1435_v36 = vadd.f32 %v1434_v8, %v328_v9  ;;  %v1441_v23 = vadd.f32 %v1440_v43, %v329_v20  ;;  %v1447_v30 = vadd.f32 %v1446_v35, %v330_v31  ;;  %v1464_v5 = vrot.slane %v333_v24, 4  ;;  %v334_v35 = vld [vmem:[%s3162_s23 + $0x580] sm:$0xff] }
 0x130   : > { %v1453_v40 = vadd.f32 %v1452_v34, %v331_v56  ;;  %v1424_v4 = vrot.slane %v1423_v37, 2  ;;  %v1430_v28 = vrot.slane %v1429_v38, 2  ;;  %v1459_v16 = vadd.f32 %v1458_v33, %v332_v7  ;;  %v335_v34 = vld [vmem:[%s3162_s23 + $0x588] sm:$0xff]  ;;  %v336_v33 = vld [vmem:[%s3162_s23 + $0x590] sm:$0xff] }
 0x131   : > { %v1436_v27 = vrot.slane %v1435_v36, 2  ;;  %v1442_v61 = vrot.slane %v1441_v23, 2  ;;  %v1448_v42 = vrot.slane %v1447_v30, 2  ;;  %v1465_v39 = vadd.f32 %v1464_v5, %v333_v24  ;;  %v340_v5 = vld [vmem:[%s3162_s23 + $0x5b0] sm:$0xff] }
 0x132   : > { %v1454_v32 = vrot.slane %v1453_v40, 2  ;;  %v1425_v29 = vadd.f32 %v1424_v4, %v1423_v37  ;;  %v1431_v26 = vadd.f32 %v1430_v28, %v1429_v38  ;;  %v1460_v11 = vrot.slane %v1459_v16, 2  ;;  %v337_v37 = vld [vmem:[%s3162_s23 + $0x598] sm:$0xff] }
 0x133   : > { %v1437_v41 = vadd.f32 %v1436_v27, %v1435_v36  ;;  %v1443_v9 = vadd.f32 %v1442_v61, %v1441_v23  ;;  %v1449_v20 = vadd.f32 %v1448_v42, %v1447_v30  ;;  %v1466_v56 = vrot.slane %v1465_v39, 2  ;;  %v338_v61 = vld [vmem:[%s3162_s23 + $0x5a0] sm:$0xff]  ;;  %v339_v36 = vld [vmem:[%s3162_s23 + $0x5a8] sm:$0xff] }
 0x134   : > { %v1455_v31 = vadd.f32 %v1454_v32, %v1453_v40  ;;  %v1426_v21 = vrot.slane %v1425_v29, 1  ;;  %v1432_v7 = vrot.slane %v1431_v26, 1  ;;  %v1461_v43 = vadd.f32 %v1460_v11, %v1459_v16 }
 0x135   : > { %v1438_v8 = vrot.slane %v1437_v41, 1  ;;  %v1444_v24 = vrot.slane %v1443_v9, 1  ;;  %v1450_v38 = vrot.slane %v1449_v20, 1  ;;  %v1467_v4 = vadd.f32 %v1466_v56, %v1465_v39 }
 0x136   : > { %v1456_v28 = vrot.slane %v1455_v31, 1  ;;  %v3686_v42 = vadd.f32 %v1426_v21, %v1425_v29  ;;  %v3688_v23 = vadd.f32 %v1432_v7, %v1431_v26  ;;  %v1462_v40 = vrot.slane %v1461_v43, 1 }
 0x137   : > { %v3690_v30 = vadd.f32 %v1438_v8, %v1437_v41  ;;  %v3693_v27 = vadd.f32 %v1444_v24, %v1443_v9  ;;  %v3695_v16 = vadd.f32 %v1450_v38, %v1449_v20  ;;  %v1468_v11 = vrot.slane %v1467_v4, 1 }
 0x138   : > { %5419 = vst [vmem:[#allocation146_spill] sm:$0xff] %v3686_v42  ;;  %5420 = vst [vmem:[#allocation147_spill] sm:$0xff] %v3688_v23  ;;  %v3697_v32 = vadd.f32 %v1456_v28, %v1455_v31  ;;  %v3700_v39 = vadd.f32 %v1462_v40, %v1461_v43  ;;  %v1470_v56 = vrot.slane %v334_v35, 4  ;;  %v1476_v25 = vrot.slane %v335_v34, 4  ;;  %v349_v23 = vld [vmem:[%s3162_s23 + $0x5f8] sm:$0xff] }
 0x139   : > { %5421 = vst [vmem:[#allocation148_spill] sm:$0xff] %v3690_v30  ;;  %5422 = vst [vmem:[#allocation149_spill] sm:$0xff] %v3693_v27  ;;  %v1482_v29 = vrot.slane %v336_v33, 4  ;;  %v3702_v21 = vadd.f32 %v1468_v11, %v1467_v4  ;;  %v1488_v26 = vrot.slane %v337_v37, 4  ;;  %v1494_v41 = vrot.slane %v338_v61, 4 }
 0x13a   : > { %5423 = vst [vmem:[#allocation150_spill] sm:$0xff] %v3695_v16  ;;  %5424 = vst [vmem:[#allocation151_spill] sm:$0xff] %v3697_v32  ;;  %v1500_v7 = vrot.slane %v339_v36, 4  ;;  %v1471_v8 = vadd.f32 %v1470_v56, %v334_v35  ;;  %v1477_v30 = vadd.f32 %v1476_v25, %v335_v34  ;;  %v1506_v24 = vrot.slane %v340_v5, 4 }
 0x13b   : > { %5425 = vst [vmem:[#allocation152_spill] sm:$0xff] %v3700_v39  ;;  %5426 = vst [vmem:[#allocation153_spill] sm:$0xff] %v3702_v21  ;;  %v1483_v9 = vadd.f32 %v1482_v29, %v336_v33  ;;  %v1489_v20 = vadd.f32 %v1488_v26, %v337_v37  ;;  %v1495_v38 = vadd.f32 %v1494_v41, %v338_v61  ;;  %v1512_v28 = vrot.slane %v341_v15, 4  ;;  %v342_v41 = vld [vmem:[%s3162_s23 + $0x5c0] sm:$0xff] }
 0x13c   : > { %v1501_v31 = vadd.f32 %v1500_v7, %v339_v36  ;;  %v1472_v32 = vrot.slane %v1471_v8, 2  ;;  %v1478_v16 = vrot.slane %v1477_v30, 2  ;;  %v1507_v40 = vadd.f32 %v1506_v24, %v340_v5  ;;  %v343_v7 = vld [vmem:[%s3162_s23 + $0x5c8] sm:$0xff]  ;;  %v344_v24 = vld [vmem:[%s3162_s23 + $0x5d0] sm:$0xff] }
 0x13d   : > { %v1484_v43 = vrot.slane %v1483_v9, 2  ;;  %v1490_v39 = vrot.slane %v1489_v20, 2  ;;  %v1496_v27 = vrot.slane %v1495_v38, 2  ;;  %v1513_v11 = vadd.f32 %v1512_v28, %v341_v15  ;;  %v348_v28 = vld [vmem:[%s3162_s23 + $0x5f0] sm:$0xff] }
 0x13e   : > { %v1502_v4 = vrot.slane %v1501_v31, 2  ;;  %v1473_v21 = vadd.f32 %v1472_v32, %v1471_v8  ;;  %v1479_v35 = vadd.f32 %v1478_v16, %v1477_v30  ;;  %v1508_v34 = vrot.slane %v1507_v40, 2  ;;  %v345_v8 = vld [vmem:[%s3162_s23 + $0x5d8] sm:$0xff] }
 0x13f   : > { %v1485_v25 = vadd.f32 %v1484_v43, %v1483_v9  ;;  %v1491_v33 = vadd.f32 %v1490_v39, %v1489_v20  ;;  %v1497_v37 = vadd.f32 %v1496_v27, %v1495_v38  ;;  %v1514_v36 = vrot.slane %v1513_v11, 2  ;;  %v346_v39 = vld [vmem:[%s3162_s23 + $0x5e0] sm:$0xff]  ;;  %v347_v9 = vld [vmem:[%s3162_s23 + $0x5e8] sm:$0xff] }
 0x140   : > { %v1503_v61 = vadd.f32 %v1502_v4, %v1501_v31  ;;  %v1474_v56 = vrot.slane %v1473_v21, 1  ;;  %v1480_v5 = vrot.slane %v1479_v35, 1  ;;  %v1509_v26 = vadd.f32 %v1508_v34, %v1507_v40 }
 0x141   : > { %v1486_v29 = vrot.slane %v1485_v25, 1  ;;  %v1492_v15 = vrot.slane %v1491_v33, 1  ;;  %v1498_v30 = vrot.slane %v1497_v37, 1  ;;  %v1515_v32 = vadd.f32 %v1514_v36, %v1513_v11 }
 0x142   : > { %v1504_v16 = vrot.slane %v1503_v61, 1  ;;  %v3710_v27 = vadd.f32 %v1474_v56, %v1473_v21  ;;  %v3712_v20 = vadd.f32 %v1480_v5, %v1479_v35  ;;  %v1510_v31 = vrot.slane %v1509_v26, 1 }
 0x143   : > { %v3714_v38 = vadd.f32 %v1486_v29, %v1485_v25  ;;  %v3717_v43 = vadd.f32 %v1492_v15, %v1491_v33  ;;  %v3719_v40 = vadd.f32 %v1498_v30, %v1497_v37  ;;  %v1516_v34 = vrot.slane %v1515_v32, 1 }
 0x144   : > { %5427 = vst [vmem:[#allocation154_spill] sm:$0xff] %v3710_v27  ;;  %5428 = vst [vmem:[#allocation155_spill] sm:$0xff] %v3712_v20  ;;  %v3721_v4 = vadd.f32 %v1504_v16, %v1503_v61  ;;  %v3724_v11 = vadd.f32 %v1510_v31, %v1509_v26  ;;  %v1518_v36 = vrot.slane %v342_v41, 4  ;;  %v1524_v42 = vrot.slane %v343_v7, 4  ;;  %v357_v20 = vld [vmem:[%s3162_s23 + $0x638] sm:$0xff] }
 0x145   : > { %5429 = vst [vmem:[#allocation156_spill] sm:$0xff] %v3714_v38  ;;  %5430 = vst [vmem:[#allocation157_spill] sm:$0xff] %v3717_v43  ;;  %v1530_v21 = vrot.slane %v344_v24, 4  ;;  %v3726_v56 = vadd.f32 %v1516_v34, %v1515_v32  ;;  %v1536_v35 = vrot.slane %v345_v8, 4  ;;  %v1542_v25 = vrot.slane %v346_v39, 4 }
 0x146   : > { %5431 = vst [vmem:[#allocation158_spill] sm:$0xff] %v3719_v40  ;;  %5432 = vst [vmem:[#allocation159_spill] sm:$0xff] %v3721_v4  ;;  %v1548_v5 = vrot.slane %v347_v9, 4  ;;  %v1519_v29 = vadd.f32 %v1518_v36, %v342_v41  ;;  %v1525_v38 = vadd.f32 %v1524_v42, %v343_v7  ;;  %v1554_v15 = vrot.slane %v348_v28, 4 }
 0x147   : > { %5433 = vst [vmem:[#allocation160_spill] sm:$0xff] %v3724_v11  ;;  %5434 = vst [vmem:[#allocation161_spill] sm:$0xff] %v3726_v56  ;;  %v1531_v33 = vadd.f32 %v1530_v21, %v344_v24  ;;  %v1537_v37 = vadd.f32 %v1536_v35, %v345_v8  ;;  %v1543_v30 = vadd.f32 %v1542_v25, %v346_v39  ;;  %v1560_v16 = vrot.slane %v349_v23, 4  ;;  %v350_v25 = vld [vmem:[%s3162_s23 + $0x600] sm:$0xff] }
 0x148   : > { %v1549_v61 = vadd.f32 %v1548_v5, %v347_v9  ;;  %v1520_v4 = vrot.slane %v1519_v29, 2  ;;  %v1526_v40 = vrot.slane %v1525_v38, 2  ;;  %v1555_v31 = vadd.f32 %v1554_v15, %v348_v28  ;;  %v351_v5 = vld [vmem:[%s3162_s23 + $0x608] sm:$0xff]  ;;  %v352_v15 = vld [vmem:[%s3162_s23 + $0x610] sm:$0xff] }
 0x149   : > { %v1532_v26 = vrot.slane %v1531_v33, 2  ;;  %v1538_v11 = vrot.slane %v1537_v37, 2  ;;  %v1544_v43 = vrot.slane %v1543_v30, 2  ;;  %v1561_v34 = vadd.f32 %v1560_v16, %v349_v23  ;;  %v356_v16 = vld [vmem:[%s3162_s23 + $0x630] sm:$0xff] }
 0x14a   : > { %v1550_v32 = vrot.slane %v1549_v61, 2  ;;  %v1521_v56 = vadd.f32 %v1520_v4, %v1519_v29  ;;  %v1527_v41 = vadd.f32 %v1526_v40, %v1525_v38  ;;  %v1556_v7 = vrot.slane %v1555_v31, 2  ;;  %v353_v29 = vld [vmem:[%s3162_s23 + $0x618] sm:$0xff] }
 0x14b   : > { %v1533_v42 = vadd.f32 %v1532_v26, %v1531_v33  ;;  %v1539_v24 = vadd.f32 %v1538_v11, %v1537_v37  ;;  %v1545_v8 = vadd.f32 %v1544_v43, %v1543_v30  ;;  %v1562_v9 = vrot.slane %v1561_v34, 2  ;;  %v354_v11 = vld [vmem:[%s3162_s23 + $0x620] sm:$0xff]  ;;  %v355_v33 = vld [vmem:[%s3162_s23 + $0x628] sm:$0xff] }
 0x14c   : > { %v1551_v39 = vadd.f32 %v1550_v32, %v1549_v61  ;;  %v1522_v36 = vrot.slane %v1521_v56, 1  ;;  %v1528_v28 = vrot.slane %v1527_v41, 1  ;;  %v1557_v35 = vadd.f32 %v1556_v7, %v1555_v31 }
 0x14d   : > { %v1534_v21 = vrot.slane %v1533_v42, 1  ;;  %v1540_v23 = vrot.slane %v1539_v24, 1  ;;  %v1546_v38 = vrot.slane %v1545_v8, 1  ;;  %v1563_v4 = vadd.f32 %v1562_v9, %v1561_v34 }
 0x14e   : > { %v1552_v40 = vrot.slane %v1551_v39, 1  ;;  %v3734_v43 = vadd.f32 %v1522_v36, %v1521_v56  ;;  %v3736_v37 = vadd.f32 %v1528_v28, %v1527_v41  ;;  %v1558_v61 = vrot.slane %v1557_v35, 1 }
 0x14f   : > { %v3738_v30 = vadd.f32 %v1534_v21, %v1533_v42  ;;  %v3741_v26 = vadd.f32 %v1540_v23, %v1539_v24  ;;  %v3743_v31 = vadd.f32 %v1546_v38, %v1545_v8  ;;  %v1564_v7 = vrot.slane %v1563_v4, 1 }
 0x150   : > { %5435 = vst [vmem:[#allocation162_spill] sm:$0xff] %v3734_v43  ;;  %5436 = vst [vmem:[#allocation163_spill] sm:$0xff] %v3736_v37  ;;  %v3745_v32 = vadd.f32 %v1552_v40, %v1551_v39  ;;  %v3748_v34 = vadd.f32 %v1558_v61, %v1557_v35  ;;  %v1566_v9 = vrot.slane %v350_v25, 4  ;;  %v1572_v27 = vrot.slane %v351_v5, 4  ;;  %v365_v37 = vld [vmem:[%s3162_s23 + $0x678] sm:$0xff] }
 0x151   : > { %5437 = vst [vmem:[#allocation164_spill] sm:$0xff] %v3738_v30  ;;  %5438 = vst [vmem:[#allocation165_spill] sm:$0xff] %v3741_v26  ;;  %v1578_v56 = vrot.slane %v352_v15, 4  ;;  %v3750_v36 = vadd.f32 %v1564_v7, %v1563_v4  ;;  %v1584_v41 = vrot.slane %v353_v29, 4  ;;  %v1590_v42 = vrot.slane %v354_v11, 4 }
 0x152   : > { %5439 = vst [vmem:[#allocation166_spill] sm:$0xff] %v3743_v31  ;;  %5440 = vst [vmem:[#allocation167_spill] sm:$0xff] %v3745_v32  ;;  %v1596_v28 = vrot.slane %v355_v33, 4  ;;  %v1567_v21 = vadd.f32 %v1566_v9, %v350_v25  ;;  %v1573_v30 = vadd.f32 %v1572_v27, %v351_v5  ;;  %v1602_v23 = vrot.slane %v356_v16, 4 }
 0x153   : > { %5441 = vst [vmem:[#allocation168_spill] sm:$0xff] %v3748_v34  ;;  %5442 = vst [vmem:[#allocation169_spill] sm:$0xff] %v3750_v36  ;;  %v1579_v24 = vadd.f32 %v1578_v56, %v352_v15  ;;  %v1585_v8 = vadd.f32 %v1584_v41, %v353_v29  ;;  %v1591_v38 = vadd.f32 %v1590_v42, %v354_v11  ;;  %v1608_v40 = vrot.slane %v357_v20, 4  ;;  %v358_v42 = vld [vmem:[%s3162_s23 + $0x640] sm:$0xff] }
 0x154   : > { %v1597_v39 = vadd.f32 %v1596_v28, %v355_v33  ;;  %v1568_v32 = vrot.slane %v1567_v21, 2  ;;  %v1574_v31 = vrot.slane %v1573_v30, 2  ;;  %v1603_v61 = vadd.f32 %v1602_v23, %v356_v16  ;;  %v359_v28 = vld [vmem:[%s3162_s23 + $0x648] sm:$0xff]  ;;  %v360_v23 = vld [vmem:[%s3162_s23 + $0x650] sm:$0xff] }
 0x155   : > { %v1580_v35 = vrot.slane %v1579_v24, 2  ;;  %v1586_v34 = vrot.slane %v1585_v8, 2  ;;  %v1592_v26 = vrot.slane %v1591_v38, 2  ;;  %v1609_v7 = vadd.f32 %v1608_v40, %v357_v20  ;;  %v364_v40 = vld [vmem:[%s3162_s23 + $0x670] sm:$0xff] }
 0x156   : > { %v1598_v4 = vrot.slane %v1597_v39, 2  ;;  %v1569_v36 = vadd.f32 %v1568_v32, %v1567_v21  ;;  %v1575_v25 = vadd.f32 %v1574_v31, %v1573_v30  ;;  %v1604_v5 = vrot.slane %v1603_v61, 2  ;;  %v361_v21 = vld [vmem:[%s3162_s23 + $0x658] sm:$0xff] }
 0x157   : > { %v1581_v27 = vadd.f32 %v1580_v35, %v1579_v24  ;;  %v1587_v15 = vadd.f32 %v1586_v34, %v1585_v8  ;;  %v1593_v29 = vadd.f32 %v1592_v26, %v1591_v38  ;;  %v1610_v33 = vrot.slane %v1609_v7, 2  ;;  %v362_v34 = vld [vmem:[%s3162_s23 + $0x660] sm:$0xff]  ;;  %v363_v24 = vld [vmem:[%s3162_s23 + $0x668] sm:$0xff] }
 0x158   : > { %v1599_v11 = vadd.f32 %v1598_v4, %v1597_v39  ;;  %v1570_v9 = vrot.slane %v1569_v36, 1  ;;  %v1576_v16 = vrot.slane %v1575_v25, 1  ;;  %v1605_v41 = vadd.f32 %v1604_v5, %v1603_v61 }
 0x159   : > { %v1582_v56 = vrot.slane %v1581_v27, 1  ;;  %v1588_v20 = vrot.slane %v1587_v15, 1  ;;  %v1594_v30 = vrot.slane %v1593_v29, 1  ;;  %v1611_v32 = vadd.f32 %v1610_v33, %v1609_v7 }
 0x15a   : > { %v1600_v31 = vrot.slane %v1599_v11, 1  ;;  %v3758_v26 = vadd.f32 %v1570_v9, %v1569_v36  ;;  %v3760_v8 = vadd.f32 %v1576_v16, %v1575_v25  ;;  %v1606_v39 = vrot.slane %v1605_v41, 1 }
 0x15b   : > { %v3762_v38 = vadd.f32 %v1582_v56, %v1581_v27  ;;  %v3765_v35 = vadd.f32 %v1588_v20, %v1587_v15  ;;  %v3767_v61 = vadd.f32 %v1594_v30, %v1593_v29  ;;  %v1612_v5 = vrot.slane %v1611_v32, 1 }
 0x15c   : > { %5443 = vst [vmem:[#allocation170_spill] sm:$0xff] %v3758_v26  ;;  %5444 = vst [vmem:[#allocation171_spill] sm:$0xff] %v3760_v8  ;;  %v3769_v4 = vadd.f32 %v1600_v31, %v1599_v11  ;;  %v3772_v7 = vadd.f32 %v1606_v39, %v1605_v41  ;;  %v1614_v33 = vrot.slane %v358_v42, 4  ;;  %v1620_v43 = vrot.slane %v359_v28, 4  ;;  %v373_v8 = vld [vmem:[%s3162_s23 + $0x6b8] sm:$0xff] }
 0x15d   : > { %5445 = vst [vmem:[#allocation172_spill] sm:$0xff] %v3762_v38  ;;  %5446 = vst [vmem:[#allocation173_spill] sm:$0xff] %v3765_v35  ;;  %v1626_v36 = vrot.slane %v360_v23, 4  ;;  %v3774_v9 = vadd.f32 %v1612_v5, %v1611_v32  ;;  %v1632_v25 = vrot.slane %v361_v21, 4  ;;  %v1638_v27 = vrot.slane %v362_v34, 4 }
 0x15e   : > { %5447 = vst [vmem:[#allocation174_spill] sm:$0xff] %v3767_v61  ;;  %5448 = vst [vmem:[#allocation175_spill] sm:$0xff] %v3769_v4  ;;  %v1644_v16 = vrot.slane %v363_v24, 4  ;;  %v1615_v56 = vadd.f32 %v1614_v33, %v358_v42  ;;  %v1621_v38 = vadd.f32 %v1620_v43, %v359_v28  ;;  %v1650_v20 = vrot.slane %v364_v40, 4 }
 0x15f   : > { %5449 = vst [vmem:[#allocation176_spill] sm:$0xff] %v3772_v7  ;;  %5450 = vst [vmem:[#allocation177_spill] sm:$0xff] %v3774_v9  ;;  %v1627_v15 = vadd.f32 %v1626_v36, %v360_v23  ;;  %v1633_v29 = vadd.f32 %v1632_v25, %v361_v21  ;;  %v1639_v30 = vadd.f32 %v1638_v27, %v362_v34  ;;  %v1656_v31 = vrot.slane %v365_v37, 4  ;;  %v366_v27 = vld [vmem:[%s3162_s23 + $0x680] sm:$0xff] }
 0x160   : > { %v1645_v11 = vadd.f32 %v1644_v16, %v363_v24  ;;  %v1616_v4 = vrot.slane %v1615_v56, 2  ;;  %v1622_v61 = vrot.slane %v1621_v38, 2  ;;  %v1651_v39 = vadd.f32 %v1650_v20, %v364_v40  ;;  %v367_v16 = vld [vmem:[%s3162_s23 + $0x688] sm:$0xff]  ;;  %v368_v20 = vld [vmem:[%s3162_s23 + $0x690] sm:$0xff] }
 0x161   : > { %v1628_v41 = vrot.slane %v1627_v15, 2  ;;  %v1634_v7 = vrot.slane %v1633_v29, 2  ;;  %v1640_v35 = vrot.slane %v1639_v30, 2  ;;  %v1657_v5 = vadd.f32 %v1656_v31, %v365_v37  ;;  %v372_v31 = vld [vmem:[%s3162_s23 + $0x6b0] sm:$0xff] }
 0x162   : > { %v1646_v32 = vrot.slane %v1645_v11, 2  ;;  %v1617_v9 = vadd.f32 %v1616_v4, %v1615_v56  ;;  %v1623_v42 = vadd.f32 %v1622_v61, %v1621_v38  ;;  %v1652_v28 = vrot.slane %v1651_v39, 2  ;;  %v369_v56 = vld [vmem:[%s3162_s23 + $0x698] sm:$0xff] }
 0x163   : > { %v1629_v43 = vadd.f32 %v1628_v41, %v1627_v15  ;;  %v1635_v23 = vadd.f32 %v1634_v7, %v1633_v29  ;;  %v1641_v21 = vadd.f32 %v1640_v35, %v1639_v30  ;;  %v1658_v24 = vrot.slane %v1657_v5, 2  ;;  %v370_v7 = vld [vmem:[%s3162_s23 + $0x6a0] sm:$0xff]  ;;  %v371_v15 = vld [vmem:[%s3162_s23 + $0x6a8] sm:$0xff] }
 0x164   : > { %v1647_v34 = vadd.f32 %v1646_v32, %v1645_v11  ;;  %v1618_v33 = vrot.slane %v1617_v9, 1  ;;  %v1624_v40 = vrot.slane %v1623_v42, 1  ;;  %v1653_v25 = vadd.f32 %v1652_v28, %v1651_v39 }
 0x165   : > { %v1630_v36 = vrot.slane %v1629_v43, 1  ;;  %v1636_v37 = vrot.slane %v1635_v23, 1  ;;  %v1642_v38 = vrot.slane %v1641_v21, 1  ;;  %v1659_v4 = vadd.f32 %v1658_v24, %v1657_v5 }
 0x166   : > { %v1648_v61 = vrot.slane %v1647_v34, 1  ;;  %v3782_v35 = vadd.f32 %v1618_v33, %v1617_v9  ;;  %v3784_v29 = vadd.f32 %v1624_v40, %v1623_v42  ;;  %v1654_v11 = vrot.slane %v1653_v25, 1 }
 0x167   : > { %v3786_v30 = vadd.f32 %v1630_v36, %v1629_v43  ;;  %v3789_v41 = vadd.f32 %v1636_v37, %v1635_v23  ;;  %v3791_v39 = vadd.f32 %v1642_v38, %v1641_v21  ;;  %v1660_v28 = vrot.slane %v1659_v4, 1 }
 0x168   : > { %5451 = vst [vmem:[#allocation178_spill] sm:$0xff] %v3782_v35  ;;  %5452 = vst [vmem:[#allocation179_spill] sm:$0xff] %v3784_v29  ;;  %v3793_v32 = vadd.f32 %v1648_v61, %v1647_v34  ;;  %v3796_v5 = vadd.f32 %v1654_v11, %v1653_v25  ;;  %v1662_v24 = vrot.slane %v366_v27, 4  ;;  %v1668_v26 = vrot.slane %v367_v16, 4  ;;  %v381_v29 = vld [vmem:[%s3162_s23 + $0x6f8] sm:$0xff] }
 0x169   : > { %5453 = vst [vmem:[#allocation180_spill] sm:$0xff] %v3786_v30  ;;  %5454 = vst [vmem:[#allocation181_spill] sm:$0xff] %v3789_v41  ;;  %v1674_v9 = vrot.slane %v368_v20, 4  ;;  %v3798_v33 = vadd.f32 %v1660_v28, %v1659_v4  ;;  %v1680_v42 = vrot.slane %v369_v56, 4  ;;  %v1686_v43 = vrot.slane %v370_v7, 4 }
 0x16a   : > { %5455 = vst [vmem:[#allocation182_spill] sm:$0xff] %v3791_v39  ;;  %5456 = vst [vmem:[#allocation183_spill] sm:$0xff] %v3793_v32  ;;  %v1692_v40 = vrot.slane %v371_v15, 4  ;;  %v1663_v36 = vadd.f32 %v1662_v24, %v366_v27  ;;  %v1669_v30 = vadd.f32 %v1668_v26, %v367_v16  ;;  %v1698_v37 = vrot.slane %v372_v31, 4 }
 0x16b   : > { %5457 = vst [vmem:[#allocation184_spill] sm:$0xff] %v3796_v5  ;;  %5458 = vst [vmem:[#allocation185_spill] sm:$0xff] %v3798_v33  ;;  %v1675_v23 = vadd.f32 %v1674_v9, %v368_v20  ;;  %v1681_v21 = vadd.f32 %v1680_v42, %v369_v56  ;;  %v1687_v38 = vadd.f32 %v1686_v43, %v370_v7  ;;  %v1704_v61 = vrot.slane %v373_v8, 4  ;;  %v374_v43 = vld [vmem:[%s3162_s23 + $0x6c0] sm:$0xff] }
 0x16c   : > { %v1693_v34 = vadd.f32 %v1692_v40, %v371_v15  ;;  %v1664_v32 = vrot.slane %v1663_v36, 2  ;;  %v1670_v39 = vrot.slane %v1669_v30, 2  ;;  %v1699_v11 = vadd.f32 %v1698_v37, %v372_v31  ;;  %v375_v40 = vld [vmem:[%s3162_s23 + $0x6c8] sm:$0xff]  ;;  %v376_v37 = vld [vmem:[%s3162_s23 + $0x6d0] sm:$0xff] }
 0x16d   : > { %v1676_v25 = vrot.slane %v1675_v23, 2  ;;  %v1682_v5 = vrot.slane %v1681_v21, 2  ;;  %v1688_v41 = vrot.slane %v1687_v38, 2  ;;  %v1705_v28 = vadd.f32 %v1704_v61, %v373_v8  ;;  %v380_v61 = vld [vmem:[%s3162_s23 + $0x6f0] sm:$0xff] }
 0x16e   : > { %v1694_v4 = vrot.slane %v1693_v34, 2  ;;  %v1665_v33 = vadd.f32 %v1664_v32, %v1663_v36  ;;  %v1671_v27 = vadd.f32 %v1670_v39, %v1669_v30  ;;  %v1700_v16 = vrot.slane %v1699_v11, 2  ;;  %v377_v36 = vld [vmem:[%s3162_s23 + $0x6d8] sm:$0xff] }
 0x16f   : > { %v1677_v26 = vadd.f32 %v1676_v25, %v1675_v23  ;;  %v1683_v20 = vadd.f32 %v1682_v5, %v1681_v21  ;;  %v1689_v56 = vadd.f32 %v1688_v41, %v1687_v38  ;;  %v1706_v15 = vrot.slane %v1705_v28, 2  ;;  %v378_v5 = vld [vmem:[%s3162_s23 + $0x6e0] sm:$0xff]  ;;  %v379_v23 = vld [vmem:[%s3162_s23 + $0x6e8] sm:$0xff] }
 0x170   : > { %v1695_v7 = vadd.f32 %v1694_v4, %v1693_v34  ;;  %v1666_v24 = vrot.slane %v1665_v33, 1  ;;  %v1672_v31 = vrot.slane %v1671_v27, 1  ;;  %v1701_v42 = vadd.f32 %v1700_v16, %v1699_v11 }
 0x171   : > { %v1678_v9 = vrot.slane %v1677_v26, 1  ;;  %v1684_v8 = vrot.slane %v1683_v20, 1  ;;  %v1690_v30 = vrot.slane %v1689_v56, 1  ;;  %v1707_v32 = vadd.f32 %v1706_v15, %v1705_v28 }
 0x172   : > { %v1696_v39 = vrot.slane %v1695_v7, 1  ;;  %v3806_v41 = vadd.f32 %v1666_v24, %v1665_v33  ;;  %v3808_v21 = vadd.f32 %v1672_v31, %v1671_v27  ;;  %v1702_v34 = vrot.slane %v1701_v42, 1 }
 0x173   : > { %v3810_v38 = vadd.f32 %v1678_v9, %v1677_v26  ;;  %v3813_v25 = vadd.f32 %v1684_v8, %v1683_v20  ;;  %v3815_v11 = vadd.f32 %v1690_v30, %v1689_v56  ;;  %v1708_v16 = vrot.slane %v1707_v32, 1 }
 0x174   : > { %5459 = vst [vmem:[#allocation186_spill] sm:$0xff] %v3806_v41  ;;  %5460 = vst [vmem:[#allocation187_spill] sm:$0xff] %v3808_v21  ;;  %v3817_v4 = vadd.f32 %v1696_v39, %v1695_v7  ;;  %v3820_v28 = vadd.f32 %v1702_v34, %v1701_v42  ;;  %v1710_v15 = vrot.slane %v374_v43, 4  ;;  %v1716_v35 = vrot.slane %v375_v40, 4  ;;  %v389_v21 = vld [vmem:[%s3162_s23 + $0x738] sm:$0xff] }
 0x175   : > { %5461 = vst [vmem:[#allocation188_spill] sm:$0xff] %v3810_v38  ;;  %5462 = vst [vmem:[#allocation189_spill] sm:$0xff] %v3813_v25  ;;  %v1722_v33 = vrot.slane %v376_v37, 4  ;;  %v3822_v24 = vadd.f32 %v1708_v16, %v1707_v32  ;;  %v1728_v27 = vrot.slane %v377_v36, 4  ;;  %v1734_v26 = vrot.slane %v378_v5, 4 }
 0x176   : > { %5463 = vst [vmem:[#allocation190_spill] sm:$0xff] %v3815_v11  ;;  %5464 = vst [vmem:[#allocation191_spill] sm:$0xff] %v3817_v4  ;;  %v1740_v31 = vrot.slane %v379_v23, 4  ;;  %v1711_v9 = vadd.f32 %v1710_v15, %v374_v43  ;;  %v1717_v38 = vadd.f32 %v1716_v35, %v375_v40  ;;  %v1746_v8 = vrot.slane %v380_v61, 4 }
 0x177   : > { %5465 = vst [vmem:[#allocation192_spill] sm:$0xff] %v3820_v28  ;;  %5466 = vst [vmem:[#allocation193_spill] sm:$0xff] %v3822_v24  ;;  %v1723_v20 = vadd.f32 %v1722_v33, %v376_v37  ;;  %v1729_v56 = vadd.f32 %v1728_v27, %v377_v36  ;;  %v1735_v30 = vadd.f32 %v1734_v26, %v378_v5  ;;  %v1752_v39 = vrot.slane %v381_v29, 4  ;;  %v382_v26 = vld [vmem:[%s3162_s23 + $0x700] sm:$0xff] }
 0x178   : > { %v1741_v7 = vadd.f32 %v1740_v31, %v379_v23  ;;  %v1712_v4 = vrot.slane %v1711_v9, 2  ;;  %v1718_v11 = vrot.slane %v1717_v38, 2  ;;  %v1747_v34 = vadd.f32 %v1746_v8, %v380_v61  ;;  %v383_v31 = vld [vmem:[%s3162_s23 + $0x708] sm:$0xff]  ;;  %v384_v8 = vld [vmem:[%s3162_s23 + $0x710] sm:$0xff] }
 0x179   : > { %v1724_v42 = vrot.slane %v1723_v20, 2  ;;  %v1730_v28 = vrot.slane %v1729_v56, 2  ;;  %v1736_v25 = vrot.slane %v1735_v30, 2  ;;  %v1753_v16 = vadd.f32 %v1752_v39, %v381_v29  ;;  %v388_v39 = vld [vmem:[%s3162_s23 + $0x730] sm:$0xff] }
 0x17a   : > { %v1742_v32 = vrot.slane %v1741_v7, 2  ;;  %v1713_v24 = vadd.f32 %v1712_v4, %v1711_v9  ;;  %v1719_v43 = vadd.f32 %v1718_v11, %v1717_v38  ;;  %v1748_v40 = vrot.slane %v1747_v34, 2  ;;  %v385_v9 = vld [vmem:[%s3162_s23 + $0x718] sm:$0xff] }
 0x17b   : > { %v1725_v35 = vadd.f32 %v1724_v42, %v1723_v20  ;;  %v1731_v37 = vadd.f32 %v1730_v28, %v1729_v56  ;;  %v1737_v36 = vadd.f32 %v1736_v25, %v1735_v30  ;;  %v1754_v23 = vrot.slane %v1753_v16, 2  ;;  %v386_v28 = vld [vmem:[%s3162_s23 + $0x720] sm:$0xff]  ;;  %v387_v20 = vld [vmem:[%s3162_s23 + $0x728] sm:$0xff] }
 0x17c   : > { %v1743_v5 = vadd.f32 %v1742_v32, %v1741_v7  ;;  %v1714_v15 = vrot.slane %v1713_v24, 1  ;;  %v1720_v61 = vrot.slane %v1719_v43, 1  ;;  %v1749_v27 = vadd.f32 %v1748_v40, %v1747_v34 }
 0x17d   : > { %v1726_v33 = vrot.slane %v1725_v35, 1  ;;  %v1732_v29 = vrot.slane %v1731_v37, 1  ;;  %v1738_v38 = vrot.slane %v1737_v36, 1  ;;  %v1755_v4 = vadd.f32 %v1754_v23, %v1753_v16 }
 0x17e   : > { %v1744_v11 = vrot.slane %v1743_v5, 1  ;;  %v3830_v25 = vadd.f32 %v1714_v15, %v1713_v24  ;;  %v3832_v56 = vadd.f32 %v1720_v61, %v1719_v43  ;;  %v1750_v7 = vrot.slane %v1749_v27, 1 }
 0x17f   : > { %v3834_v30 = vadd.f32 %v1726_v33, %v1725_v35  ;;  %v3837_v42 = vadd.f32 %v1732_v29, %v1731_v37  ;;  %v3839_v34 = vadd.f32 %v1738_v38, %v1737_v36  ;;  %v1756_v40 = vrot.slane %v1755_v4, 1 }
 0x180   : > { %5467 = vst [vmem:[#allocation194_spill] sm:$0xff] %v3830_v25  ;;  %5468 = vst [vmem:[#allocation195_spill] sm:$0xff] %v3832_v56  ;;  %v3841_v32 = vadd.f32 %v1744_v11, %v1743_v5  ;;  %v3844_v16 = vadd.f32 %v1750_v7, %v1749_v27  ;;  %v1758_v23 = vrot.slane %v382_v26, 4  ;;  %v1764_v41 = vrot.slane %v383_v31, 4  ;;  %v397_v56 = vld [vmem:[%s3162_s23 + $0x778] sm:$0xff] }
 0x181   : > { %5469 = vst [vmem:[#allocation196_spill] sm:$0xff] %v3834_v30  ;;  %5470 = vst [vmem:[#allocation197_spill] sm:$0xff] %v3837_v42  ;;  %v1770_v24 = vrot.slane %v384_v8, 4  ;;  %v3846_v15 = vadd.f32 %v1756_v40, %v1755_v4  ;;  %v1776_v43 = vrot.slane %v385_v9, 4  ;;  %v1782_v35 = vrot.slane %v386_v28, 4 }
 0x182   : > { %5471 = vst [vmem:[#allocation198_spill] sm:$0xff] %v3839_v34  ;;  %5472 = vst [vmem:[#allocation199_spill] sm:$0xff] %v3841_v32  ;;  %v1788_v61 = vrot.slane %v387_v20, 4  ;;  %v1759_v33 = vadd.f32 %v1758_v23, %v382_v26  ;;  %v1765_v30 = vadd.f32 %v1764_v41, %v383_v31  ;;  %v1794_v29 = vrot.slane %v388_v39, 4 }
 0x183   : > { %5473 = vst [vmem:[#allocation200_spill] sm:$0xff] %v3844_v16  ;;  %5474 = vst [vmem:[#allocation201_spill] sm:$0xff] %v3846_v15  ;;  %v1771_v37 = vadd.f32 %v1770_v24, %v384_v8  ;;  %v1777_v36 = vadd.f32 %v1776_v43, %v385_v9  ;;  %v1783_v38 = vadd.f32 %v1782_v35, %v386_v28  ;;  %v1800_v11 = vrot.slane %v389_v21, 4  ;;  %v390_v35 = vld [vmem:[%s3162_s23 + $0x740] sm:$0xff] }
 0x184   : > { %v1789_v5 = vadd.f32 %v1788_v61, %v387_v20  ;;  %v1760_v32 = vrot.slane %v1759_v33, 2  ;;  %v1766_v34 = vrot.slane %v1765_v30, 2  ;;  %v1795_v7 = vadd.f32 %v1794_v29, %v388_v39  ;;  %v391_v61 = vld [vmem:[%s3162_s23 + $0x748] sm:$0xff]  ;;  %v392_v29 = vld [vmem:[%s3162_s23 + $0x750] sm:$0xff] }
 0x185   : > { %v1772_v27 = vrot.slane %v1771_v37, 2  ;;  %v1778_v16 = vrot.slane %v1777_v36, 2  ;;  %v1784_v42 = vrot.slane %v1783_v38, 2  ;;  %v1801_v40 = vadd.f32 %v1800_v11, %v389_v21  ;;  %v396_v11 = vld [vmem:[%s3162_s23 + $0x770] sm:$0xff] }
 0x186   : > { %v1790_v4 = vrot.slane %v1789_v5, 2  ;;  %v1761_v15 = vadd.f32 %v1760_v32, %v1759_v33  ;;  %v1767_v26 = vadd.f32 %v1766_v34, %v1765_v30  ;;  %v1796_v31 = vrot.slane %v1795_v7, 2  ;;  %v393_v33 = vld [vmem:[%s3162_s23 + $0x758] sm:$0xff] }
 0x187   : > { %v1773_v41 = vadd.f32 %v1772_v27, %v1771_v37  ;;  %v1779_v8 = vadd.f32 %v1778_v16, %v1777_v36  ;;  %v1785_v9 = vadd.f32 %v1784_v42, %v1783_v38  ;;  %v1802_v20 = vrot.slane %v1801_v40, 2  ;;  %v394_v16 = vld [vmem:[%s3162_s23 + $0x760] sm:$0xff]  ;;  %v395_v37 = vld [vmem:[%s3162_s23 + $0x768] sm:$0xff] }
 0x188   : > { %v1791_v28 = vadd.f32 %v1790_v4, %v1789_v5  ;;  %v1762_v23 = vrot.slane %v1761_v15, 1  ;;  %v1768_v39 = vrot.slane %v1767_v26, 1  ;;  %v1797_v43 = vadd.f32 %v1796_v31, %v1795_v7 }
 0x189   : > { %v1774_v24 = vrot.slane %v1773_v41, 1  ;;  %v1780_v21 = vrot.slane %v1779_v8, 1  ;;  %v1786_v30 = vrot.slane %v1785_v9, 1  ;;  %v1803_v32 = vadd.f32 %v1802_v20, %v1801_v40 }
 0x18a   : > { %v1792_v34 = vrot.slane %v1791_v28, 1  ;;  %v3854_v42 = vadd.f32 %v1762_v23, %v1761_v15  ;;  %v3856_v36 = vadd.f32 %v1768_v39, %v1767_v26  ;;  %v1798_v5 = vrot.slane %v1797_v43, 1 }
 0x18b   : > { %v3858_v38 = vadd.f32 %v1774_v24, %v1773_v41  ;;  %v3861_v27 = vadd.f32 %v1780_v21, %v1779_v8  ;;  %v3863_v7 = vadd.f32 %v1786_v30, %v1785_v9  ;;  %v1804_v31 = vrot.slane %v1803_v32, 1 }
 0x18c   : > { %5475 = vst [vmem:[#allocation202_spill] sm:$0xff] %v3854_v42  ;;  %5476 = vst [vmem:[#allocation203_spill] sm:$0xff] %v3856_v36  ;;  %v3865_v4 = vadd.f32 %v1792_v34, %v1791_v28  ;;  %v3868_v40 = vadd.f32 %v1798_v5, %v1797_v43  ;;  %v1806_v20 = vrot.slane %v390_v35, 4  ;;  %v1812_v25 = vrot.slane %v391_v61, 4  ;;  %v405_v36 = vld [vmem:[%s3162_s23 + $0x7b8] sm:$0xff] }
 0x18d   : > { %5477 = vst [vmem:[#allocation204_spill] sm:$0xff] %v3858_v38  ;;  %5478 = vst [vmem:[#allocation205_spill] sm:$0xff] %v3861_v27  ;;  %v1818_v15 = vrot.slane %v392_v29, 4  ;;  %v3870_v23 = vadd.f32 %v1804_v31, %v1803_v32  ;;  %v1824_v26 = vrot.slane %v393_v33, 4  ;;  %v1830_v41 = vrot.slane %v394_v16, 4 }
 0x18e   : > { %5479 = vst [vmem:[#allocation206_spill] sm:$0xff] %v3863_v7  ;;  %5480 = vst [vmem:[#allocation207_spill] sm:$0xff] %v3865_v4  ;;  %v1836_v39 = vrot.slane %v395_v37, 4  ;;  %v1807_v24 = vadd.f32 %v1806_v20, %v390_v35  ;;  %v1813_v38 = vadd.f32 %v1812_v25, %v391_v61  ;;  %v1842_v21 = vrot.slane %v396_v11, 4 }
 0x18f   : > { %5481 = vst [vmem:[#allocation208_spill] sm:$0xff] %v3868_v40  ;;  %5482 = vst [vmem:[#allocation209_spill] sm:$0xff] %v3870_v23  ;;  %v1819_v8 = vadd.f32 %v1818_v15, %v392_v29  ;;  %v1825_v9 = vadd.f32 %v1824_v26, %v393_v33  ;;  %v1831_v30 = vadd.f32 %v1830_v41, %v394_v16  ;;  %v1848_v34 = vrot.slane %v397_v56, 4  ;;  %v398_v41 = vld [vmem:[%s3162_s23 + $0x780] sm:$0xff] }
 0x190   : > { %v1837_v28 = vadd.f32 %v1836_v39, %v395_v37  ;;  %v1808_v4 = vrot.slane %v1807_v24, 2  ;;  %v1814_v7 = vrot.slane %v1813_v38, 2  ;;  %v1843_v5 = vadd.f32 %v1842_v21, %v396_v11  ;;  %v399_v39 = vld [vmem:[%s3162_s23 + $0x788] sm:$0xff]  ;;  %v400_v21 = vld [vmem:[%s3162_s23 + $0x790] sm:$0xff] }
 0x191   : > { %v1820_v43 = vrot.slane %v1819_v8, 2  ;;  %v1826_v40 = vrot.slane %v1825_v9, 2  ;;  %v1832_v27 = vrot.slane %v1831_v30, 2  ;;  %v1849_v31 = vadd.f32 %v1848_v34, %v397_v56  ;;  %v404_v34 = vld [vmem:[%s3162_s23 + $0x7b0] sm:$0xff] }
 0x192   : > { %v1838_v32 = vrot.slane %v1837_v28, 2  ;;  %v1809_v23 = vadd.f32 %v1808_v4, %v1807_v24  ;;  %v1815_v35 = vadd.f32 %v1814_v7, %v1813_v38  ;;  %v1844_v61 = vrot.slane %v1843_v5, 2  ;;  %v401_v24 = vld [vmem:[%s3162_s23 + $0x798] sm:$0xff] }
 0x193   : > { %v1821_v25 = vadd.f32 %v1820_v43, %v1819_v8  ;;  %v1827_v29 = vadd.f32 %v1826_v40, %v1825_v9  ;;  %v1833_v33 = vadd.f32 %v1832_v27, %v1831_v30  ;;  %v1850_v37 = vrot.slane %v1849_v31, 2  ;;  %v402_v40 = vld [vmem:[%s3162_s23 + $0x7a0] sm:$0xff]  ;;  %v403_v8 = vld [vmem:[%s3162_s23 + $0x7a8] sm:$0xff] }
 0x194   : > { %v1839_v16 = vadd.f32 %v1838_v32, %v1837_v28  ;;  %v1810_v20 = vrot.slane %v1809_v23, 1  ;;  %v1816_v11 = vrot.slane %v1815_v35, 1  ;;  %v1845_v26 = vadd.f32 %v1844_v61, %v1843_v5 }
 0x195   : > { %v1822_v15 = vrot.slane %v1821_v25, 1  ;;  %v1828_v56 = vrot.slane %v1827_v29, 1  ;;  %v1834_v38 = vrot.slane %v1833_v33, 1  ;;  %v1851_v4 = vadd.f32 %v1850_v37, %v1849_v31 }
 0x196   : > { %v1840_v7 = vrot.slane %v1839_v16, 1  ;;  %v3878_v27 = vadd.f32 %v1810_v20, %v1809_v23  ;;  %v3880_v9 = vadd.f32 %v1816_v11, %v1815_v35  ;;  %v1846_v28 = vrot.slane %v1845_v26, 1 }
 0x197   : > { %v3882_v30 = vadd.f32 %v1822_v15, %v1821_v25  ;;  %v3885_v43 = vadd.f32 %v1828_v56, %v1827_v29  ;;  %v3887_v5 = vadd.f32 %v1834_v38, %v1833_v33  ;;  %v1852_v61 = vrot.slane %v1851_v4, 1 }
 0x198   : > { %5483 = vst [vmem:[#allocation210_spill] sm:$0xff] %v3878_v27  ;;  %5484 = vst [vmem:[#allocation211_spill] sm:$0xff] %v3880_v9  ;;  %v3889_v32 = vadd.f32 %v1840_v7, %v1839_v16  ;;  %v3892_v31 = vadd.f32 %v1846_v28, %v1845_v26  ;;  %v1854_v37 = vrot.slane %v398_v41, 4  ;;  %v1860_v42 = vrot.slane %v399_v39, 4  ;;  %v413_v9 = vld [vmem:[%s3162_s23 + $0x7f8] sm:$0xff] }
 0x199   : > { %5485 = vst [vmem:[#allocation212_spill] sm:$0xff] %v3882_v30  ;;  %5486 = vst [vmem:[#allocation213_spill] sm:$0xff] %v3885_v43  ;;  %v1866_v23 = vrot.slane %v400_v21, 4  ;;  %v3894_v20 = vadd.f32 %v1852_v61, %v1851_v4  ;;  %v1872_v35 = vrot.slane %v401_v24, 4  ;;  %v1878_v25 = vrot.slane %v402_v40, 4 }
 0x19a   : > { %5487 = vst [vmem:[#allocation214_spill] sm:$0xff] %v3887_v5  ;;  %5488 = vst [vmem:[#allocation215_spill] sm:$0xff] %v3889_v32  ;;  %v1884_v11 = vrot.slane %v403_v8, 4  ;;  %v1855_v15 = vadd.f32 %v1854_v37, %v398_v41  ;;  %v1861_v30 = vadd.f32 %v1860_v42, %v399_v39  ;;  %v1890_v56 = vrot.slane %v404_v34, 4 }
 0x19b   : > { %5489 = vst [vmem:[#allocation216_spill] sm:$0xff] %v3892_v31  ;;  %5490 = vst [vmem:[#allocation217_spill] sm:$0xff] %v3894_v20  ;;  %v1867_v29 = vadd.f32 %v1866_v23, %v400_v21  ;;  %v1873_v33 = vadd.f32 %v1872_v35, %v401_v24  ;;  %v1879_v38 = vadd.f32 %v1878_v25, %v402_v40  ;;  %v1896_v7 = vrot.slane %v405_v36, 4  ;;  %v406_v25 = vld [vmem:[%s3162_s23 + $0x7c0] sm:$0xff] }
 0x19c   : > { %v1885_v16 = vadd.f32 %v1884_v11, %v403_v8  ;;  %v1856_v32 = vrot.slane %v1855_v15, 2  ;;  %v1862_v5 = vrot.slane %v1861_v30, 2  ;;  %v1891_v28 = vadd.f32 %v1890_v56, %v404_v34  ;;  %v407_v11 = vld [vmem:[%s3162_s23 + $0x7c8] sm:$0xff]  ;;  %v408_v56 = vld [vmem:[%s3162_s23 + $0x7d0] sm:$0xff] }
 0x19d   : > { %v1868_v26 = vrot.slane %v1867_v29, 2  ;;  %v1874_v31 = vrot.slane %v1873_v33, 2  ;;  %v1880_v43 = vrot.slane %v1879_v38, 2  ;;  %v1897_v61 = vadd.f32 %v1896_v7, %v405_v36  ;;  %v412_v7 = vld [vmem:[%s3162_s23 + $0x7f0] sm:$0xff] }
 0x19e   : > { %v1886_v4 = vrot.slane %v1885_v16, 2  ;;  %v1857_v20 = vadd.f32 %v1856_v32, %v1855_v15  ;;  %v1863_v41 = vadd.f32 %v1862_v5, %v1861_v30  ;;  %v1892_v39 = vrot.slane %v1891_v28, 2  ;;  %v409_v15 = vld [vmem:[%s3162_s23 + $0x7d8] sm:$0xff] }
 0x19f   : > { %v1869_v42 = vadd.f32 %v1868_v26, %v1867_v29  ;;  %v1875_v21 = vadd.f32 %v1874_v31, %v1873_v33  ;;  %v1881_v24 = vadd.f32 %v1880_v43, %v1879_v38  ;;  %v1898_v8 = vrot.slane %v1897_v61, 2  ;;  %v410_v31 = vld [vmem:[%s3162_s23 + $0x7e0] sm:$0xff]  ;;  %v411_v29 = vld [vmem:[%s3162_s23 + $0x7e8] sm:$0xff] }
 0x1a0   : > { %v1887_v40 = vadd.f32 %v1886_v4, %v1885_v16  ;;  %v1858_v37 = vrot.slane %v1857_v20, 1  ;;  %v1864_v34 = vrot.slane %v1863_v41, 1  ;;  %v1893_v35 = vadd.f32 %v1892_v39, %v1891_v28 }
 0x1a1   : > { %v1870_v23 = vrot.slane %v1869_v42, 1  ;;  %v1876_v36 = vrot.slane %v1875_v21, 1  ;;  %v1882_v30 = vrot.slane %v1881_v24, 1  ;;  %v1899_v32 = vadd.f32 %v1898_v8, %v1897_v61 }
 0x1a2   : > { %v1888_v5 = vrot.slane %v1887_v40, 1  ;;  %v3902_v43 = vadd.f32 %v1858_v37, %v1857_v20  ;;  %v3904_v33 = vadd.f32 %v1864_v34, %v1863_v41  ;;  %v1894_v16 = vrot.slane %v1893_v35, 1 }
 0x1a3   : > { %v3906_v38 = vadd.f32 %v1870_v23, %v1869_v42  ;;  %v3909_v26 = vadd.f32 %v1876_v36, %v1875_v21  ;;  %v3911_v28 = vadd.f32 %v1882_v30, %v1881_v24  ;;  %v1900_v39 = vrot.slane %v1899_v32, 1 }
 0x1a4   : > { %5491 = vst [vmem:[#allocation218_spill] sm:$0xff] %v3902_v43  ;;  %5492 = vst [vmem:[#allocation219_spill] sm:$0xff] %v3904_v33  ;;  %v3913_v4 = vadd.f32 %v1888_v5, %v1887_v40  ;;  %v3916_v61 = vadd.f32 %v1894_v16, %v1893_v35  ;;  %v1902_v8 = vrot.slane %v406_v25, 4  ;;  %v1908_v27 = vrot.slane %v407_v11, 4 }
 0x1a5   : > { %5493 = vst [vmem:[#allocation220_spill] sm:$0xff] %v3906_v38  ;;  %5494 = vst [vmem:[#allocation221_spill] sm:$0xff] %v3909_v26  ;;  %v1914_v20 = vrot.slane %v408_v56, 4  ;;  %v3918_v37 = vadd.f32 %v1900_v39, %v1899_v32  ;;  %v1920_v41 = vrot.slane %v409_v15, 4  ;;  %v1926_v42 = vrot.slane %v410_v31, 4 }
 0x1a6   : > { %5495 = vst [vmem:[#allocation222_spill] sm:$0xff] %v3911_v28  ;;  %5496 = vst [vmem:[#allocation223_spill] sm:$0xff] %v3913_v4  ;;  %v1932_v34 = vrot.slane %v411_v29, 4  ;;  %v1903_v23 = vadd.f32 %v1902_v8, %v406_v25  ;;  %v1909_v38 = vadd.f32 %v1908_v27, %v407_v11  ;;  %v1938_v36 = vrot.slane %v412_v7, 4 }
 0x1a7   : > { %5497 = vst [vmem:[#allocation224_spill] sm:$0xff] %v3916_v61  ;;  %5498 = vst [vmem:[#allocation225_spill] sm:$0xff] %v3918_v37  ;;  %v1915_v21 = vadd.f32 %v1914_v20, %v408_v56  ;;  %v1921_v24 = vadd.f32 %v1920_v41, %v409_v15  ;;  %v1927_v30 = vadd.f32 %v1926_v42, %v410_v31  ;;  %v1944_v5 = vrot.slane %v413_v9, 4 }
 0x1a8   : > { %v1933_v40 = vadd.f32 %v1932_v34, %v411_v29  ;;  %v1904_v4 = vrot.slane %v1903_v23, 2  ;;  %v1910_v28 = vrot.slane %v1909_v38, 2  ;;  %v1939_v16 = vadd.f32 %v1938_v36, %v412_v7 }
 0x1a9   : > { %v1916_v35 = vrot.slane %v1915_v21, 2  ;;  %v1922_v61 = vrot.slane %v1921_v24, 2  ;;  %v1928_v26 = vrot.slane %v1927_v30, 2  ;;  %v1945_v32 = vadd.f32 %v1944_v5, %v413_v9 }
 0x1aa   : > { %v1934_v33 = vrot.slane %v1933_v40, 2  ;;  %v1905_v39 = vadd.f32 %v1904_v4, %v1903_v23  ;;  %v1911_v37 = vadd.f32 %v1910_v28, %v1909_v38  ;;  %v1940_v22 = vrot.slane %v1939_v16, 2 }
 0x1ab   : > { %v1917_v43 = vadd.f32 %v1916_v35, %v1915_v21  ;;  %v1923_v25 = vadd.f32 %v1922_v61, %v1921_v24  ;;  %v1929_v27 = vadd.f32 %v1928_v26, %v1927_v30  ;;  %v1946_v56 = vrot.slane %v1945_v32, 2 }
 0x1ac   : > { %v1935_v11 = vadd.f32 %v1934_v33, %v1933_v40  ;;  %v1906_v15 = vrot.slane %v1905_v39, 1  ;;  %v1912_v31 = vrot.slane %v1911_v37, 1  ;;  %v1941_v8 = vadd.f32 %v1940_v22, %v1939_v16 }
 0x1ad   : > { %v1918_v29 = vrot.slane %v1917_v43, 1  ;;  %v1924_v20 = vrot.slane %v1923_v25, 1  ;;  %v1930_v41 = vrot.slane %v1929_v27, 1  ;;  %v1947_v7 = vadd.f32 %v1946_v56, %v1945_v32 }
 0x1ae   : > { %v1936_v42 = vrot.slane %v1935_v11, 1  ;;  %v3920_v34 = vadd.f32 %v1906_v15, %v1905_v39  ;;  %v3922_v36 = vadd.f32 %v1912_v31, %v1911_v37  ;;  %v1942_v38 = vrot.slane %v1941_v8, 1  ;;  %v5524_v15 = vld [vmem:[#allocation16_spill] sm:$0xff] }
 0x1af   : > { %v3924_v9 = vadd.f32 %v1918_v29, %v1917_v43  ;;  %v3926_v28 = vadd.f32 %v1924_v20, %v1923_v25  ;;  %v3928_v26 = vadd.f32 %v1930_v41, %v1929_v27  ;;  %v1948_v4 = vrot.slane %v1947_v7, 1  ;;  %v5526_v29 = vld [vmem:[#allocation17_spill] sm:$0xff]  ;;  %v5528_v20 = vld [vmem:[#allocation18_spill] sm:$0xff] }
 0x1b0   : > { %v3930_v33 = vadd.f32 %v1936_v42, %v1935_v11  ;;  %v3932_v61 = vadd.f32 %v1942_v38, %v1941_v8  ;;  %v3935_v22 = vmul.f32 0.125, %v3182_v52  ;;  %v3938_v23 = vmul.f32 0.125, %v3184_v53  ;;  %v5523_v11 = vld [vmem:[#allocation15_spill] sm:$0xff]  ;;  %v5532_v38 = vld [vmem:[#allocation20_spill] sm:$0xff] }
 0x1b1   : > { %v3941_v37 = vmul.f32 0.125, %v3186_v54  ;;  %v3943_v43 = vadd.f32 %v1948_v4, %v1947_v7  ;;  %v3946_v21 = vmul.f32 0.125, %v3189_v57  ;;  %v3949_v24 = vmul.f32 0.125, %v3191_v58  ;;  %v5530_v42 = vld [vmem:[#allocation19_spill] sm:$0xff] }
 0x1b2   : > { %v3952_v30 = vmul.f32 0.125, %v3193_v59  ;;  %v3955_v52 = vmul.f32 0.125, %v3196_v62  ;;  %v3958_v53 = vmul.f32 0.125, %v3198_v2  ;;  %v3961_v54 = vmul.f32 0.125, %v3206_v44 }
 0x1b3   : > { %v3964_v40 = vmul.f32 0.125, %v3208_v45  ;;  %v3967_v57 = vmul.f32 0.125, %v3210_v46  ;;  %v3970_v58 = vmul.f32 0.125, %v3213_v49  ;;  %v3973_v59 = vmul.f32 0.125, %v3215_v50 }
 0x1b4   : > { %5499 = vst [vmem:[#allocation226_spill] sm:$0xff] %v3961_v54  ;;  %v3976_v62 = vmul.f32 0.125, %v3217_v51  ;;  %v3979_v2 = vmul.f32 0.125, %v3220_v60  ;;  %v3982_v44 = vmul.f32 0.125, %v3222_v1  ;;  %v3985_v45 = vmul.f32 0.125, %v3230_v47 }
 0x1b5   : > { %5500 = vst [vmem:[#allocation227_spill] sm:$0xff] %v3964_v40  ;;  %5501 = vst [vmem:[#allocation228_spill] sm:$0xff] %v3967_v57  ;;  %v3988_v46 = vmul.f32 0.125, %v3232_v48  ;;  %v3991_v49 = vmul.f32 0.125, %v3234_v55  ;;  %v3994_v50 = vmul.f32 0.125, %v3237_v63  ;;  %v3997_v51 = vmul.f32 0.125, %v3239_v0 }
 0x1b6   : > { %5502 = vst [vmem:[#allocation229_spill] sm:$0xff] %v3970_v58  ;;  %5503 = vst [vmem:[#allocation230_spill] sm:$0xff] %v3973_v59  ;;  %v4000_v60 = vmul.f32 0.125, %v3241_v3  ;;  %v4003_v1 = vmul.f32 0.125, %v3244_v6  ;;  %v4006_v47 = vmul.f32 0.125, %v3246_v10  ;;  %v4009_v48 = vmul.f32 0.125, %v3254_v12 }
 0x1b7   : > { %5504 = vst [vmem:[#allocation231_spill] sm:$0xff] %v3976_v62  ;;  %5505 = vst [vmem:[#allocation232_spill] sm:$0xff] %v3979_v2  ;;  %v4012_v55 = vmul.f32 0.125, %v3256_v13  ;;  %v4015_v63 = vmul.f32 0.125, %v3258_v14  ;;  %v4018_v0 = vmul.f32 0.125, %v3261_v17  ;;  %v4021_v3 = vmul.f32 0.125, %v3263_v18 }
 0x1b8   : > { %5506 = vst [vmem:[#allocation233_spill] sm:$0xff] %v3982_v44  ;;  %5507 = vst [vmem:[#allocation234_spill] sm:$0xff] %v4006_v47  ;;  %v4024_v6 = vmul.f32 0.125, %v3265_v19  ;;  %v5514_v10 = vld [vmem:[#allocation8_spill] sm:$0xff]  ;;  %v5516_v12 = vld [vmem:[#allocation9_spill] sm:$0xff]  ;;  %v4048_v56 = vmul.f32 0.125, %v5523_v11 }
 0x1b9   : > { %5508 = vst [vmem:[#allocation235_spill] sm:$0xff] %v4009_v48  ;;  %5509 = vst [vmem:[#allocation236_spill] sm:$0xff] %v4012_v55  ;;  %v4027_v5 = vmul.f32 0.125, %v5514_v10  ;;  %v4030_v35 = vmul.f32 0.125, %v5516_v12  ;;  %v5518_v13 = vld [vmem:[#allocation10_spill] sm:$0xff]  ;;  %v5519_v14 = vld [vmem:[#allocation11_spill] sm:$0xff] }
 0x1ba   : > { %5510 = vst [vmem:[#allocation237_spill] sm:$0xff] %v4015_v63  ;;  %5511 = vst [vmem:[#allocation238_spill] sm:$0xff] %v4018_v0  ;;  %v4033_v16 = vmul.f32 0.125, %v5518_v13  ;;  %v4036_v32 = vmul.f32 0.125, %v5519_v14  ;;  %v5520_v17 = vld [vmem:[#allocation12_spill] sm:$0xff]  ;;  %v5521_v18 = vld [vmem:[#allocation13_spill] sm:$0xff] }
 0x1bb   : > { %5512 = vst [vmem:[#allocation239_spill] sm:$0xff] %v4021_v3  ;;  %5513 = vst [vmem:[#allocation240_spill] sm:$0xff] %v4024_v6  ;;  %v4039_v39 = vmul.f32 0.125, %v5520_v17  ;;  %v4042_v25 = vmul.f32 0.125, %v5521_v18  ;;  %v5522_v19 = vld [vmem:[#allocation14_spill] sm:$0xff]  ;;  %v4051_v31 = vmul.f32 0.125, %v5524_v15 }
 0x1bc   : > { %5515 = vst [vmem:[#allocation8_spill] sm:$0xff] %v4027_v5  ;;  %5517 = vst [vmem:[#allocation9_spill] sm:$0xff] %v4030_v35  ;;  %v4045_v27 = vmul.f32 0.125, %v5522_v19  ;;  %v4054_v8 = vmul.f32 0.125, %v5526_v29  ;;  %v4057_v41 = vmul.f32 0.125, %v5528_v20  ;;  %v4060_v7 = vmul.f32 0.125, %v5530_v42 }
 0x1bd   : > { %5525 = vst [vmem:[#allocation10_spill] sm:$0xff] %v4051_v31  ;;  %v4063_v4 = vmul.f32 0.125, %v5532_v38  ;;  %v5534_v10 = vld [vmem:[#allocation21_spill] sm:$0xff]  ;;  %v5536_v13 = vld [vmem:[#allocation22_spill] sm:$0xff]  ;;  %v5538_v17 = vld [vmem:[#allocation23_spill] sm:$0xff]  ;;  %vm2470_vm4 = vcmask 1045509  }
 0x1be   : > { %5527 = vst [vmem:[#allocation11_spill] sm:$0xff] %v4054_v8  ;;  %5529 = vst [vmem:[#allocation12_spill] sm:$0xff] %v4057_v41  ;;  %v4066_v12 = vmul.f32 0.125, %v5534_v10  ;;  %v4069_v14 = vmul.f32 0.125, %v5536_v13  ;;  %v4072_v18 = vmul.f32 0.125, %v5538_v17  ;;  %v5540_v19 = vld [vmem:[#allocation24_spill] sm:$0xff] }
 0x1bf   : > { %5531 = vst [vmem:[#allocation13_spill] sm:$0xff] %v4060_v7  ;;  %5533 = vst [vmem:[#allocation14_spill] sm:$0xff] %v4063_v4  ;;  %v4075_v11 = vmul.f32 0.125, %v5540_v19  ;;  %v5542_v15 = vld [vmem:[#allocation25_spill] sm:$0xff]  ;;  %v5544_v20 = vld [vmem:[#allocation26_spill] sm:$0xff]  ;;  %vm2472_vm5 = vcmask 1046534  }
 0x1c0   : > { %5535 = vst [vmem:[#allocation15_spill] sm:$0xff] %v4066_v12  ;;  %5537 = vst [vmem:[#allocation16_spill] sm:$0xff] %v4069_v14  ;;  %v4078_v29 = vmul.f32 0.125, %v5542_v15  ;;  %v4081_v42 = vmul.f32 0.125, %v5544_v20  ;;  %v5545_v38 = vld [vmem:[#allocation27_spill] sm:$0xff]  ;;  %v5546_v10 = vld [vmem:[#allocation28_spill] sm:$0xff] }
 0x1c1   : > { %5539 = vst [vmem:[#allocation17_spill] sm:$0xff] %v4072_v18  ;;  %5541 = vst [vmem:[#allocation18_spill] sm:$0xff] %v4075_v11  ;;  %v4084_v35 = vmul.f32 0.125, %v5545_v38  ;;  %v4087_v44 = vmul.f32 0.125, %v5546_v10  ;;  %v5547_v13 = vld [vmem:[#allocation29_spill] sm:$0xff]  ;;  %v5548_v17 = vld [vmem:[#allocation30_spill] sm:$0xff] }
 0x1c2   : > { %5543 = vst [vmem:[#allocation19_spill] sm:$0xff] %v4078_v29  ;;  %v4090_v5 = vmul.f32 0.125, %v5547_v13  ;;  %v4093_v2 = vmul.f32 0.125, %v5548_v17  ;;  %v5549_v19 = vld [vmem:[#allocation31_spill] sm:$0xff]  ;;  %v5551_v15 = vld [vmem:[#allocation32_spill] sm:$0xff]  ;;  %v5553_v20 = vld [vmem:[#allocation33_spill] sm:$0xff] }
 0x1c3   : > { %v4096_v11 = vmul.f32 0.125, %v5549_v19  ;;  %v4099_v29 = vmul.f32 0.125, %v5551_v15  ;;  %v4102_v18 = vmul.f32 0.125, %v5553_v20  ;;  %v5555_v38 = vld [vmem:[#allocation34_spill] sm:$0xff]  ;;  %v5557_v10 = vld [vmem:[#allocation35_spill] sm:$0xff]  ;;  %v5559_v13 = vld [vmem:[#allocation36_spill] sm:$0xff] }
 0x1c4   : > { %v4105_v6 = vmul.f32 0.125, %v5555_v38  ;;  %v4108_v62 = vmul.f32 0.125, %v5557_v10  ;;  %v4111_v14 = vmul.f32 0.125, %v5559_v13  ;;  %v5561_v17 = vld [vmem:[#allocation37_spill] sm:$0xff]  ;;  %v5563_v19 = vld [vmem:[#allocation38_spill] sm:$0xff]  ;;  %v5565_v15 = vld [vmem:[#allocation39_spill] sm:$0xff] }
 0x1c5   : > { %5550 = vst [vmem:[#allocation20_spill] sm:$0xff] %v4096_v11  ;;  %5552 = vst [vmem:[#allocation21_spill] sm:$0xff] %v4099_v29  ;;  %v4114_v3 = vmul.f32 0.125, %v5561_v17  ;;  %v4117_v59 = vmul.f32 0.125, %v5563_v19  ;;  %v4120_v12 = vmul.f32 0.125, %v5565_v15  ;;  %v5567_v20 = vld [vmem:[#allocation40_spill] sm:$0xff] }
 0x1c6   : > { %5554 = vst [vmem:[#allocation22_spill] sm:$0xff] %v4102_v18  ;;  %5556 = vst [vmem:[#allocation23_spill] sm:$0xff] %v4105_v6  ;;  %v4123_v4 = vmul.f32 0.125, %v5567_v20  ;;  %v5569_v38 = vld [vmem:[#allocation41_spill] sm:$0xff]  ;;  %v5571_v10 = vld [vmem:[#allocation42_spill] sm:$0xff]  ;;  %vm2474_vm6 = vcmask 1047559  }
 0x1c7   : > { %5558 = vst [vmem:[#allocation24_spill] sm:$0xff] %v4108_v62  ;;  %5560 = vst [vmem:[#allocation25_spill] sm:$0xff] %v4111_v14  ;;  %v4126_v0 = vmul.f32 0.125, %v5569_v38  ;;  %v4129_v62 = vmul.f32 0.125, %v5571_v10  ;;  %v5572_v13 = vld [vmem:[#allocation43_spill] sm:$0xff]  ;;  %v5573_v17 = vld [vmem:[#allocation44_spill] sm:$0xff] }
 0x1c8   : > { %5562 = vst [vmem:[#allocation26_spill] sm:$0xff] %v4114_v3  ;;  %5564 = vst [vmem:[#allocation27_spill] sm:$0xff] %v4117_v59  ;;  %v4132_v14 = vmul.f32 0.125, %v5572_v13  ;;  %v4135_v3 = vmul.f32 0.125, %v5573_v17  ;;  %v5574_v19 = vld [vmem:[#allocation45_spill] sm:$0xff]  ;;  %v5575_v15 = vld [vmem:[#allocation46_spill] sm:$0xff] }
 0x1c9   : > { %5566 = vst [vmem:[#allocation28_spill] sm:$0xff] %v4120_v12  ;;  %5568 = vst [vmem:[#allocation29_spill] sm:$0xff] %v4123_v4  ;;  %v4138_v59 = vmul.f32 0.125, %v5574_v19  ;;  %v4141_v12 = vmul.f32 0.125, %v5575_v15  ;;  %v5577_v20 = vld [vmem:[#allocation47_spill] sm:$0xff]  ;;  %v5579_v38 = vld [vmem:[#allocation48_spill] sm:$0xff] }
 0x1ca   : > { %5570 = vst [vmem:[#allocation30_spill] sm:$0xff] %v4126_v0  ;;  %v4144_v4 = vmul.f32 0.125, %v5577_v20  ;;  %v4147_v0 = vmul.f32 0.125, %v5579_v38  ;;  %v5581_v10 = vld [vmem:[#allocation49_spill] sm:$0xff]  ;;  %v5583_v13 = vld [vmem:[#allocation50_spill] sm:$0xff]  ;;  %v5585_v17 = vld [vmem:[#allocation51_spill] sm:$0xff] }
 0x1cb   : > { %5576 = vst [vmem:[#allocation31_spill] sm:$0xff] %v4141_v12  ;;  %v4150_v58 = vmul.f32 0.125, %v5581_v10  ;;  %v4153_v63 = vmul.f32 0.125, %v5583_v13  ;;  %v4156_v57 = vmul.f32 0.125, %v5585_v17  ;;  %v5587_v19 = vld [vmem:[#allocation52_spill] sm:$0xff]  ;;  %v5589_v15 = vld [vmem:[#allocation53_spill] sm:$0xff] }
 0x1cc   : > { %5578 = vst [vmem:[#allocation32_spill] sm:$0xff] %v4144_v4  ;;  %5580 = vst [vmem:[#allocation33_spill] sm:$0xff] %v4147_v0  ;;  %v4159_v7 = vmul.f32 0.125, %v5587_v19  ;;  %v4162_v6 = vmul.f32 0.125, %v5589_v15  ;;  %v5591_v20 = vld [vmem:[#allocation54_spill] sm:$0xff]  ;;  %v5593_v38 = vld [vmem:[#allocation55_spill] sm:$0xff] }
 0x1cd   : > { %5582 = vst [vmem:[#allocation34_spill] sm:$0xff] %v4150_v58  ;;  %5584 = vst [vmem:[#allocation35_spill] sm:$0xff] %v4153_v63  ;;  %v4165_v55 = vmul.f32 0.125, %v5591_v20  ;;  %v4168_v40 = vmul.f32 0.125, %v5593_v38  ;;  %v5595_v10 = vld [vmem:[#allocation56_spill] sm:$0xff]  ;;  %v5597_v13 = vld [vmem:[#allocation57_spill] sm:$0xff] }
 0x1ce   : > { %5586 = vst [vmem:[#allocation36_spill] sm:$0xff] %v4156_v57  ;;  %5588 = vst [vmem:[#allocation37_spill] sm:$0xff] %v4159_v7  ;;  %v4171_v41 = vmul.f32 0.125, %v5595_v10  ;;  %v4174_v63 = vmul.f32 0.125, %v5597_v13  ;;  %v5599_v17 = vld [vmem:[#allocation58_spill] sm:$0xff]  ;;  %v5600_v19 = vld [vmem:[#allocation59_spill] sm:$0xff] }
 0x1cf   : > { %5590 = vst [vmem:[#allocation38_spill] sm:$0xff] %v4162_v6  ;;  %5592 = vst [vmem:[#allocation39_spill] sm:$0xff] %v4165_v55  ;;  %v4177_v57 = vmul.f32 0.125, %v5599_v17  ;;  %v4180_v7 = vmul.f32 0.125, %v5600_v19  ;;  %v5601_v15 = vld [vmem:[#allocation60_spill] sm:$0xff]  ;;  %v5602_v20 = vld [vmem:[#allocation61_spill] sm:$0xff] }
 0x1d0   : > { %5594 = vst [vmem:[#allocation40_spill] sm:$0xff] %v4168_v40  ;;  %5596 = vst [vmem:[#allocation41_spill] sm:$0xff] %v4171_v41  ;;  %v4183_v6 = vmul.f32 0.125, %v5601_v15  ;;  %v4186_v55 = vmul.f32 0.125, %v5602_v20  ;;  %v5603_v38 = vld [vmem:[#allocation62_spill] sm:$0xff]  ;;  %v5605_v10 = vld [vmem:[#allocation63_spill] sm:$0xff] }
 0x1d1   : > { %5598 = vst [vmem:[#allocation42_spill] sm:$0xff] %v4174_v63  ;;  %v4189_v40 = vmul.f32 0.125, %v5603_v38  ;;  %v4192_v41 = vmul.f32 0.125, %v5605_v10  ;;  %v5607_v13 = vld [vmem:[#allocation64_spill] sm:$0xff]  ;;  %v5609_v17 = vld [vmem:[#allocation65_spill] sm:$0xff]  ;;  %v5611_v19 = vld [vmem:[#allocation66_spill] sm:$0xff] }
 0x1d2   : > { %v4195_v63 = vmul.f32 0.125, %v5607_v13  ;;  %v4198_v48 = vmul.f32 0.125, %v5609_v17  ;;  %v4201_v54 = vmul.f32 0.125, %v5611_v19  ;;  %v5613_v15 = vld [vmem:[#allocation67_spill] sm:$0xff]  ;;  %v5615_v20 = vld [vmem:[#allocation68_spill] sm:$0xff]  ;;  %v5617_v38 = vld [vmem:[#allocation69_spill] sm:$0xff] }
 0x1d3   : > { %5604 = vst [vmem:[#allocation43_spill] sm:$0xff] %v4189_v40  ;;  %5606 = vst [vmem:[#allocation44_spill] sm:$0xff] %v4192_v41  ;;  %v4204_v58 = vmul.f32 0.125, %v5613_v15  ;;  %v4207_v0 = vmul.f32 0.125, %v5615_v20  ;;  %v4210_v18 = vmul.f32 0.125, %v5617_v38  ;;  %v5619_v10 = vld [vmem:[#allocation70_spill] sm:$0xff] }
 0x1d4   : > { %5608 = vst [vmem:[#allocation45_spill] sm:$0xff] %v4195_v63  ;;  %5610 = vst [vmem:[#allocation46_spill] sm:$0xff] %v4198_v48  ;;  %v4213_v41 = vmul.f32 0.125, %v5619_v10  ;;  %v5621_v13 = vld [vmem:[#allocation71_spill] sm:$0xff]  ;;  %v5623_v17 = vld [vmem:[#allocation72_spill] sm:$0xff] }
 0x1d5   : > { %5612 = vst [vmem:[#allocation47_spill] sm:$0xff] %v4201_v54  ;;  %5614 = vst [vmem:[#allocation48_spill] sm:$0xff] %v4204_v58  ;;  %v4216_v63 = vmul.f32 0.125, %v5621_v13  ;;  %v4219_v48 = vmul.f32 0.125, %v5623_v17  ;;  %v5625_v19 = vld [vmem:[#allocation73_spill] sm:$0xff]  ;;  %v5627_v15 = vld [vmem:[#allocation74_spill] sm:$0xff] }
 0x1d6   : > { %5616 = vst [vmem:[#allocation49_spill] sm:$0xff] %v4207_v0  ;;  %5618 = vst [vmem:[#allocation50_spill] sm:$0xff] %v4210_v18  ;;  %v4222_v54 = vmul.f32 0.125, %v5625_v19  ;;  %v4225_v58 = vmul.f32 0.125, %v5627_v15  ;;  %v5628_v20 = vld [vmem:[#allocation75_spill] sm:$0xff]  ;;  %v5629_v38 = vld [vmem:[#allocation76_spill] sm:$0xff] }
 0x1d7   : > { %5620 = vst [vmem:[#allocation51_spill] sm:$0xff] %v4213_v41  ;;  %5622 = vst [vmem:[#allocation52_spill] sm:$0xff] %v4216_v63  ;;  %v4228_v0 = vmul.f32 0.125, %v5628_v20  ;;  %v4231_v18 = vmul.f32 0.125, %v5629_v38  ;;  %v5630_v10 = vld [vmem:[#allocation77_spill] sm:$0xff]  ;;  %v5631_v13 = vld [vmem:[#allocation78_spill] sm:$0xff] }
 0x1d8   : > { %5624 = vst [vmem:[#allocation53_spill] sm:$0xff] %v4219_v48  ;;  %5626 = vst [vmem:[#allocation54_spill] sm:$0xff] %v4222_v54  ;;  %v4234_v41 = vmul.f32 0.125, %v5630_v10  ;;  %v4237_v63 = vmul.f32 0.125, %v5631_v13  ;;  %v5633_v17 = vld [vmem:[#allocation79_spill] sm:$0xff]  ;;  %v5635_v19 = vld [vmem:[#allocation80_spill] sm:$0xff] }
 0x1d9   : > { %v4240_v48 = vmul.f32 0.125, %v5633_v17  ;;  %v4243_v54 = vmul.f32 0.125, %v5635_v19  ;;  %v5637_v15 = vld [vmem:[#allocation81_spill] sm:$0xff]  ;;  %v5639_v20 = vld [vmem:[#allocation82_spill] sm:$0xff]  ;;  %v5641_v38 = vld [vmem:[#allocation83_spill] sm:$0xff] }
 0x1da   : > { %5632 = vst [vmem:[#allocation55_spill] sm:$0xff] %v4237_v63  ;;  %v4246_v29 = vmul.f32 0.125, %v5637_v15  ;;  %v4249_v4 = vmul.f32 0.125, %v5639_v20  ;;  %v4252_v40 = vmul.f32 0.125, %v5641_v38  ;;  %v5643_v10 = vld [vmem:[#allocation84_spill] sm:$0xff]  ;;  %v5645_v13 = vld [vmem:[#allocation85_spill] sm:$0xff] }
 0x1db   : > { %5634 = vst [vmem:[#allocation56_spill] sm:$0xff] %v4240_v48  ;;  %5636 = vst [vmem:[#allocation57_spill] sm:$0xff] %v4243_v54  ;;  %v4255_v8 = vmul.f32 0.125, %v5643_v10  ;;  %v4258_v63 = vmul.f32 0.125, %v5645_v13  ;;  %v5647_v17 = vld [vmem:[#allocation86_spill] sm:$0xff]  ;;  %v5649_v19 = vld [vmem:[#allocation87_spill] sm:$0xff] }
 0x1dc   : > { %5638 = vst [vmem:[#allocation58_spill] sm:$0xff] %v4246_v29  ;;  %5640 = vst [vmem:[#allocation59_spill] sm:$0xff] %v4249_v4  ;;  %v4261_v48 = vmul.f32 0.125, %v5647_v17  ;;  %v4264_v54 = vmul.f32 0.125, %v5649_v19  ;;  %v5651_v15 = vld [vmem:[#allocation88_spill] sm:$0xff]  ;;  %v5653_v20 = vld [vmem:[#allocation89_spill] sm:$0xff] }
 0x1dd   : > { %5642 = vst [vmem:[#allocation60_spill] sm:$0xff] %v4252_v40  ;;  %5644 = vst [vmem:[#allocation61_spill] sm:$0xff] %v4255_v8  ;;  %v4267_v29 = vmul.f32 0.125, %v5651_v15  ;;  %v4270_v4 = vmul.f32 0.125, %v5653_v20  ;;  %v5655_v38 = vld [vmem:[#allocation90_spill] sm:$0xff]  ;;  %v5656_v10 = vld [vmem:[#allocation91_spill] sm:$0xff] }
 0x1de   : > { %5646 = vst [vmem:[#allocation62_spill] sm:$0xff] %v4258_v63  ;;  %5648 = vst [vmem:[#allocation63_spill] sm:$0xff] %v4261_v48  ;;  %v4273_v40 = vmul.f32 0.125, %v5655_v38  ;;  %v4276_v8 = vmul.f32 0.125, %v5656_v10  ;;  %v5657_v13 = vld [vmem:[#allocation92_spill] sm:$0xff]  ;;  %v5658_v17 = vld [vmem:[#allocation93_spill] sm:$0xff] }
 0x1df   : > { %5650 = vst [vmem:[#allocation64_spill] sm:$0xff] %v4264_v54  ;;  %5652 = vst [vmem:[#allocation65_spill] sm:$0xff] %v4267_v29  ;;  %v4279_v63 = vmul.f32 0.125, %v5657_v13  ;;  %v4282_v48 = vmul.f32 0.125, %v5658_v17  ;;  %v5659_v19 = vld [vmem:[#allocation94_spill] sm:$0xff]  ;;  %v5661_v15 = vld [vmem:[#allocation95_spill] sm:$0xff] }
 0x1e0   : > { %5654 = vst [vmem:[#allocation66_spill] sm:$0xff] %v4270_v4  ;;  %v4285_v54 = vmul.f32 0.125, %v5659_v19  ;;  %v4288_v29 = vmul.f32 0.125, %v5661_v15  ;;  %v5663_v20 = vld [vmem:[#allocation96_spill] sm:$0xff]  ;;  %v5665_v38 = vld [vmem:[#allocation97_spill] sm:$0xff]  ;;  %v5667_v10 = vld [vmem:[#allocation98_spill] sm:$0xff] }
 0x1e1   : > { %v4291_v4 = vmul.f32 0.125, %v5663_v20  ;;  %v4294_v31 = vmul.f32 0.125, %v5665_v38  ;;  %v4297_v11 = vmul.f32 0.125, %v5667_v10  ;;  %v5669_v13 = vld [vmem:[#allocation99_spill] sm:$0xff]  ;;  %v5671_v17 = vld [vmem:[#allocation100_spill] sm:$0xff]  ;;  %v5673_v19 = vld [vmem:[#allocation101_spill] sm:$0xff] }
 0x1e2   : > { %5660 = vst [vmem:[#allocation67_spill] sm:$0xff] %v4285_v54  ;;  %5662 = vst [vmem:[#allocation68_spill] sm:$0xff] %v4288_v29  ;;  %v4300_v12 = vmul.f32 0.125, %v5669_v13  ;;  %v4303_v47 = vmul.f32 0.125, %v5671_v17  ;;  %v4306_v54 = vmul.f32 0.125, %v5673_v19  ;;  %v5675_v15 = vld [vmem:[#allocation102_spill] sm:$0xff] }
 0x1e3   : > { %5664 = vst [vmem:[#allocation69_spill] sm:$0xff] %v4291_v4  ;;  %5666 = vst [vmem:[#allocation70_spill] sm:$0xff] %v4294_v31  ;;  %v4309_v29 = vmul.f32 0.125, %v5675_v15  ;;  %v5677_v20 = vld [vmem:[#allocation103_spill] sm:$0xff]  ;;  %v5679_v38 = vld [vmem:[#allocation104_spill] sm:$0xff] }
 0x1e4   : > { %5668 = vst [vmem:[#allocation71_spill] sm:$0xff] %v4297_v11  ;;  %5670 = vst [vmem:[#allocation72_spill] sm:$0xff] %v4300_v12  ;;  %v4312_v4 = vmul.f32 0.125, %v5677_v20  ;;  %v4315_v31 = vmul.f32 0.125, %v5679_v38  ;;  %v5681_v10 = vld [vmem:[#allocation105_spill] sm:$0xff]  ;;  %v5683_v13 = vld [vmem:[#allocation106_spill] sm:$0xff] }
 0x1e5   : > { %5672 = vst [vmem:[#allocation73_spill] sm:$0xff] %v4303_v47  ;;  %5674 = vst [vmem:[#allocation74_spill] sm:$0xff] %v4306_v54  ;;  %v4318_v11 = vmul.f32 0.125, %v5681_v10  ;;  %v4321_v12 = vmul.f32 0.125, %v5683_v13  ;;  %v5685_v17 = vld [vmem:[#allocation107_spill] sm:$0xff]  ;;  %v5687_v19 = vld [vmem:[#allocation108_spill] sm:$0xff] }
 0x1e6   : > { %5676 = vst [vmem:[#allocation75_spill] sm:$0xff] %v4309_v29  ;;  %5678 = vst [vmem:[#allocation76_spill] sm:$0xff] %v4312_v4  ;;  %v4324_v47 = vmul.f32 0.125, %v5685_v17  ;;  %v4327_v54 = vmul.f32 0.125, %v5687_v19  ;;  %v5689_v15 = vld [vmem:[#allocation109_spill] sm:$0xff]  ;;  %v5691_v20 = vld [vmem:[#allocation110_spill] sm:$0xff] }
 0x1e7   : > { %5680 = vst [vmem:[#allocation77_spill] sm:$0xff] %v4315_v31  ;;  %5682 = vst [vmem:[#allocation78_spill] sm:$0xff] %v4318_v11  ;;  %v4330_v29 = vmul.f32 0.125, %v5689_v15  ;;  %v4333_v4 = vmul.f32 0.125, %v5691_v20  ;;  %v5693_v38 = vld [vmem:[#allocation111_spill] sm:$0xff]  ;;  %v5695_v10 = vld [vmem:[#allocation112_spill] sm:$0xff] }
 0x1e8   : > { %5684 = vst [vmem:[#allocation79_spill] sm:$0xff] %v4321_v12  ;;  %5686 = vst [vmem:[#allocation80_spill] sm:$0xff] %v4324_v47  ;;  %v4336_v31 = vmul.f32 0.125, %v5693_v38  ;;  %v4339_v11 = vmul.f32 0.125, %v5695_v10  ;;  %v5697_v13 = vld [vmem:[#allocation113_spill] sm:$0xff]  ;;  %v5699_v17 = vld [vmem:[#allocation114_spill] sm:$0xff] }
 0x1e9   : > { %5688 = vst [vmem:[#allocation81_spill] sm:$0xff] %v4327_v54  ;;  %5690 = vst [vmem:[#allocation82_spill] sm:$0xff] %v4330_v29  ;;  %v4342_v12 = vmul.f32 0.125, %v5697_v13  ;;  %v4345_v47 = vmul.f32 0.125, %v5699_v17  ;;  %v5701_v19 = vld [vmem:[#allocation115_spill] sm:$0xff]  ;;  %v5703_v15 = vld [vmem:[#allocation116_spill] sm:$0xff] }
 0x1ea   : > { %5692 = vst [vmem:[#allocation83_spill] sm:$0xff] %v4333_v4  ;;  %5694 = vst [vmem:[#allocation84_spill] sm:$0xff] %v4336_v31  ;;  %v4348_v54 = vmul.f32 0.125, %v5701_v19  ;;  %v4351_v29 = vmul.f32 0.125, %v5703_v15  ;;  %v5705_v20 = vld [vmem:[#allocation117_spill] sm:$0xff]  ;;  %v5707_v38 = vld [vmem:[#allocation118_spill] sm:$0xff] }
 0x1eb   : > { %5696 = vst [vmem:[#allocation85_spill] sm:$0xff] %v4339_v11  ;;  %5698 = vst [vmem:[#allocation86_spill] sm:$0xff] %v4342_v12  ;;  %v4354_v4 = vmul.f32 0.125, %v5705_v20  ;;  %v4357_v31 = vmul.f32 0.125, %v5707_v38  ;;  %v5709_v10 = vld [vmem:[#allocation119_spill] sm:$0xff]  ;;  %v5711_v13 = vld [vmem:[#allocation120_spill] sm:$0xff] }
 0x1ec   : > { %5700 = vst [vmem:[#allocation87_spill] sm:$0xff] %v4345_v47  ;;  %5702 = vst [vmem:[#allocation88_spill] sm:$0xff] %v4348_v54  ;;  %v4360_v11 = vmul.f32 0.125, %v5709_v10  ;;  %v4363_v12 = vmul.f32 0.125, %v5711_v13  ;;  %v5713_v17 = vld [vmem:[#allocation121_spill] sm:$0xff]  ;;  %v5715_v19 = vld [vmem:[#allocation122_spill] sm:$0xff] }
 0x1ed   : > { %5704 = vst [vmem:[#allocation89_spill] sm:$0xff] %v4351_v29  ;;  %5706 = vst [vmem:[#allocation90_spill] sm:$0xff] %v4354_v4  ;;  %v4366_v47 = vmul.f32 0.125, %v5713_v17  ;;  %v4369_v54 = vmul.f32 0.125, %v5715_v19  ;;  %v5717_v15 = vld [vmem:[#allocation123_spill] sm:$0xff]  ;;  %v5719_v20 = vld [vmem:[#allocation124_spill] sm:$0xff] }
 0x1ee   : > { %5708 = vst [vmem:[#allocation91_spill] sm:$0xff] %v4357_v31  ;;  %5710 = vst [vmem:[#allocation92_spill] sm:$0xff] %v4360_v11  ;;  %v4372_v29 = vmul.f32 0.125, %v5717_v15  ;;  %v4375_v4 = vmul.f32 0.125, %v5719_v20  ;;  %v5721_v38 = vld [vmem:[#allocation125_spill] sm:$0xff]  ;;  %v5723_v10 = vld [vmem:[#allocation126_spill] sm:$0xff] }
 0x1ef   : > { %5712 = vst [vmem:[#allocation93_spill] sm:$0xff] %v4363_v12  ;;  %5714 = vst [vmem:[#allocation94_spill] sm:$0xff] %v4366_v47  ;;  %v4378_v31 = vmul.f32 0.125, %v5721_v38  ;;  %v4381_v11 = vmul.f32 0.125, %v5723_v10  ;;  %v5725_v13 = vld [vmem:[#allocation127_spill] sm:$0xff]  ;;  %v5727_v17 = vld [vmem:[#allocation128_spill] sm:$0xff] }
 0x1f0   : > { %5716 = vst [vmem:[#allocation95_spill] sm:$0xff] %v4369_v54  ;;  %5718 = vst [vmem:[#allocation96_spill] sm:$0xff] %v4372_v29  ;;  %v4384_v12 = vmul.f32 0.125, %v5725_v13  ;;  %v4387_v47 = vmul.f32 0.125, %v5727_v17  ;;  %v5729_v19 = vld [vmem:[#allocation129_spill] sm:$0xff]  ;;  %v5731_v15 = vld [vmem:[#allocation130_spill] sm:$0xff] }
 0x1f1   : > { %5720 = vst [vmem:[#allocation97_spill] sm:$0xff] %v4375_v4  ;;  %5722 = vst [vmem:[#allocation98_spill] sm:$0xff] %v4378_v31  ;;  %v4390_v54 = vmul.f32 0.125, %v5729_v19  ;;  %v4393_v29 = vmul.f32 0.125, %v5731_v15  ;;  %v5733_v20 = vld [vmem:[#allocation131_spill] sm:$0xff]  ;;  %v5735_v38 = vld [vmem:[#allocation132_spill] sm:$0xff] }
 0x1f2   : > { %5724 = vst [vmem:[#allocation99_spill] sm:$0xff] %v4381_v11  ;;  %5726 = vst [vmem:[#allocation100_spill] sm:$0xff] %v4384_v12  ;;  %v4396_v4 = vmul.f32 0.125, %v5733_v20  ;;  %v4399_v31 = vmul.f32 0.125, %v5735_v38  ;;  %v5737_v10 = vld [vmem:[#allocation133_spill] sm:$0xff]  ;;  %v5739_v13 = vld [vmem:[#allocation134_spill] sm:$0xff] }
 0x1f3   : > { %5728 = vst [vmem:[#allocation101_spill] sm:$0xff] %v4387_v47  ;;  %5730 = vst [vmem:[#allocation102_spill] sm:$0xff] %v4390_v54  ;;  %v4402_v11 = vmul.f32 0.125, %v5737_v10  ;;  %v4405_v12 = vmul.f32 0.125, %v5739_v13  ;;  %v5741_v17 = vld [vmem:[#allocation135_spill] sm:$0xff]  ;;  %v5743_v19 = vld [vmem:[#allocation136_spill] sm:$0xff] }
 0x1f4   : > { %5732 = vst [vmem:[#allocation103_spill] sm:$0xff] %v4393_v29  ;;  %5734 = vst [vmem:[#allocation104_spill] sm:$0xff] %v4396_v4  ;;  %v4408_v47 = vmul.f32 0.125, %v5741_v17  ;;  %v4411_v54 = vmul.f32 0.125, %v5743_v19  ;;  %v5745_v15 = vld [vmem:[#allocation137_spill] sm:$0xff]  ;;  %v5747_v20 = vld [vmem:[#allocation138_spill] sm:$0xff] }
 0x1f5   : > { %5736 = vst [vmem:[#allocation105_spill] sm:$0xff] %v4399_v31  ;;  %5738 = vst [vmem:[#allocation106_spill] sm:$0xff] %v4402_v11  ;;  %v4414_v29 = vmul.f32 0.125, %v5745_v15  ;;  %v4417_v4 = vmul.f32 0.125, %v5747_v20  ;;  %v5749_v38 = vld [vmem:[#allocation139_spill] sm:$0xff]  ;;  %v5751_v10 = vld [vmem:[#allocation140_spill] sm:$0xff] }
 0x1f6   : > { %5740 = vst [vmem:[#allocation107_spill] sm:$0xff] %v4405_v12  ;;  %5742 = vst [vmem:[#allocation108_spill] sm:$0xff] %v4408_v47  ;;  %v4420_v31 = vmul.f32 0.125, %v5749_v38  ;;  %v4423_v11 = vmul.f32 0.125, %v5751_v10  ;;  %v5753_v13 = vld [vmem:[#allocation141_spill] sm:$0xff]  ;;  %v5755_v17 = vld [vmem:[#allocation142_spill] sm:$0xff] }
 0x1f7   : > { %5744 = vst [vmem:[#allocation109_spill] sm:$0xff] %v4411_v54  ;;  %5746 = vst [vmem:[#allocation110_spill] sm:$0xff] %v4414_v29  ;;  %v4426_v12 = vmul.f32 0.125, %v5753_v13  ;;  %v4429_v47 = vmul.f32 0.125, %v5755_v17  ;;  %v5757_v19 = vld [vmem:[#allocation143_spill] sm:$0xff]  ;;  %v5759_v15 = vld [vmem:[#allocation144_spill] sm:$0xff] }
 0x1f8   : > { %5748 = vst [vmem:[#allocation111_spill] sm:$0xff] %v4417_v4  ;;  %5750 = vst [vmem:[#allocation112_spill] sm:$0xff] %v4420_v31  ;;  %v4432_v54 = vmul.f32 0.125, %v5757_v19  ;;  %v4435_v29 = vmul.f32 0.125, %v5759_v15  ;;  %v5761_v20 = vld [vmem:[#allocation145_spill] sm:$0xff]  ;;  %v5763_v38 = vld [vmem:[#allocation146_spill] sm:$0xff] }
 0x1f9   : > { %5752 = vst [vmem:[#allocation113_spill] sm:$0xff] %v4423_v11  ;;  %5754 = vst [vmem:[#allocation114_spill] sm:$0xff] %v4426_v12  ;;  %v4438_v4 = vmul.f32 0.125, %v5761_v20  ;;  %v4441_v31 = vmul.f32 0.125, %v5763_v38  ;;  %v5765_v10 = vld [vmem:[#allocation147_spill] sm:$0xff]  ;;  %v5767_v13 = vld [vmem:[#allocation148_spill] sm:$0xff] }
 0x1fa   : > { %5756 = vst [vmem:[#allocation115_spill] sm:$0xff] %v4429_v47  ;;  %5758 = vst [vmem:[#allocation116_spill] sm:$0xff] %v4432_v54  ;;  %v4444_v11 = vmul.f32 0.125, %v5765_v10  ;;  %v4447_v12 = vmul.f32 0.125, %v5767_v13  ;;  %v5769_v17 = vld [vmem:[#allocation149_spill] sm:$0xff]  ;;  %v5771_v19 = vld [vmem:[#allocation150_spill] sm:$0xff] }
 0x1fb   : > { %5760 = vst [vmem:[#allocation117_spill] sm:$0xff] %v4435_v29  ;;  %5762 = vst [vmem:[#allocation118_spill] sm:$0xff] %v4438_v4  ;;  %v4450_v47 = vmul.f32 0.125, %v5769_v17  ;;  %v4453_v54 = vmul.f32 0.125, %v5771_v19  ;;  %v5773_v15 = vld [vmem:[#allocation151_spill] sm:$0xff]  ;;  %v5775_v20 = vld [vmem:[#allocation152_spill] sm:$0xff] }
 0x1fc   : > { %5764 = vst [vmem:[#allocation119_spill] sm:$0xff] %v4441_v31  ;;  %5766 = vst [vmem:[#allocation120_spill] sm:$0xff] %v4444_v11  ;;  %v4456_v29 = vmul.f32 0.125, %v5773_v15  ;;  %v4459_v4 = vmul.f32 0.125, %v5775_v20  ;;  %v5777_v38 = vld [vmem:[#allocation153_spill] sm:$0xff]  ;;  %v5779_v10 = vld [vmem:[#allocation154_spill] sm:$0xff] }
 0x1fd   : > { %5768 = vst [vmem:[#allocation121_spill] sm:$0xff] %v4447_v12  ;;  %5770 = vst [vmem:[#allocation122_spill] sm:$0xff] %v4450_v47  ;;  %v4462_v31 = vmul.f32 0.125, %v5777_v38  ;;  %v4465_v11 = vmul.f32 0.125, %v5779_v10  ;;  %v5781_v13 = vld [vmem:[#allocation155_spill] sm:$0xff]  ;;  %v5783_v17 = vld [vmem:[#allocation156_spill] sm:$0xff] }
 0x1fe   : > { %5772 = vst [vmem:[#allocation123_spill] sm:$0xff] %v4453_v54  ;;  %5774 = vst [vmem:[#allocation124_spill] sm:$0xff] %v4456_v29  ;;  %v4468_v12 = vmul.f32 0.125, %v5781_v13  ;;  %v4471_v47 = vmul.f32 0.125, %v5783_v17  ;;  %v5785_v19 = vld [vmem:[#allocation157_spill] sm:$0xff]  ;;  %v5787_v15 = vld [vmem:[#allocation158_spill] sm:$0xff] }
 0x1ff   : > { %5776 = vst [vmem:[#allocation125_spill] sm:$0xff] %v4459_v4  ;;  %5778 = vst [vmem:[#allocation126_spill] sm:$0xff] %v4462_v31  ;;  %v4474_v54 = vmul.f32 0.125, %v5785_v19  ;;  %v4477_v29 = vmul.f32 0.125, %v5787_v15  ;;  %v5789_v20 = vld [vmem:[#allocation159_spill] sm:$0xff]  ;;  %v5791_v38 = vld [vmem:[#allocation160_spill] sm:$0xff] }
 0x200   : > { %5780 = vst [vmem:[#allocation127_spill] sm:$0xff] %v4465_v11  ;;  %5782 = vst [vmem:[#allocation128_spill] sm:$0xff] %v4468_v12  ;;  %v4480_v4 = vmul.f32 0.125, %v5789_v20  ;;  %v4483_v31 = vmul.f32 0.125, %v5791_v38  ;;  %v5793_v10 = vld [vmem:[#allocation161_spill] sm:$0xff]  ;;  %v5795_v13 = vld [vmem:[#allocation162_spill] sm:$0xff] }
 0x201   : > { %5784 = vst [vmem:[#allocation129_spill] sm:$0xff] %v4471_v47  ;;  %5786 = vst [vmem:[#allocation130_spill] sm:$0xff] %v4474_v54  ;;  %v4486_v11 = vmul.f32 0.125, %v5793_v10  ;;  %v4489_v12 = vmul.f32 0.125, %v5795_v13  ;;  %v5797_v17 = vld [vmem:[#allocation163_spill] sm:$0xff]  ;;  %v5799_v19 = vld [vmem:[#allocation164_spill] sm:$0xff] }
 0x202   : > { %5788 = vst [vmem:[#allocation131_spill] sm:$0xff] %v4477_v29  ;;  %5790 = vst [vmem:[#allocation132_spill] sm:$0xff] %v4480_v4  ;;  %v4492_v47 = vmul.f32 0.125, %v5797_v17  ;;  %v4495_v54 = vmul.f32 0.125, %v5799_v19  ;;  %v5801_v15 = vld [vmem:[#allocation165_spill] sm:$0xff]  ;;  %v5803_v20 = vld [vmem:[#allocation166_spill] sm:$0xff] }
 0x203   : > { %5792 = vst [vmem:[#allocation133_spill] sm:$0xff] %v4483_v31  ;;  %5794 = vst [vmem:[#allocation134_spill] sm:$0xff] %v4486_v11  ;;  %v4498_v29 = vmul.f32 0.125, %v5801_v15  ;;  %v4501_v4 = vmul.f32 0.125, %v5803_v20  ;;  %v5805_v38 = vld [vmem:[#allocation167_spill] sm:$0xff]  ;;  %v5807_v10 = vld [vmem:[#allocation168_spill] sm:$0xff] }
 0x204   : > { %5796 = vst [vmem:[#allocation135_spill] sm:$0xff] %v4489_v12  ;;  %5798 = vst [vmem:[#allocation136_spill] sm:$0xff] %v4492_v47  ;;  %v4504_v31 = vmul.f32 0.125, %v5805_v38  ;;  %v4507_v11 = vmul.f32 0.125, %v5807_v10  ;;  %v5809_v13 = vld [vmem:[#allocation169_spill] sm:$0xff]  ;;  %v5811_v17 = vld [vmem:[#allocation170_spill] sm:$0xff] }
 0x205   : > { %5800 = vst [vmem:[#allocation137_spill] sm:$0xff] %v4495_v54  ;;  %5802 = vst [vmem:[#allocation138_spill] sm:$0xff] %v4498_v29  ;;  %v4510_v12 = vmul.f32 0.125, %v5809_v13  ;;  %v4513_v47 = vmul.f32 0.125, %v5811_v17  ;;  %v5813_v19 = vld [vmem:[#allocation171_spill] sm:$0xff]  ;;  %v5815_v15 = vld [vmem:[#allocation172_spill] sm:$0xff] }
 0x206   : > { %5804 = vst [vmem:[#allocation139_spill] sm:$0xff] %v4501_v4  ;;  %5806 = vst [vmem:[#allocation140_spill] sm:$0xff] %v4504_v31  ;;  %v4516_v54 = vmul.f32 0.125, %v5813_v19  ;;  %v4519_v29 = vmul.f32 0.125, %v5815_v15  ;;  %v5817_v20 = vld [vmem:[#allocation173_spill] sm:$0xff]  ;;  %v5819_v38 = vld [vmem:[#allocation174_spill] sm:$0xff] }
 0x207   : > { %5808 = vst [vmem:[#allocation141_spill] sm:$0xff] %v4507_v11  ;;  %5810 = vst [vmem:[#allocation142_spill] sm:$0xff] %v4510_v12  ;;  %v4522_v4 = vmul.f32 0.125, %v5817_v20  ;;  %v4525_v31 = vmul.f32 0.125, %v5819_v38  ;;  %v5821_v10 = vld [vmem:[#allocation175_spill] sm:$0xff]  ;;  %v5823_v13 = vld [vmem:[#allocation176_spill] sm:$0xff] }
 0x208   : > { %5812 = vst [vmem:[#allocation143_spill] sm:$0xff] %v4513_v47  ;;  %5814 = vst [vmem:[#allocation144_spill] sm:$0xff] %v4516_v54  ;;  %v4528_v11 = vmul.f32 0.125, %v5821_v10  ;;  %v4531_v12 = vmul.f32 0.125, %v5823_v13  ;;  %v5825_v17 = vld [vmem:[#allocation177_spill] sm:$0xff]  ;;  %v5827_v19 = vld [vmem:[#allocation178_spill] sm:$0xff] }
 0x209   : > { %5816 = vst [vmem:[#allocation145_spill] sm:$0xff] %v4519_v29  ;;  %5818 = vst [vmem:[#allocation146_spill] sm:$0xff] %v4522_v4  ;;  %v4534_v47 = vmul.f32 0.125, %v5825_v17  ;;  %v4537_v54 = vmul.f32 0.125, %v5827_v19  ;;  %v5829_v15 = vld [vmem:[#allocation179_spill] sm:$0xff]  ;;  %v5831_v20 = vld [vmem:[#allocation180_spill] sm:$0xff] }
 0x20a   : > { %5820 = vst [vmem:[#allocation147_spill] sm:$0xff] %v4525_v31  ;;  %5822 = vst [vmem:[#allocation148_spill] sm:$0xff] %v4528_v11  ;;  %v4540_v29 = vmul.f32 0.125, %v5829_v15  ;;  %v4543_v4 = vmul.f32 0.125, %v5831_v20  ;;  %v5833_v38 = vld [vmem:[#allocation181_spill] sm:$0xff]  ;;  %v5835_v10 = vld [vmem:[#allocation182_spill] sm:$0xff] }
 0x20b   : > { %5824 = vst [vmem:[#allocation149_spill] sm:$0xff] %v4531_v12  ;;  %5826 = vst [vmem:[#allocation150_spill] sm:$0xff] %v4534_v47  ;;  %v4546_v31 = vmul.f32 0.125, %v5833_v38  ;;  %v4549_v11 = vmul.f32 0.125, %v5835_v10  ;;  %v5837_v13 = vld [vmem:[#allocation183_spill] sm:$0xff]  ;;  %v5839_v17 = vld [vmem:[#allocation184_spill] sm:$0xff] }
 0x20c   : > { %5828 = vst [vmem:[#allocation151_spill] sm:$0xff] %v4537_v54  ;;  %5830 = vst [vmem:[#allocation152_spill] sm:$0xff] %v4540_v29  ;;  %v4552_v12 = vmul.f32 0.125, %v5837_v13  ;;  %v4555_v47 = vmul.f32 0.125, %v5839_v17  ;;  %v5841_v19 = vld [vmem:[#allocation185_spill] sm:$0xff]  ;;  %v5843_v15 = vld [vmem:[#allocation186_spill] sm:$0xff] }
 0x20d   : > { %5832 = vst [vmem:[#allocation153_spill] sm:$0xff] %v4543_v4  ;;  %5834 = vst [vmem:[#allocation154_spill] sm:$0xff] %v4546_v31  ;;  %v4558_v54 = vmul.f32 0.125, %v5841_v19  ;;  %v4561_v29 = vmul.f32 0.125, %v5843_v15  ;;  %v5845_v20 = vld [vmem:[#allocation187_spill] sm:$0xff]  ;;  %v5847_v38 = vld [vmem:[#allocation188_spill] sm:$0xff] }
 0x20e   : > { %5836 = vst [vmem:[#allocation155_spill] sm:$0xff] %v4549_v11  ;;  %5838 = vst [vmem:[#allocation156_spill] sm:$0xff] %v4552_v12  ;;  %v4564_v4 = vmul.f32 0.125, %v5845_v20  ;;  %v4567_v31 = vmul.f32 0.125, %v5847_v38  ;;  %v5849_v10 = vld [vmem:[#allocation189_spill] sm:$0xff]  ;;  %v5851_v13 = vld [vmem:[#allocation190_spill] sm:$0xff] }
 0x20f   : > { %5840 = vst [vmem:[#allocation157_spill] sm:$0xff] %v4555_v47  ;;  %5842 = vst [vmem:[#allocation158_spill] sm:$0xff] %v4558_v54  ;;  %v4570_v11 = vmul.f32 0.125, %v5849_v10  ;;  %v4573_v12 = vmul.f32 0.125, %v5851_v13  ;;  %v5853_v17 = vld [vmem:[#allocation191_spill] sm:$0xff]  ;;  %v5855_v19 = vld [vmem:[#allocation192_spill] sm:$0xff] }
 0x210   : > { %5844 = vst [vmem:[#allocation159_spill] sm:$0xff] %v4561_v29  ;;  %5846 = vst [vmem:[#allocation160_spill] sm:$0xff] %v4564_v4  ;;  %v4576_v47 = vmul.f32 0.125, %v5853_v17  ;;  %v4579_v54 = vmul.f32 0.125, %v5855_v19  ;;  %v5857_v15 = vld [vmem:[#allocation193_spill] sm:$0xff]  ;;  %v5859_v20 = vld [vmem:[#allocation194_spill] sm:$0xff] }
 0x211   : > { %5848 = vst [vmem:[#allocation161_spill] sm:$0xff] %v4567_v31  ;;  %5850 = vst [vmem:[#allocation162_spill] sm:$0xff] %v4570_v11  ;;  %v4582_v29 = vmul.f32 0.125, %v5857_v15  ;;  %v4585_v4 = vmul.f32 0.125, %v5859_v20  ;;  %v5861_v38 = vld [vmem:[#allocation195_spill] sm:$0xff]  ;;  %v5863_v10 = vld [vmem:[#allocation196_spill] sm:$0xff] }
 0x212   : > { %5852 = vst [vmem:[#allocation163_spill] sm:$0xff] %v4573_v12  ;;  %5854 = vst [vmem:[#allocation164_spill] sm:$0xff] %v4576_v47  ;;  %v4588_v31 = vmul.f32 0.125, %v5861_v38  ;;  %v4591_v11 = vmul.f32 0.125, %v5863_v10  ;;  %v5865_v13 = vld [vmem:[#allocation197_spill] sm:$0xff]  ;;  %v5867_v17 = vld [vmem:[#allocation198_spill] sm:$0xff] }
 0x213   : > { %5856 = vst [vmem:[#allocation165_spill] sm:$0xff] %v4579_v54  ;;  %5858 = vst [vmem:[#allocation166_spill] sm:$0xff] %v4582_v29  ;;  %v4594_v12 = vmul.f32 0.125, %v5865_v13  ;;  %v4597_v47 = vmul.f32 0.125, %v5867_v17  ;;  %v5869_v19 = vld [vmem:[#allocation199_spill] sm:$0xff]  ;;  %v5871_v15 = vld [vmem:[#allocation200_spill] sm:$0xff] }
 0x214   : > { %5860 = vst [vmem:[#allocation167_spill] sm:$0xff] %v4585_v4  ;;  %5862 = vst [vmem:[#allocation168_spill] sm:$0xff] %v4588_v31  ;;  %v4600_v54 = vmul.f32 0.125, %v5869_v19  ;;  %v4603_v29 = vmul.f32 0.125, %v5871_v15  ;;  %v5873_v20 = vld [vmem:[#allocation201_spill] sm:$0xff]  ;;  %v5875_v38 = vld [vmem:[#allocation202_spill] sm:$0xff] }
 0x215   : > { %5864 = vst [vmem:[#allocation169_spill] sm:$0xff] %v4591_v11  ;;  %5866 = vst [vmem:[#allocation170_spill] sm:$0xff] %v4594_v12  ;;  %v4606_v4 = vmul.f32 0.125, %v5873_v20  ;;  %v4609_v31 = vmul.f32 0.125, %v5875_v38  ;;  %v5877_v10 = vld [vmem:[#allocation203_spill] sm:$0xff]  ;;  %v5879_v13 = vld [vmem:[#allocation204_spill] sm:$0xff] }
 0x216   : > { %5868 = vst [vmem:[#allocation171_spill] sm:$0xff] %v4597_v47  ;;  %5870 = vst [vmem:[#allocation172_spill] sm:$0xff] %v4600_v54  ;;  %v4612_v11 = vmul.f32 0.125, %v5877_v10  ;;  %v4615_v12 = vmul.f32 0.125, %v5879_v13  ;;  %v5881_v17 = vld [vmem:[#allocation205_spill] sm:$0xff]  ;;  %v5883_v19 = vld [vmem:[#allocation206_spill] sm:$0xff] }
 0x217   : > { %5872 = vst [vmem:[#allocation173_spill] sm:$0xff] %v4603_v29  ;;  %5874 = vst [vmem:[#allocation174_spill] sm:$0xff] %v4606_v4  ;;  %v4618_v47 = vmul.f32 0.125, %v5881_v17  ;;  %v4621_v54 = vmul.f32 0.125, %v5883_v19  ;;  %v5885_v15 = vld [vmem:[#allocation207_spill] sm:$0xff]  ;;  %v5887_v20 = vld [vmem:[#allocation208_spill] sm:$0xff] }
 0x218   : > { %5876 = vst [vmem:[#allocation175_spill] sm:$0xff] %v4609_v31  ;;  %5878 = vst [vmem:[#allocation176_spill] sm:$0xff] %v4612_v11  ;;  %v4624_v29 = vmul.f32 0.125, %v5885_v15  ;;  %v4627_v4 = vmul.f32 0.125, %v5887_v20  ;;  %v5889_v38 = vld [vmem:[#allocation209_spill] sm:$0xff]  ;;  %v5891_v10 = vld [vmem:[#allocation210_spill] sm:$0xff] }
 0x219   : > { %5880 = vst [vmem:[#allocation177_spill] sm:$0xff] %v4615_v12  ;;  %5882 = vst [vmem:[#allocation178_spill] sm:$0xff] %v4618_v47  ;;  %v4630_v31 = vmul.f32 0.125, %v5889_v38  ;;  %v4633_v11 = vmul.f32 0.125, %v5891_v10  ;;  %v5893_v13 = vld [vmem:[#allocation211_spill] sm:$0xff]  ;;  %v5895_v17 = vld [vmem:[#allocation212_spill] sm:$0xff] }
 0x21a   : > { %5884 = vst [vmem:[#allocation179_spill] sm:$0xff] %v4621_v54  ;;  %5886 = vst [vmem:[#allocation180_spill] sm:$0xff] %v4624_v29  ;;  %v4636_v12 = vmul.f32 0.125, %v5893_v13  ;;  %v4639_v47 = vmul.f32 0.125, %v5895_v17  ;;  %v5897_v19 = vld [vmem:[#allocation213_spill] sm:$0xff]  ;;  %v5899_v15 = vld [vmem:[#allocation214_spill] sm:$0xff] }
 0x21b   : > { %5888 = vst [vmem:[#allocation181_spill] sm:$0xff] %v4627_v4  ;;  %5890 = vst [vmem:[#allocation182_spill] sm:$0xff] %v4630_v31  ;;  %v4642_v54 = vmul.f32 0.125, %v5897_v19  ;;  %v4645_v29 = vmul.f32 0.125, %v5899_v15  ;;  %v5901_v20 = vld [vmem:[#allocation215_spill] sm:$0xff]  ;;  %v5903_v38 = vld [vmem:[#allocation216_spill] sm:$0xff] }
 0x21c   : > { %5892 = vst [vmem:[#allocation183_spill] sm:$0xff] %v4633_v11  ;;  %5894 = vst [vmem:[#allocation184_spill] sm:$0xff] %v4636_v12  ;;  %v4648_v4 = vmul.f32 0.125, %v5901_v20  ;;  %v4651_v31 = vmul.f32 0.125, %v5903_v38  ;;  %v5905_v10 = vld [vmem:[#allocation217_spill] sm:$0xff]  ;;  %v5907_v13 = vld [vmem:[#allocation218_spill] sm:$0xff] }
 0x21d   : > { %5896 = vst [vmem:[#allocation185_spill] sm:$0xff] %v4639_v47  ;;  %5898 = vst [vmem:[#allocation186_spill] sm:$0xff] %v4642_v54  ;;  %v4654_v11 = vmul.f32 0.125, %v5905_v10  ;;  %v4657_v12 = vmul.f32 0.125, %v5907_v13  ;;  %v5909_v17 = vld [vmem:[#allocation219_spill] sm:$0xff]  ;;  %v5910_v19 = vld [vmem:[#allocation220_spill] sm:$0xff] }
 0x21e   : > { %5900 = vst [vmem:[#allocation187_spill] sm:$0xff] %v4645_v29  ;;  %5902 = vst [vmem:[#allocation188_spill] sm:$0xff] %v4648_v4  ;;  %v4660_v47 = vmul.f32 0.125, %v5909_v17  ;;  %v4663_v54 = vmul.f32 0.125, %v5910_v19  ;;  %v5911_v15 = vld [vmem:[#allocation221_spill] sm:$0xff]  ;;  %v5912_v20 = vld [vmem:[#allocation222_spill] sm:$0xff] }
 0x21f   : > { %5904 = vst [vmem:[#allocation189_spill] sm:$0xff] %v4651_v31  ;;  %5906 = vst [vmem:[#allocation190_spill] sm:$0xff] %v4654_v11  ;;  %v4666_v29 = vmul.f32 0.125, %v5911_v15  ;;  %v4669_v4 = vmul.f32 0.125, %v5912_v20  ;;  %v5913_v38 = vld [vmem:[#allocation223_spill] sm:$0xff]  ;;  %v5914_v10 = vld [vmem:[#allocation224_spill] sm:$0xff] }
 0x220   : > { %5908 = vst [vmem:[#allocation191_spill] sm:$0xff] %v4657_v12  ;;  %v4672_v31 = vmul.f32 0.125, %v5913_v38  ;;  %v4675_v11 = vmul.f32 0.125, %v5914_v10  ;;  %v5915_v13 = vld [vmem:[#allocation225_spill] sm:$0xff]  ;;  %v4681_v17 = vmul.f32 0.125, %v3920_v34  ;;  %v4684_v19 = vmul.f32 0.125, %v3922_v36 }
 0x221   : > { %v4678_v12 = vmul.f32 0.125, %v5915_v13  ;;  %v4687_v15 = vmul.f32 0.125, %v3924_v9  ;;  %v4690_v20 = vmul.f32 0.125, %v3926_v28  ;;  %v4693_v38 = vmul.f32 0.125, %v3928_v26 }
 0x222   : > { %v4696_v10 = vmul.f32 0.125, %v3930_v33  ;;  %v4699_v13 = vmul.f32 0.125, %v3932_v61  ;;  %v4702_v34 = vmul.f32 0.125, %v3943_v43  ;;  %v2463_v36 = vsel %vm2462_vm0, %v3985_v45, %v3935_v22 }
 0x223   : > { %v2465_v9 = vsel %vm2464_vm1, %v4033_v16, %v2463_v36  ;;  %v2476_v28 = vsel %vm2462_vm0, %v3988_v46, %v3938_v23  ;;  %v2483_v61 = vsel %vm2462_vm0, %v3991_v49, %v3941_v37  ;;  %v2490_v22 = vsel %vm2462_vm0, %v3994_v50, %v3946_v21 }
 0x224   : > { %v2467_v26 = vsel %vm2466_vm2, %v4081_v42, %v2465_v9  ;;  %v2477_v33 = vsel %vm2464_vm1, %v4036_v32, %v2476_v28  ;;  %v2484_v45 = vsel %vm2464_vm1, %v4039_v39, %v2483_v61  ;;  %v2491_v46 = vsel %vm2464_vm1, %v4042_v25, %v2490_v22  ;;  %v5923_v42 = vld [vmem:[#allocation21_spill] sm:$0xff]  ;;  %v5924_v9 = vld [vmem:[#allocation22_spill] sm:$0xff]  ;;  %v5926_v61 = vld [vmem:[#allocation44_spill] sm:$0xff] }
 0x225   : > { %v2469_v43 = vsel %vm2468_vm3, %v4129_v62, %v2467_v26  ;;  %v2478_v23 = vsel %vm2466_vm2, %v4084_v35, %v2477_v33  ;;  %v2485_v21 = vsel %vm2466_vm2, %v4087_v44, %v2484_v45  ;;  %v2492_v62 = vsel %vm2466_vm2, %v4090_v5, %v2491_v46  ;;  %v5925_v26 = vld [vmem:[#allocation55_spill] sm:$0xff]  ;;  %v5928_v45 = vld [vmem:[#allocation34_spill] sm:$0xff] }
 0x226   : > { %v2471_v16 = vsel %vm2470_vm4, %v4177_v57, %v2469_v43  ;;  %v2479_v37 = vsel %vm2468_vm3, %v4132_v14, %v2478_v23  ;;  %v2486_v35 = vsel %vm2468_vm3, %v4135_v3, %v2485_v21  ;;  %v2493_v57 = vsel %vm2468_vm3, %v4138_v59, %v2492_v62  ;;  %v5927_v43 = vld [vmem:[#allocation33_spill] sm:$0xff]  ;;  %v5930_v21 = vld [vmem:[#allocation56_spill] sm:$0xff] }
 0x227   : > { %v2473_v49 = vsel %vm2472_vm5, %v4225_v58, %v2471_v16  ;;  %v2480_v50 = vsel %vm2470_vm4, %v4180_v7, %v2479_v37  ;;  %v2487_v5 = vsel %vm2470_vm4, %v4183_v6, %v2486_v35  ;;  %v2494_v58 = vsel %vm2470_vm4, %v4186_v55, %v2493_v57  ;;  %v5929_v16 = vld [vmem:[#allocation67_spill] sm:$0xff]  ;;  %v5932_v35 = vld [vmem:[#allocation46_spill] sm:$0xff] }
 0x228   : > { %v2475_v32 = vsel %vm2474_vm6, %v4273_v40, %v2473_v49  ;;  %v2481_v44 = vsel %vm2472_vm5, %v4228_v0, %v2480_v50  ;;  %v2488_v3 = vsel %vm2472_vm5, %v4231_v18, %v2487_v5  ;;  %v2495_v59 = vsel %vm2472_vm5, %v4234_v41, %v2494_v58  ;;  %v5921_v18 = vld [vmem:[#allocation43_spill] sm:$0xff]  ;;  %v5931_v49 = vld [vmem:[#allocation45_spill] sm:$0xff] }
 0x229   : > { %v2482_v39 = vsel %vm2474_vm6, %v4276_v8, %v2481_v44  ;;  %v2497_v40 = vsel %vm2462_vm0, %v3997_v51, %v3949_v24  ;;  %2725 = vst [vmem:[%s4764_s24] sm:$0xff] %v2475_v32  ;;  %v2489_v55 = vsel %vm2474_vm6, %v4279_v63, %v2488_v3  ;;  %v2496_v0 = vsel %vm2474_vm6, %v4282_v48, %v2495_v59  ;;  %v5916_v48 = vld [vmem:[#allocation234_spill] sm:$0xff]  ;;  %v5933_v32 = vld [vmem:[#allocation68_spill] sm:$0xff]  ;;  %v5934_v5 = vld [vmem:[#allocation57_spill] sm:$0xff] }
 0x22a   : > { %v2498_v6 = vsel %vm2464_vm1, %v4045_v27, %v2497_v40  ;;  %v2504_v24 = vsel %vm2462_vm0, %v4000_v60, %v3952_v30  ;;  %2726 = vst [vmem:[%s4764_s24 + $0x8] sm:$0xff] %v2482_v39  ;;  %v2511_v63 = vsel %vm2462_vm0, %v4003_v1, %v3955_v52  ;;  %v2518_v8 = vsel %vm2462_vm0, %v5916_v48, %v3958_v53  ;;  %v5917_v27 = vld [vmem:[#allocation31_spill] sm:$0xff]  ;;  %v5918_v60 = vld [vmem:[#allocation20_spill] sm:$0xff]  ;;  %v5935_v39 = vld [vmem:[#allocation58_spill] sm:$0xff] }
 0x22b   : > { %v2499_v51 = vsel %vm2466_vm2, %v4093_v2, %v2498_v6  ;;  %v2505_v25 = vsel %vm2464_vm1, %v4048_v56, %v2504_v24  ;;  %2727 = vst [vmem:[%s4764_s24 + $0x10] sm:$0xff] %v2489_v55  ;;  %2728 = vst [vmem:[%s4764_s24 + $0x18] sm:$0xff] %v2496_v0  ;;  %v5919_v2 = vld [vmem:[#allocation10_spill] sm:$0xff]  ;;  %v5920_v56 = vld [vmem:[#allocation11_spill] sm:$0xff] }
 0x22c   : > { %v2500_v30 = vsel %vm2468_vm3, %v5917_v27, %v2499_v51  ;;  %v2506_v41 = vsel %vm2466_vm2, %v5918_v60, %v2505_v25  ;;  %v2512_v7 = vsel %vm2464_vm1, %v5919_v2, %v2511_v63  ;;  %v2519_v14 = vsel %vm2464_vm1, %v5920_v56, %v2518_v8  ;;  %v5922_v1 = vld [vmem:[#allocation32_spill] sm:$0xff]  ;;  %v5936_v59 = vld [vmem:[#allocation226_spill] sm:$0xff]  ;;  %v5937_v40 = vld [vmem:[#allocation235_spill] sm:$0xff] }
 0x22d   : > { %v2501_v52 = vsel %vm2470_vm4, %v5921_v18, %v2500_v30  ;;  %v2507_v53 = vsel %vm2468_vm3, %v5922_v1, %v2506_v41  ;;  %v2513_v36 = vsel %vm2466_vm2, %v5923_v42, %v2512_v7  ;;  %v2520_v28 = vsel %vm2466_vm2, %v5924_v9, %v2519_v14  ;;  %v5938_v0 = vld [vmem:[#allocation69_spill] sm:$0xff]  ;;  %v5939_v24 = vld [vmem:[#allocation70_spill] sm:$0xff]  ;;  %v5940_v25 = vld [vmem:[#allocation12_spill] sm:$0xff] }
 0x22e   : > { %v2502_v33 = vsel %vm2472_vm5, %v5925_v26, %v2501_v52  ;;  %v2508_v22 = vsel %vm2470_vm4, %v5926_v61, %v2507_v53  ;;  %v2514_v23 = vsel %vm2468_vm3, %v5927_v43, %v2513_v36  ;;  %v2521_v46 = vsel %vm2468_vm3, %v5928_v45, %v2520_v28  ;;  %v5941_v48 = vld [vmem:[#allocation227_spill] sm:$0xff]  ;;  %v5942_v8 = vld [vmem:[#allocation236_spill] sm:$0xff]  ;;  %v5944_v41 = vld [vmem:[#allocation13_spill] sm:$0xff] }
 0x22f   : > { %v2503_v37 = vsel %vm2474_vm6, %v5929_v16, %v2502_v33  ;;  %v2509_v62 = vsel %vm2472_vm5, %v5930_v21, %v2508_v22  ;;  %v2515_v50 = vsel %vm2470_vm4, %v5931_v49, %v2514_v23  ;;  %v2522_v57 = vsel %vm2470_vm4, %v5932_v35, %v2521_v46  ;;  %v5943_v30 = vld [vmem:[#allocation23_spill] sm:$0xff]  ;;  %v5945_v7 = vld [vmem:[#allocation228_spill] sm:$0xff]  ;;  %v5946_v56 = vld [vmem:[#allocation237_spill] sm:$0xff] }
 0x230   : > { %v2510_v44 = vsel %vm2474_vm6, %v5933_v32, %v2509_v62  ;;  %v2516_v58 = vsel %vm2472_vm5, %v5934_v5, %v2515_v50  ;;  %v2523_v3 = vsel %vm2472_vm5, %v5935_v39, %v2522_v57  ;;  %v2525_v55 = vsel %vm2462_vm0, %v5937_v40, %v5936_v59  ;;  %2729 = vst [vmem:[%s4764_s24 + $0x20] sm:$0xff] %v2503_v37  ;;  %v5947_v18 = vld [vmem:[#allocation229_spill] sm:$0xff]  ;;  %v5948_v52 = vld [vmem:[#allocation238_spill] sm:$0xff]  ;;  %v5949_v53 = vld [vmem:[#allocation35_spill] sm:$0xff] }
 0x231   : > { %v2517_v6 = vsel %vm2474_vm6, %v5938_v0, %v2516_v58  ;;  %v2524_v51 = vsel %vm2474_vm6, %v5939_v24, %v2523_v3  ;;  %v2526_v63 = vsel %vm2464_vm1, %v5940_v25, %v2525_v55  ;;  %v2532_v27 = vsel %vm2462_vm0, %v5942_v8, %v5941_v48  ;;  %2730 = vst [vmem:[%s4764_s24 + $0x28] sm:$0xff] %v2510_v44  ;;  %v5950_v36 = vld [vmem:[#allocation24_spill] sm:$0xff]  ;;  %v5951_v28 = vld [vmem:[#allocation14_spill] sm:$0xff]  ;;  %v5952_v33 = vld [vmem:[#allocation15_spill] sm:$0xff] }
 0x232   : > { %v2527_v60 = vsel %vm2466_vm2, %v5943_v30, %v2526_v63  ;;  %v2533_v2 = vsel %vm2464_vm1, %v5944_v41, %v2532_v27  ;;  %v2539_v14 = vsel %vm2462_vm0, %v5946_v56, %v5945_v7  ;;  %v2546_v1 = vsel %vm2462_vm0, %v5948_v52, %v5947_v18  ;;  %2731 = vst [vmem:[%s4764_s24 + $0x30] sm:$0xff] %v2517_v6  ;;  %v5953_v22 = vld [vmem:[#allocation47_spill] sm:$0xff]  ;;  %v5954_v23 = vld [vmem:[#allocation36_spill] sm:$0xff]  ;;  %v5955_v46 = vld [vmem:[#allocation25_spill] sm:$0xff] }
 0x233   : > { %2732 = vst [vmem:[%s4764_s24 + $0x38] sm:$0xff] %v2524_v51  ;;  %v2528_v42 = vsel %vm2468_vm3, %v5949_v53, %v2527_v60  ;;  %v2534_v9 = vsel %vm2466_vm2, %v5950_v36, %v2533_v2  ;;  %v2540_v26 = vsel %vm2464_vm1, %v5951_v28, %v2539_v14  ;;  %v2547_v61 = vsel %vm2464_vm1, %v5952_v33, %v2546_v1  ;;  %v5956_v37 = vld [vmem:[#allocation26_spill] sm:$0xff]  ;;  %v5957_v62 = vld [vmem:[#allocation59_spill] sm:$0xff]  ;;  %v5958_v50 = vld [vmem:[#allocation48_spill] sm:$0xff] }
 0x234   : > { %v2529_v43 = vsel %vm2470_vm4, %v5953_v22, %v2528_v42  ;;  %v2535_v45 = vsel %vm2468_vm3, %v5954_v23, %v2534_v9  ;;  %v2541_v16 = vsel %vm2466_vm2, %v5955_v46, %v2540_v26  ;;  %v2548_v21 = vsel %vm2466_vm2, %v5956_v37, %v2547_v61  ;;  %v5959_v57 = vld [vmem:[#allocation37_spill] sm:$0xff]  ;;  %v5960_v44 = vld [vmem:[#allocation38_spill] sm:$0xff]  ;;  %v5961_v58 = vld [vmem:[#allocation71_spill] sm:$0xff] }
 0x235   : > { %v2530_v49 = vsel %vm2472_vm5, %v5957_v62, %v2529_v43  ;;  %v2536_v35 = vsel %vm2470_vm4, %v5958_v50, %v2535_v45  ;;  %v2542_v32 = vsel %vm2468_vm3, %v5959_v57, %v2541_v16  ;;  %v2549_v5 = vsel %vm2468_vm3, %v5960_v44, %v2548_v21  ;;  %v5962_v3 = vld [vmem:[#allocation60_spill] sm:$0xff]  ;;  %v5963_v40 = vld [vmem:[#allocation49_spill] sm:$0xff]  ;;  %v5964_v0 = vld [vmem:[#allocation50_spill] sm:$0xff] }
 0x236   : > { %v2531_v39 = vsel %vm2474_vm6, %v5961_v58, %v2530_v49  ;;  %v2537_v59 = vsel %vm2472_vm5, %v5962_v3, %v2536_v35  ;;  %v2543_v55 = vsel %vm2470_vm4, %v5963_v40, %v2542_v32  ;;  %v2550_v6 = vsel %vm2470_vm4, %v5964_v0, %v2549_v5  ;;  %v5965_v24 = vld [vmem:[#allocation72_spill] sm:$0xff]  ;;  %v5966_v25 = vld [vmem:[#allocation61_spill] sm:$0xff]  ;;  %v5967_v48 = vld [vmem:[#allocation62_spill] sm:$0xff] }
 0x237   : > { %v2538_v51 = vsel %vm2474_vm6, %v5965_v24, %v2537_v59  ;;  %v2544_v63 = vsel %vm2472_vm5, %v5966_v25, %v2543_v55  ;;  %v2551_v8 = vsel %vm2472_vm5, %v5967_v48, %v2550_v6  ;;  %v5968_v27 = vld [vmem:[#allocation230_spill] sm:$0xff]  ;;  %v5969_v30 = vld [vmem:[#allocation239_spill] sm:$0xff]  ;;  %2733 = vst [vmem:[%s4764_s24 + $0x40] sm:$0xff] %v2531_v39  ;;  %v5970_v41 = vld [vmem:[#allocation73_spill] sm:$0xff] }
 0x238   : > { %v2553_v60 = vsel %vm2462_vm0, %v5969_v30, %v5968_v27  ;;  %v2545_v2 = vsel %vm2474_vm6, %v5970_v41, %v2544_v63  ;;  %v5971_v7 = vld [vmem:[#allocation74_spill] sm:$0xff]  ;;  %v5972_v14 = vld [vmem:[#allocation16_spill] sm:$0xff]  ;;  %v5973_v52 = vld [vmem:[#allocation231_spill] sm:$0xff]  ;;  %2734 = vst [vmem:[%s4764_s24 + $0x48] sm:$0xff] %v2538_v51 }
 0x239   : > { %v2552_v56 = vsel %vm2474_vm6, %v5971_v7, %v2551_v8  ;;  %v2554_v18 = vsel %vm2464_vm1, %v5972_v14, %v2553_v60  ;;  %v5974_v1 = vld [vmem:[#allocation240_spill] sm:$0xff]  ;;  %v5975_v42 = vld [vmem:[#allocation27_spill] sm:$0xff]  ;;  %v5976_v9 = vld [vmem:[#allocation17_spill] sm:$0xff]  ;;  %2735 = vst [vmem:[%s4764_s24 + $0x50] sm:$0xff] %v2545_v2 }
 0x23a   : > { %v2560_v53 = vsel %vm2462_vm0, %v5974_v1, %v5973_v52  ;;  %v2555_v36 = vsel %vm2466_vm2, %v5975_v42, %v2554_v18  ;;  %v5977_v26 = vld [vmem:[#allocation232_spill] sm:$0xff]  ;;  %v5979_v22 = vld [vmem:[#allocation233_spill] sm:$0xff]  ;;  %2736 = vst [vmem:[%s4764_s24 + $0x58] sm:$0xff] %v2552_v56  ;;  %v5981_v45 = vld [vmem:[#allocation39_spill] sm:$0xff] }
 0x23b   : > { %v2561_v28 = vsel %vm2464_vm1, %v5976_v9, %v2560_v53  ;;  %v5978_v33 = vld [vmem:[#allocation8_spill] sm:$0xff]  ;;  %v5980_v43 = vld [vmem:[#allocation9_spill] sm:$0xff]  ;;  %v2556_v46 = vsel %vm2468_vm3, %v5981_v45, %v2555_v36  ;;  %v5983_v21 = vld [vmem:[#allocation18_spill] sm:$0xff] }
 0x23c   : > { %v2567_v61 = vsel %vm2462_vm0, %v5978_v33, %v5977_v26  ;;  %v2574_v23 = vsel %vm2462_vm0, %v5980_v43, %v5979_v22  ;;  %v5982_v16 = vld [vmem:[#allocation28_spill] sm:$0xff]  ;;  %v5984_v49 = vld [vmem:[#allocation19_spill] sm:$0xff]  ;;  %v5987_v5 = vld [vmem:[#allocation29_spill] sm:$0xff] }
 0x23d   : > { %v2562_v37 = vsel %vm2466_vm2, %v5982_v16, %v2561_v28  ;;  %v2568_v62 = vsel %vm2464_vm1, %v5983_v21, %v2567_v61  ;;  %v2575_v50 = vsel %vm2464_vm1, %v5984_v49, %v2574_v23  ;;  %v5985_v35 = vld [vmem:[#allocation51_spill] sm:$0xff]  ;;  %v5986_v32 = vld [vmem:[#allocation40_spill] sm:$0xff]  ;;  %v5988_v39 = vld [vmem:[#allocation30_spill] sm:$0xff] }
 0x23e   : > { %v2557_v57 = vsel %vm2470_vm4, %v5985_v35, %v2556_v46  ;;  %v2563_v44 = vsel %vm2468_vm3, %v5986_v32, %v2562_v37  ;;  %v2569_v58 = vsel %vm2466_vm2, %v5987_v5, %v2568_v62  ;;  %v2576_v3 = vsel %vm2466_vm2, %v5988_v39, %v2575_v50  ;;  %v5989_v59 = vld [vmem:[#allocation63_spill] sm:$0xff]  ;;  %v5990_v55 = vld [vmem:[#allocation52_spill] sm:$0xff]  ;;  %v5991_v6 = vld [vmem:[#allocation41_spill] sm:$0xff] }
 0x23f   : > { %v2558_v40 = vsel %vm2472_vm5, %v5989_v59, %v2557_v57  ;;  %v2564_v0 = vsel %vm2470_vm4, %v5990_v55, %v2563_v44  ;;  %v2570_v24 = vsel %vm2468_vm3, %v5991_v6, %v2569_v58  ;;  %v5992_v51 = vld [vmem:[#allocation42_spill] sm:$0xff]  ;;  %v5993_v63 = vld [vmem:[#allocation75_spill] sm:$0xff]  ;;  %v5994_v8 = vld [vmem:[#allocation64_spill] sm:$0xff] }
 0x240   : > { %v2577_v25 = vsel %vm2468_vm3, %v5992_v51, %v2576_v3  ;;  %v2559_v48 = vsel %vm2474_vm6, %v5993_v63, %v2558_v40  ;;  %v2565_v27 = vsel %vm2472_vm5, %v5994_v8, %v2564_v0  ;;  %v5995_v30 = vld [vmem:[#allocation53_spill] sm:$0xff]  ;;  %v5996_v41 = vld [vmem:[#allocation54_spill] sm:$0xff]  ;;  %v5997_v7 = vld [vmem:[#allocation76_spill] sm:$0xff] }
 0x241   : > { %v2571_v60 = vsel %vm2470_vm4, %v5995_v30, %v2570_v24  ;;  %v2578_v2 = vsel %vm2470_vm4, %v5996_v41, %v2577_v25  ;;  %v2566_v56 = vsel %vm2474_vm6, %v5997_v7, %v2565_v27  ;;  %v5998_v14 = vld [vmem:[#allocation65_spill] sm:$0xff]  ;;  %v5999_v52 = vld [vmem:[#allocation66_spill] sm:$0xff]  ;;  %v6000_v53 = vld [vmem:[#allocation79_spill] sm:$0xff]  ;;  %2737 = vst [vmem:[%s4764_s24 + $0x60] sm:$0xff] %v2559_v48 }
 0x242   : > { %v2572_v18 = vsel %vm2472_vm5, %v5998_v14, %v2571_v60  ;;  %v2579_v1 = vsel %vm2472_vm5, %v5999_v52, %v2578_v2  ;;  %v6001_v42 = vld [vmem:[#allocation95_spill] sm:$0xff]  ;;  %v6002_v9 = vld [vmem:[#allocation77_spill] sm:$0xff]  ;;  %v6003_v26 = vld [vmem:[#allocation78_spill] sm:$0xff]  ;;  %2738 = vst [vmem:[%s4764_s24 + $0x68] sm:$0xff] %v2566_v56 }
 0x243   : > { %v2581_v36 = vsel %vm2462_vm0, %v6001_v42, %v6000_v53  ;;  %v2573_v28 = vsel %vm2474_vm6, %v6002_v9, %v2572_v18  ;;  %v2580_v33 = vsel %vm2474_vm6, %v6003_v26, %v2579_v1  ;;  %v6004_v61 = vld [vmem:[#allocation111_spill] sm:$0xff]  ;;  %v6005_v43 = vld [vmem:[#allocation80_spill] sm:$0xff]  ;;  %v6009_v62 = vld [vmem:[#allocation81_spill] sm:$0xff] }
 0x244   : > { %v2582_v22 = vsel %vm2464_vm1, %v6004_v61, %v2581_v36  ;;  %v6006_v23 = vld [vmem:[#allocation96_spill] sm:$0xff]  ;;  %v6007_v46 = vld [vmem:[#allocation127_spill] sm:$0xff]  ;;  %v6010_v49 = vld [vmem:[#allocation97_spill] sm:$0xff]  ;;  %2739 = vst [vmem:[%s4764_s24 + $0x70] sm:$0xff] %v2573_v28 }
 0x245   : > { %v2588_v45 = vsel %vm2462_vm0, %v6006_v23, %v6005_v43  ;;  %v2583_v16 = vsel %vm2466_vm2, %v6007_v46, %v2582_v22  ;;  %v6008_v37 = vld [vmem:[#allocation112_spill] sm:$0xff]  ;;  %v2595_v50 = vsel %vm2462_vm0, %v6010_v49, %v6009_v62  ;;  %v6011_v35 = vld [vmem:[#allocation82_spill] sm:$0xff]  ;;  %2740 = vst [vmem:[%s4764_s24 + $0x78] sm:$0xff] %v2580_v33  ;;  %v6013_v44 = vld [vmem:[#allocation143_spill] sm:$0xff] }
 0x246   : > { %v2589_v21 = vsel %vm2464_vm1, %v6008_v37, %v2588_v45  ;;  %v6012_v57 = vld [vmem:[#allocation98_spill] sm:$0xff]  ;;  %v2584_v5 = vsel %vm2468_vm3, %v6013_v44, %v2583_v16  ;;  %v6014_v58 = vld [vmem:[#allocation128_spill] sm:$0xff]  ;;  %v6015_v3 = vld [vmem:[#allocation113_spill] sm:$0xff] }
 0x247   : > { %v2602_v32 = vsel %vm2462_vm0, %v6012_v57, %v6011_v35  ;;  %v2590_v39 = vsel %vm2466_vm2, %v6014_v58, %v2589_v21  ;;  %v2596_v59 = vsel %vm2464_vm1, %v6015_v3, %v2595_v50  ;;  %v6016_v40 = vld [vmem:[#allocation114_spill] sm:$0xff]  ;;  %v6017_v0 = vld [vmem:[#allocation159_spill] sm:$0xff]  ;;  %v6018_v24 = vld [vmem:[#allocation144_spill] sm:$0xff] }
 0x248   : > { %v2603_v55 = vsel %vm2464_vm1, %v6016_v40, %v2602_v32  ;;  %v2585_v6 = vsel %vm2470_vm4, %v6017_v0, %v2584_v5  ;;  %v2591_v51 = vsel %vm2468_vm3, %v6018_v24, %v2590_v39  ;;  %v6019_v25 = vld [vmem:[#allocation129_spill] sm:$0xff]  ;;  %v6020_v48 = vld [vmem:[#allocation130_spill] sm:$0xff]  ;;  %v6021_v27 = vld [vmem:[#allocation175_spill] sm:$0xff] }
 0x249   : > { %v2597_v63 = vsel %vm2466_vm2, %v6019_v25, %v2596_v59  ;;  %v2604_v8 = vsel %vm2466_vm2, %v6020_v48, %v2603_v55  ;;  %v2586_v30 = vsel %vm2472_vm5, %v6021_v27, %v2585_v6  ;;  %v6022_v60 = vld [vmem:[#allocation160_spill] sm:$0xff]  ;;  %v6023_v2 = vld [vmem:[#allocation145_spill] sm:$0xff]  ;;  %v6024_v56 = vld [vmem:[#allocation146_spill] sm:$0xff] }
 0x24a   : > { %v2592_v41 = vsel %vm2470_vm4, %v6022_v60, %v2591_v51  ;;  %v2598_v7 = vsel %vm2468_vm3, %v6023_v2, %v2597_v63  ;;  %v2605_v14 = vsel %vm2468_vm3, %v6024_v56, %v2604_v8  ;;  %v6025_v18 = vld [vmem:[#allocation191_spill] sm:$0xff]  ;;  %v6026_v1 = vld [vmem:[#allocation176_spill] sm:$0xff]  ;;  %v6027_v42 = vld [vmem:[#allocation161_spill] sm:$0xff] }
 0x24b   : > { %v2587_v52 = vsel %vm2474_vm6, %v6025_v18, %v2586_v30  ;;  %v2593_v53 = vsel %vm2472_vm5, %v6026_v1, %v2592_v41  ;;  %v2599_v36 = vsel %vm2470_vm4, %v6027_v42, %v2598_v7  ;;  %v6028_v9 = vld [vmem:[#allocation162_spill] sm:$0xff]  ;;  %v6029_v33 = vld [vmem:[#allocation177_spill] sm:$0xff]  ;;  %v6031_v23 = vld [vmem:[#allocation83_spill] sm:$0xff] }
 0x24c   : > { %v2606_v28 = vsel %vm2470_vm4, %v6028_v9, %v2605_v14  ;;  %v2594_v26 = vsel %vm2474_vm6, %v4660_v47, %v2593_v53  ;;  %v2600_v61 = vsel %vm2472_vm5, %v6029_v33, %v2599_v36  ;;  %v6030_v22 = vld [vmem:[#allocation178_spill] sm:$0xff]  ;;  %v6032_v45 = vld [vmem:[#allocation99_spill] sm:$0xff]  ;;  %2741 = vst [vmem:[%s4764_s24 + $0x80] sm:$0xff] %v2587_v52  ;;  %v6034_v62 = vld [vmem:[#allocation84_spill] sm:$0xff] }
 0x24d   : > { %v2607_v43 = vsel %vm2472_vm5, %v6030_v22, %v2606_v28  ;;  %v2609_v46 = vsel %vm2462_vm0, %v6032_v45, %v6031_v23  ;;  %v2601_v16 = vsel %vm2474_vm6, %v4663_v54, %v2600_v61  ;;  %v6033_v21 = vld [vmem:[#allocation115_spill] sm:$0xff]  ;;  %v6035_v49 = vld [vmem:[#allocation100_spill] sm:$0xff]  ;;  %2742 = vst [vmem:[%s4764_s24 + $0x88] sm:$0xff] %v2594_v26  ;;  %v6038_v5 = vld [vmem:[#allocation85_spill] sm:$0xff] }
 0x24e   : > { %v2608_v37 = vsel %vm2474_vm6, %v4666_v29, %v2607_v43  ;;  %v2610_v47 = vsel %vm2464_vm1, %v6033_v21, %v2609_v46  ;;  %v2616_v50 = vsel %vm2462_vm0, %v6035_v49, %v6034_v62  ;;  %v6036_v35 = vld [vmem:[#allocation131_spill] sm:$0xff]  ;;  %v6037_v32 = vld [vmem:[#allocation116_spill] sm:$0xff]  ;;  %v6039_v58 = vld [vmem:[#allocation101_spill] sm:$0xff]  ;;  %2743 = vst [vmem:[%s4764_s24 + $0x90] sm:$0xff] %v2601_v16 }
 0x24f   : > { %v2611_v57 = vsel %vm2466_vm2, %v6036_v35, %v2610_v47  ;;  %v2617_v44 = vsel %vm2464_vm1, %v6037_v32, %v2616_v50  ;;  %v2623_v54 = vsel %vm2462_vm0, %v6039_v58, %v6038_v5  ;;  %v6040_v39 = vld [vmem:[#allocation86_spill] sm:$0xff]  ;;  %2744 = vst [vmem:[%s4764_s24 + $0x98] sm:$0xff] %v2608_v37  ;;  %v6042_v59 = vld [vmem:[#allocation147_spill] sm:$0xff]  ;;  %v6043_v55 = vld [vmem:[#allocation132_spill] sm:$0xff] }
 0x250   : > { %v6041_v29 = vld [vmem:[#allocation102_spill] sm:$0xff]  ;;  %v2612_v40 = vsel %vm2468_vm3, %v6042_v59, %v2611_v57  ;;  %v2618_v0 = vsel %vm2466_vm2, %v6043_v55, %v2617_v44  ;;  %v6044_v6 = vld [vmem:[#allocation117_spill] sm:$0xff]  ;;  %v6046_v63 = vld [vmem:[#allocation163_spill] sm:$0xff] }
 0x251   : > { %v2630_v3 = vsel %vm2462_vm0, %v6041_v29, %v6040_v39  ;;  %v2624_v24 = vsel %vm2464_vm1, %v6044_v6, %v2623_v54  ;;  %v6045_v51 = vld [vmem:[#allocation118_spill] sm:$0xff]  ;;  %v2613_v48 = vsel %vm2470_vm4, %v6046_v63, %v2612_v40  ;;  %v6047_v8 = vld [vmem:[#allocation148_spill] sm:$0xff]  ;;  %v6048_v30 = vld [vmem:[#allocation133_spill] sm:$0xff] }
 0x252   : > { %v2631_v25 = vsel %vm2464_vm1, %v6045_v51, %v2630_v3  ;;  %v2619_v27 = vsel %vm2468_vm3, %v6047_v8, %v2618_v0  ;;  %v2625_v60 = vsel %vm2466_vm2, %v6048_v30, %v2624_v24  ;;  %v6049_v41 = vld [vmem:[#allocation134_spill] sm:$0xff]  ;;  %v6050_v7 = vld [vmem:[#allocation179_spill] sm:$0xff]  ;;  %v6051_v14 = vld [vmem:[#allocation164_spill] sm:$0xff] }
 0x253   : > { %v2632_v2 = vsel %vm2466_vm2, %v6049_v41, %v2631_v25  ;;  %v2614_v56 = vsel %vm2472_vm5, %v6050_v7, %v2613_v48  ;;  %v2620_v18 = vsel %vm2470_vm4, %v6051_v14, %v2619_v27  ;;  %v6052_v52 = vld [vmem:[#allocation149_spill] sm:$0xff]  ;;  %v6053_v53 = vld [vmem:[#allocation150_spill] sm:$0xff]  ;;  %v6054_v9 = vld [vmem:[#allocation180_spill] sm:$0xff] }
 0x254   : > { %v2626_v1 = vsel %vm2468_vm3, %v6052_v52, %v2625_v60  ;;  %v2633_v42 = vsel %vm2468_vm3, %v6053_v53, %v2632_v2  ;;  %v2615_v36 = vsel %vm2474_vm6, %v4669_v4, %v2614_v56  ;;  %v2621_v28 = vsel %vm2472_vm5, %v6054_v9, %v2620_v18  ;;  %v6055_v26 = vld [vmem:[#allocation165_spill] sm:$0xff]  ;;  %v6056_v61 = vld [vmem:[#allocation166_spill] sm:$0xff]  ;;  %v6059_v16 = vld [vmem:[#allocation87_spill] sm:$0xff] }
 0x255   : > { %v2627_v33 = vsel %vm2470_vm4, %v6055_v26, %v2626_v1  ;;  %v2634_v22 = vsel %vm2470_vm4, %v6056_v61, %v2633_v42  ;;  %v2622_v43 = vsel %vm2474_vm6, %v4672_v31, %v2621_v28  ;;  %v6057_v23 = vld [vmem:[#allocation181_spill] sm:$0xff]  ;;  %v6058_v46 = vld [vmem:[#allocation182_spill] sm:$0xff]  ;;  %v6060_v37 = vld [vmem:[#allocation103_spill] sm:$0xff]  ;;  %2745 = vst [vmem:[%s4764_s24 + $0xa0] sm:$0xff] %v2615_v36 }
 0x256   : > { %v2628_v45 = vsel %vm2472_vm5, %v6057_v23, %v2627_v33  ;;  %v2635_v4 = vsel %vm2472_vm5, %v6058_v46, %v2634_v22  ;;  %v2637_v21 = vsel %vm2462_vm0, %v6060_v37, %v6059_v16  ;;  %v6061_v49 = vld [vmem:[#allocation119_spill] sm:$0xff]  ;;  %v6062_v50 = vld [vmem:[#allocation88_spill] sm:$0xff]  ;;  %2746 = vst [vmem:[%s4764_s24 + $0xa8] sm:$0xff] %v2622_v43  ;;  %v6066_v54 = vld [vmem:[#allocation89_spill] sm:$0xff] }
 0x257   : > { %v2629_v47 = vsel %vm2474_vm6, %v4675_v11, %v2628_v45  ;;  %v2636_v62 = vsel %vm2474_vm6, %v4678_v12, %v2635_v4  ;;  %v2638_v31 = vsel %vm2464_vm1, %v6061_v49, %v2637_v21  ;;  %v6063_v35 = vld [vmem:[#allocation104_spill] sm:$0xff]  ;;  %v6064_v32 = vld [vmem:[#allocation135_spill] sm:$0xff]  ;;  %v6067_v39 = vld [vmem:[#allocation105_spill] sm:$0xff] }
 0x258   : > { %v2644_v57 = vsel %vm2462_vm0, %v6063_v35, %v6062_v50  ;;  %v2639_v44 = vsel %vm2466_vm2, %v6064_v32, %v2638_v31  ;;  %v6065_v5 = vld [vmem:[#allocation120_spill] sm:$0xff]  ;;  %v2651_v11 = vsel %vm2462_vm0, %v6067_v39, %v6066_v54  ;;  %v6068_v29 = vld [vmem:[#allocation90_spill] sm:$0xff]  ;;  %2747 = vst [vmem:[%s4764_s24 + $0xb0] sm:$0xff] %v2629_v47  ;;  %2748 = vst [vmem:[%s4764_s24 + $0xb8] sm:$0xff] %v2636_v62 }
 0x259   : > { %v2645_v58 = vsel %vm2464_vm1, %v6065_v5, %v2644_v57  ;;  %v6069_v12 = vld [vmem:[#allocation106_spill] sm:$0xff]  ;;  %v6070_v59 = vld [vmem:[#allocation151_spill] sm:$0xff]  ;;  %v6071_v55 = vld [vmem:[#allocation136_spill] sm:$0xff] }
 0x25a   : > { %v2658_v3 = vsel %vm2462_vm0, %v6069_v12, %v6068_v29  ;;  %v2640_v40 = vsel %vm2468_vm3, %v6070_v59, %v2639_v44  ;;  %v2646_v0 = vsel %vm2466_vm2, %v6071_v55, %v2645_v58  ;;  %v6072_v6 = vld [vmem:[#allocation121_spill] sm:$0xff]  ;;  %v6073_v51 = vld [vmem:[#allocation122_spill] sm:$0xff]  ;;  %v6074_v63 = vld [vmem:[#allocation167_spill] sm:$0xff] }
 0x25b   : > { %v2652_v24 = vsel %vm2464_vm1, %v6072_v6, %v2651_v11  ;;  %v2659_v25 = vsel %vm2464_vm1, %v6073_v51, %v2658_v3  ;;  %v2641_v48 = vsel %vm2470_vm4, %v6074_v63, %v2640_v40  ;;  %v6075_v8 = vld [vmem:[#allocation152_spill] sm:$0xff]  ;;  %v6076_v30 = vld [vmem:[#allocation137_spill] sm:$0xff]  ;;  %v6077_v41 = vld [vmem:[#allocation138_spill] sm:$0xff] }
 0x25c   : > { %v2647_v27 = vsel %vm2468_vm3, %v6075_v8, %v2646_v0  ;;  %v2653_v60 = vsel %vm2466_vm2, %v6076_v30, %v2652_v24  ;;  %v2660_v2 = vsel %vm2466_vm2, %v6077_v41, %v2659_v25  ;;  %v6078_v7 = vld [vmem:[#allocation183_spill] sm:$0xff]  ;;  %v6079_v14 = vld [vmem:[#allocation168_spill] sm:$0xff]  ;;  %v6080_v52 = vld [vmem:[#allocation153_spill] sm:$0xff] }
 0x25d   : > { %v2642_v56 = vsel %vm2472_vm5, %v6078_v7, %v2641_v48  ;;  %v2648_v18 = vsel %vm2470_vm4, %v6079_v14, %v2647_v27  ;;  %v2654_v1 = vsel %vm2468_vm3, %v6080_v52, %v2653_v60  ;;  %v6081_v53 = vld [vmem:[#allocation154_spill] sm:$0xff]  ;;  %v6082_v9 = vld [vmem:[#allocation184_spill] sm:$0xff]  ;;  %v6083_v26 = vld [vmem:[#allocation169_spill] sm:$0xff] }
 0x25e   : > { %v2661_v42 = vsel %vm2468_vm3, %v6081_v53, %v2660_v2  ;;  %v2643_v36 = vsel %vm2474_vm6, %v4681_v17, %v2642_v56  ;;  %v2649_v28 = vsel %vm2472_vm5, %v6082_v9, %v2648_v18  ;;  %v2655_v33 = vsel %vm2470_vm4, %v6083_v26, %v2654_v1  ;;  %v6084_v61 = vld [vmem:[#allocation170_spill] sm:$0xff]  ;;  %v6085_v23 = vld [vmem:[#allocation185_spill] sm:$0xff]  ;;  %v6087_v4 = vld [vmem:[#allocation91_spill] sm:$0xff] }
 0x25f   : > { %v2662_v22 = vsel %vm2470_vm4, %v6084_v61, %v2661_v42  ;;  %v2650_v43 = vsel %vm2474_vm6, %v4684_v19, %v2649_v28  ;;  %v2656_v45 = vsel %vm2472_vm5, %v6085_v23, %v2655_v33  ;;  %v6086_v46 = vld [vmem:[#allocation186_spill] sm:$0xff]  ;;  %v6088_v16 = vld [vmem:[#allocation107_spill] sm:$0xff]  ;;  %2749 = vst [vmem:[%s4764_s24 + $0xc0] sm:$0xff] %v2643_v36  ;;  %v6090_v49 = vld [vmem:[#allocation92_spill] sm:$0xff] }
 0x260   : > { %v2663_v17 = vsel %vm2472_vm5, %v6086_v46, %v2662_v22  ;;  %v2665_v37 = vsel %vm2462_vm0, %v6088_v16, %v6087_v4  ;;  %v2657_v21 = vsel %vm2474_vm6, %v4687_v15, %v2656_v45  ;;  %v6089_v19 = vld [vmem:[#allocation123_spill] sm:$0xff]  ;;  %v6091_v31 = vld [vmem:[#allocation108_spill] sm:$0xff]  ;;  %2750 = vst [vmem:[%s4764_s24 + $0xc8] sm:$0xff] %v2650_v43  ;;  %v6094_v5 = vld [vmem:[#allocation93_spill] sm:$0xff] }
 0x261   : > { %v2664_v47 = vsel %vm2474_vm6, %v4690_v20, %v2663_v17  ;;  %v2666_v62 = vsel %vm2464_vm1, %v6089_v19, %v2665_v37  ;;  %v2672_v50 = vsel %vm2462_vm0, %v6091_v31, %v6090_v49  ;;  %v6092_v35 = vld [vmem:[#allocation139_spill] sm:$0xff]  ;;  %v6093_v32 = vld [vmem:[#allocation124_spill] sm:$0xff]  ;;  %v6095_v15 = vld [vmem:[#allocation109_spill] sm:$0xff]  ;;  %2751 = vst [vmem:[%s4764_s24 + $0xd0] sm:$0xff] %v2657_v21 }
 0x262   : > { %v2667_v57 = vsel %vm2466_vm2, %v6092_v35, %v2666_v62  ;;  %v2673_v44 = vsel %vm2464_vm1, %v6093_v32, %v2672_v50  ;;  %v2679_v58 = vsel %vm2462_vm0, %v6095_v15, %v6094_v5  ;;  %v6096_v54 = vld [vmem:[#allocation94_spill] sm:$0xff]  ;;  %2752 = vst [vmem:[%s4764_s24 + $0xd8] sm:$0xff] %v2664_v47  ;;  %v6098_v11 = vld [vmem:[#allocation155_spill] sm:$0xff]  ;;  %v6099_v12 = vld [vmem:[#allocation140_spill] sm:$0xff] }
 0x263   : > { %v6097_v20 = vld [vmem:[#allocation110_spill] sm:$0xff]  ;;  %v2668_v29 = vsel %vm2468_vm3, %v6098_v11, %v2667_v57  ;;  %v2674_v3 = vsel %vm2466_vm2, %v6099_v12, %v2673_v44  ;;  %v6100_v59 = vld [vmem:[#allocation125_spill] sm:$0xff]  ;;  %v6102_v6 = vld [vmem:[#allocation171_spill] sm:$0xff] }
 0x264   : > { %v2686_v39 = vsel %vm2462_vm0, %v6097_v20, %v6096_v54  ;;  %v2680_v40 = vsel %vm2464_vm1, %v6100_v59, %v2679_v58  ;;  %v6101_v55 = vld [vmem:[#allocation126_spill] sm:$0xff]  ;;  %v2669_v24 = vsel %vm2470_vm4, %v6102_v6, %v2668_v29  ;;  %v6103_v51 = vld [vmem:[#allocation156_spill] sm:$0xff]  ;;  %v6104_v63 = vld [vmem:[#allocation141_spill] sm:$0xff] }
 0x265   : > { %v2687_v0 = vsel %vm2464_vm1, %v6101_v55, %v2686_v39  ;;  %v2675_v25 = vsel %vm2468_vm3, %v6103_v51, %v2674_v3  ;;  %v2681_v48 = vsel %vm2466_vm2, %v6104_v63, %v2680_v40  ;;  %v6105_v8 = vld [vmem:[#allocation142_spill] sm:$0xff]  ;;  %v6106_v30 = vld [vmem:[#allocation187_spill] sm:$0xff]  ;;  %v6107_v41 = vld [vmem:[#allocation172_spill] sm:$0xff] }
 0x266   : > { %v2688_v27 = vsel %vm2466_vm2, %v6105_v8, %v2687_v0  ;;  %v2670_v60 = vsel %vm2472_vm5, %v6106_v30, %v2669_v24  ;;  %v2676_v2 = vsel %vm2470_vm4, %v6107_v41, %v2675_v25  ;;  %v6108_v7 = vld [vmem:[#allocation157_spill] sm:$0xff]  ;;  %v6109_v14 = vld [vmem:[#allocation158_spill] sm:$0xff]  ;;  %v6110_v1 = vld [vmem:[#allocation188_spill] sm:$0xff] }
 0x267   : > { %v2682_v56 = vsel %vm2468_vm3, %v6108_v7, %v2681_v48  ;;  %v2689_v18 = vsel %vm2468_vm3, %v6109_v14, %v2688_v27  ;;  %v2671_v52 = vsel %vm2474_vm6, %v4693_v38, %v2670_v60  ;;  %v2677_v53 = vsel %vm2472_vm5, %v6110_v1, %v2676_v2  ;;  %v6111_v42 = vld [vmem:[#allocation173_spill] sm:$0xff]  ;;  %v6112_v9 = vld [vmem:[#allocation174_spill] sm:$0xff] }
 0x268   : > { %v2683_v36 = vsel %vm2470_vm4, %v6111_v42, %v2682_v56  ;;  %v2690_v28 = vsel %vm2470_vm4, %v6112_v9, %v2689_v18  ;;  %v2678_v38 = vsel %vm2474_vm6, %v4696_v10, %v2677_v53  ;;  %v6113_v26 = vld [vmem:[#allocation189_spill] sm:$0xff]  ;;  %v6114_v61 = vld [vmem:[#allocation190_spill] sm:$0xff]  ;;  %2753 = vst [vmem:[%s4764_s24 + $0xe0] sm:$0xff] %v2671_v52 }
 0x269   : > { %v2684_v33 = vsel %vm2472_vm5, %v6113_v26, %v2683_v36  ;;  %v2691_v22 = vsel %vm2472_vm5, %v6114_v61, %v2690_v28  ;;  %2754 = vst [vmem:[%s4764_s24 + $0xe8] sm:$0xff] %v2678_v38 }
 0x26a   : > { %v2685_v43 = vsel %vm2474_vm6, %v4699_v13, %v2684_v33  ;;  %v2692_v23 = vsel %vm2474_vm6, %v4702_v34, %v2691_v22 }
 0x26b   : > { %2755 = vst [vmem:[%s4764_s24 + $0xf0] sm:$0xff] %v2685_v43  ;;  %2756 = vst [vmem:[%s4764_s24 + $0xf8] sm:$0xff] %v2692_v23 }
 0x26c   : > { %2989 = shalt.err (!%p2986_p6)
}
 0x26d   : > { %s2990_s5 = scalar_lea.hbm %s5210_s28, 4096  ;;  %s2994_s15 = scalar_lea.hbm %s5275_s1, 8192 }
 0x26e   : > { %p2991_p7 = scmp.ne.s32.totalorder %s5210_s28, %s2990_s5  ;;  %p2995_p13 = scmp.lt.s32.totalorder %s5210_s28, %s5275_s1 }
 0x26f   : > { %p2996_p2 = scmp.lt.s32.totalorder %s2994_s15, %s2990_s5 }
 0x270   : > { %p2992_p10 = pnand %p2991_p7, %p3125_p9 }
 0x271   : > { %p2997_p8 = por %p2996_p2, %p2995_p13 }
 0x272   : > { %p2993_p4 = pneg %p2992_p10 }
 0x274   : > { %p2998_p12 = pnand %p2997_p8, %p2993_p4 }
 0x276   : > { %3001 = shalt.err (!%p2998_p12)
}
 0x277   : > { %s3062_s23 = smov 2048   ;;  %s3063_s18 = smov 128  }
 0x278   : > { %2884 = dma.vmem_to_hbm [thread:$0]  (%p3125_p9), %s5212_s26, 4096, %s5210_s28, %s2758_s29, %s3062_s23, %s3062_s23, %s3063_s18  }
 0x279 PF: > { %s2789_s24 = sand.u32 1, %s3036_s6   ;;  %p6115_p0 = scmp.ge.s32.totalorder %s3056_s11, 2 }
 0x27a   : > { %s2790_s25 = scalar_lea.sflag [#allocation4], %s2789_s24 }
 0x27b   : > { %p2891_p1 = pnand %p6115_p0, %p3132_p11 }
 0x27d   : > { %p2892_p3 = pneg %p2891_p1 }
 0x27f   : > { %3031 = dma.done.wait (%p2892_p3), %s2790_s25, 4096  }
 0x280   : > { %3033 = vsyncadd (%p2892_p3), %s2790_s25, 4294963200  ;;  %s17_s11 = sadd.s32 1, %s3056_s11   ;;  %s6116_s6 = smov %s3040_s7 }
 0x281   : > { %p14_p5 = scmp.ge.s32.totalorder %s17_s11, 4   ;;  %s6117_s7 = smov %s3044_s8 }
 0x282   : > { %s6118_s8 = smov %s3130_s20  ;;  %s6119_s9 = smov %s3052_s10 }
 0x283   : > { %s6120_s10 = smov %s6122_s14  ;;  %16 = sbr.rel (!%p14_p5) target bundleno = 6 (0x6), region = 69 }
 0x288   :  { %2795 = vsyncpa [#allocation3], 1 }
 0x289   :  { %2797 = vsyncpa [#allocation3 + $0x1], 1 }
 0x28a   :  { %2798 = vsyncpa [#allocation4], 1 }
 0x28b   :  { %2800 = vsyncpa [#allocation4 + $0x1], 1 }

</bundles_post_ra>
